<compile_context>
chip_gen: v7x
topology: tpu7x:2x2x1
jax: 0.10.0
libtpu: 0.0.40
codegen_flags: <defaults>
</compile_context>

<pallas_src>
import functools

import jax
import jax.numpy as jnp
from jax.experimental import pallas as pl
from jax.experimental.pallas import tpu as pltpu


def _pick_block_n(n):
    """Largest divisor of n (<= 8) that still leaves >= 2 grid steps."""
    best = 1
    for cand in range(2, min(n, 8) + 1):
        if n % cand == 0 and n // cand >= 2:
            best = cand
    return best


def _downblock_kernel(x_ref, w1_ref, b1_ref, w2_ref, b2_ref, o_ref, *,
                      dilation, pool, single_matmul, compute_dtype):
    d = dilation
    nb, H, W, Cin = x_ref.shape
    Cout = b1_ref.shape[-1]

    H2 = H // 2 if pool else H
    W2 = W // 2 if pool else W
    Ho1, Wo1 = H2 + 2 - 2 * d, W2 + 2 - 2 * d
    Ho2, Wo2 = Ho1 + 2 - 2 * d, Wo1 + 2 - 2 * d

    # ---- MaxPool2d(kernel_size=2, stride=2); floor-truncates odd H/W ------
    if pool:
        x = x_ref[...][:, :2 * H2, :2 * W2, :]
        # H pooling: split an OUTER dim (layout-free) and reduce on the VPU.
        xh = jnp.max(x.reshape(nb, H2, 2, 2 * W2, Cin), axis=2)
        # W pooling: one sublane split + reduce.
        xp = jnp.max(xh.reshape(nb, H2, W2, 2, Cin), axis=3)
    else:
        xp = x_ref[...]

    def conv3x3_relu(inp, hi, wi, ho, wo, ci, w_ref, b_ref, co):
        inp = inp.astype(compute_dtype)
        # Zero-pad by 1: H-pad via outer-dim concat (cheap), W-pad via sublane
        # concat.  Pure value ops — no scratch refs / init ordering issues.
        zrow = jnp.zeros((nb, 1, wi, ci), compute_dtype)
        zcol = jnp.zeros((nb, hi + 2, 1, ci), compute_dtype)
        xpad = jnp.concatenate([zrow, inp, zrow], axis=1)
        xpad = jnp.concatenate([zcol, xpad, zcol], axis=2)   # (nb, hi+2, wi+2, ci)

        m = nb * ho * wo
        # Tap (ky, kx) of the dilated 3x3 conv (pad=1): padded-coord window
        # [ky*d : ky*d + ho, kx*d : kx*d + wo].
        taps = [xpad[:, ky * d:ky * d + ho, kx * d:kx * d + wo, :]
                for ky in range(3) for kx in range(3)]
        if single_matmul:
            # im2col: one K = 9*ci MXU matmul instead of nine K = ci matmuls.
            cat = jnp.concatenate(taps, axis=-1).reshape(m, 9 * ci)
            acc = jnp.dot(cat, w_ref[...], preferred_element_type=jnp.float32)
        else:
            acc = jnp.zeros((m, co), jnp.float32)
            for t_idx, t in enumerate(taps):
                acc = acc + jnp.dot(t.reshape(m, ci),
                                    w_ref[pl.ds(t_idx * ci, ci), :],
                                    preferred_element_type=jnp.float32)
        # Bias + ReLU stay in f32 (v5e has no bf16 VPU).
        out = jnp.maximum(acc + b_ref[...], 0.0)
        return out.reshape(nb, ho, wo, co)

    h1 = conv3x3_relu(xp, H2, W2, Ho1, Wo1, Cin, w1_ref, b1_ref, Cout)
    h2 = conv3x3_relu(h1, Ho1, Wo1, Ho2, Wo2, Cout, w2_ref, b2_ref, Cout)

    # Full-extent last-two-dims store (contiguous HBM writeback region).
    o_ref[...] = h2.reshape(nb, Ho2 * Wo2, Cout).astype(o_ref.dtype)


def _downblock_pallas(x_nchw, params, *, dilation, pool, compute_dtype,
                      single_matmul):
    w1, b1, w2, b2 = params                     # w: OIHW, b: (Cout,)
    N, Cin, H, W = x_nchw.shape
    Cout = w1.shape[0]
    d = int(dilation)
    assert d >= 1

    H2, W2 = (H // 2, W // 2) if pool else (H, W)   # PyTorch pool floor-truncates
    Ho1, Wo1 = H2 + 2 - 2 * d, W2 + 2 - 2 * d
    Ho2, Wo2 = Ho1 + 2 - 2 * d, Wo1 + 2 - 2 * d
    assert min(H2, W2, Ho1, Wo1, Ho2, Wo2) >= 1, \
        "spatial dims collapse for this (size, dilation, pool) combination"

    nb = _pick_block_n(N)
    grid = (N // nb,)

    x = jnp.transpose(x_nchw, (0, 2, 3, 1)).astype(jnp.float32)        # NHWC
    # OIHW -> (ky, kx, Cin, Cout) -> (9*Cin, Cout): tap-major rows match the
    # in-kernel im2col concat order.
    w1k = jnp.transpose(w1, (2, 3, 1, 0)).reshape(9 * Cin, Cout).astype(compute_dtype)
    w2k = jnp.transpose(w2, (2, 3, 1, 0)).reshape(9 * Cout, Cout).astype(compute_dtype)
    b1k = b1.reshape(1, Cout).astype(jnp.float32)
    b2k = b2.reshape(1, Cout).astype(jnp.float32)

    kernel = functools.partial(_downblock_kernel, dilation=d, pool=pool,
                               single_matmul=single_matmul,
                               compute_dtype=compute_dtype)

    cbytes = jnp.dtype(compute_dtype).itemsize
    est = (2 * nb * H * W * Cin * 4                          # double-buffered input
           + 2 * nb * Ho2 * Wo2 * Cout * 4                   # double-buffered output
           + 2 * (9 * Cin * Cout + 9 * Cout * Cout) * cbytes # weights
           + 4 * Cout * 4                                    # biases
           + nb * (H2 + 2) * (W2 + 2) * Cin * cbytes         # padded conv1 input
           + nb * (Ho1 + 2) * (Wo1 + 2) * Cout * cbytes      # padded conv2 input
           + nb * Ho1 * Wo1 * (9 * Cin * cbytes + Cout * 4)  # im2col + acc conv1
           + nb * Ho2 * Wo2 * (9 * Cout * cbytes + Cout * 4))  # im2col + acc conv2
    vmem_limit = int(min(max(2 * est, 32 * 1024 * 1024), 64 * 1024 * 1024))
    # TODO(synk): for production-sized images add an H row-strip grid axis with
    # a 2*dilation halo so blocks also fit v7x's 64 MiB VMEM.

    out = pl.pallas_call(
        kernel,
        out_shape=jax.ShapeDtypeStruct((N, Ho2 * Wo2, Cout), jnp.float32),
        grid_spec=pltpu.PrefetchScalarGridSpec(
            num_scalar_prefetch=0,
            grid=grid,
            in_specs=[
                pl.BlockSpec((nb, H, W, Cin), lambda n: (n, 0, 0, 0)),
                pl.BlockSpec((9 * Cin, Cout), lambda n: (0, 0)),
                pl.BlockSpec((1, Cout), lambda n: (0, 0)),
                pl.BlockSpec((9 * Cout, Cout), lambda n: (0, 0)),
                pl.BlockSpec((1, Cout), lambda n: (0, 0)),
            ],
            out_specs=pl.BlockSpec((nb, Ho2 * Wo2, Cout), lambda n: (n, 0, 0)),
        ),
        compiler_params=pltpu.CompilerParams(
            dimension_semantics=("parallel",),
            vmem_limit_bytes=vmem_limit,
        ),
    )(x, w1k, b1k, w2k, b2k)

    out = out.reshape(N, Ho2, Wo2, Cout)
    return jnp.transpose(out, (0, 3, 1, 2))                 # back to NCHW


def downblock_forward(x_nchw, params, *, dilation=1, pool=True,
                      compute_dtype=jnp.float32):
    """x_nchw: (N, Cin, H, W) f32. Returns (N, Cout, Ho, Wo) f32 (NCHW)."""
    try:
        return _downblock_pallas(x_nchw, params, dilation=dilation, pool=pool,
                                 compute_dtype=compute_dtype, single_matmul=True)
    except Exception:
        # Conservative Pallas fallback (per-tap matmul accumulation) in case
        # the running Mosaic build rejects the unaligned lane concat.
        return _downblock_pallas(x_nchw, params, dilation=dilation, pool=pool,
                                 compute_dtype=compute_dtype, single_matmul=False)


def downblock_reference(x_nchw, params, *, dilation=1, pool=True):
    """Pure-JAX reference (lax conv / reduce_window) for correctness check."""
    w1, b1, w2, b2 = params
    x = x_nchw.astype(jnp.float32)
    if pool:
        x = jax.lax.reduce_window(x, -jnp.inf, jax.lax.max,
                                  (1, 1, 2, 2), (1, 1, 2, 2), 'VALID')

    def conv(x, w, b):
        dn = jax.lax.conv_dimension_numbers(x.shape, w.shape,
                                            ('NCHW', 'OIHW', 'NCHW'))
        y = jax.lax.conv_general_dilated(
            x, w, window_strides=(1, 1), padding=[(1, 1), (1, 1)],
            rhs_dilation=(dilation, dilation), dimension_numbers=dn,
            precision=jax.lax.Precision.HIGHEST)
        return jnp.maximum(y + b[None, :, None, None], 0.0)

    x = conv(x, w1, b1)
    x = conv(x, w2, b2)
    return x


def init_params(key, inchannels, outchannels):
    """Deterministic init mimicking the module: kaiming_normal_ on conv weights."""
    k1, k2, k3, k4 = jax.random.split(key, 4)
    fan1 = inchannels * 9
    fan2 = outchannels * 9
    w1 = jax.random.normal(k1, (outchannels, inchannels, 3, 3), jnp.float32) * jnp.sqrt(2.0 / fan1)
    w2 = jax.random.normal(k2, (outchannels, outchannels, 3, 3), jnp.float32) * jnp.sqrt(2.0 / fan2)
    # PyTorch Conv2d default bias init: U(-1/sqrt(fan_in), 1/sqrt(fan_in))
    b1 = jax.random.uniform(k3, (outchannels,), jnp.float32,
                            -1.0 / jnp.sqrt(fan1), 1.0 / jnp.sqrt(fan1))
    b2 = jax.random.uniform(k4, (outchannels,), jnp.float32,
                            -1.0 / jnp.sqrt(fan2), 1.0 / jnp.sqrt(fan2))
    return (w1, b1, w2, b2)


if __name__ == "__main__":
    key = jax.random.PRNGKey(0)
    kx, kp = jax.random.split(key)

    N, Cin, H, W = 2, 4, 16, 16
    Cout = 8
    dilation = 1
    pool = True

    x = jax.random.normal(kx, (N, Cin, H, W), jnp.float32)
    params = init_params(kp, Cin, Cout)

    ref = jax.block_until_ready(
        downblock_reference(x, params, dilation=dilation, pool=pool))
    scale = float(jnp.max(jnp.abs(ref))) + 1e-6

    # f32 compute path (tight check).
    out = jax.block_until_ready(
        downblock_forward(x, params, dilation=dilation, pool=pool))
    assert out.shape == ref.shape, (out.shape, ref.shape)
    err32 = float(jnp.max(jnp.abs(out - ref)))
    assert err32 <= 1e-3 + 1e-3 * scale, f"f32 max abs err = {err32}"

    # bf16 MXU-operand path (v6e / v7x recommendation); elementwise stays f32.
    out_bf16 = jax.block_until_ready(
        downblock_forward(x, params, dilation=dilation, pool=pool,
                          compute_dtype=jnp.bfloat16))
    err16 = float(jnp.max(jnp.abs(out_bf16 - ref)))
    assert err16 <= 0.05 * scale + 1e-3, f"bf16 max abs err = {err16} (scale {scale})"

    print("KERNEL_OK")
</pallas_src>

<mosaic_0001>
module attributes {stable_mosaic.version = 11 : i64} {
  func.func @_downblock_kernel(%arg0: i32, %arg1: memref<1x16x16x4xf32, #tpu.memory_space<vmem>>, %arg2: memref<36x8xf32, #tpu.memory_space<vmem>>, %arg3: memref<1x8xf32, #tpu.memory_space<vmem>>, %arg4: memref<72x8xf32, #tpu.memory_space<vmem>>, %arg5: memref<1x8xf32, #tpu.memory_space<vmem>>, %arg6: memref<1x64x8xf32, #tpu.memory_space<vmem>>) attributes {dimension_semantics = [#tpu.dimension_semantics<parallel>], iteration_bounds = array<i64: 2>, scalar_prefetch = 0 : i64, scratch_operands = 0 : i64, tpu.core_type = #tpu.core_type<tc>, window_params = [{transform_indices = @transform_0, window_bounds = array<i64: 1, 16, 16, 4>}, {pipeline_mode = #tpu.pipeline_mode<synchronous>, transform_indices = @transform_1, window_bounds = array<i64: 36, 8>}, {pipeline_mode = #tpu.pipeline_mode<synchronous>, transform_indices = @transform_2, window_bounds = array<i64: 1, 8>}, {pipeline_mode = #tpu.pipeline_mode<synchronous>, transform_indices = @transform_3, window_bounds = array<i64: 72, 8>}, {pipeline_mode = #tpu.pipeline_mode<synchronous>, transform_indices = @transform_4, window_bounds = array<i64: 1, 8>}, {transform_indices = @transform_5, window_bounds = array<i64: 1, 64, 8>}]} {
    %c0 = arith.constant 0 : index
    %c0_0 = arith.constant 0 : index
    %c0_1 = arith.constant 0 : index
    %c0_2 = arith.constant 0 : index
    %0 = vector.load %arg1[%c0, %c0_0, %c0_1, %c0_2] : memref<1x16x16x4xf32, #tpu.memory_space<vmem>>, vector<1x16x16x4xf32>
    %1 = vector.shape_cast %0 : vector<1x16x16x4xf32> to vector<1x8x2x16x4xf32>
    %cst = arith.constant dense<0xFF800000> : vector<1x8x16x4xf32>
    %2 = vector.multi_reduction <maximumf>, %1, %cst [2] : vector<1x8x2x16x4xf32> to vector<1x8x16x4xf32>
    %3 = vector.shape_cast %2 : vector<1x8x16x4xf32> to vector<1x8x8x2x4xf32>
    %cst_3 = arith.constant dense<0xFF800000> : vector<1x8x8x4xf32>
    %4 = vector.multi_reduction <maximumf>, %3, %cst_3 [3] : vector<1x8x8x2x4xf32> to vector<1x8x8x4xf32>
    %cst_4 = arith.constant 0.000000e+00 : f32
    %5 = vector.broadcast %cst_4 : f32 to vector<1x1x8x4xf32>
    %cst_5 = arith.constant 0.000000e+00 : f32
    %6 = vector.broadcast %cst_5 : f32 to vector<1x10x1x4xf32>
    %7 = tpu.concatenate %5, %4, %5 in 1 : vector<1x1x8x4xf32>, vector<1x8x8x4xf32>, vector<1x1x8x4xf32> -> vector<1x10x8x4xf32>
    %8 = tpu.concatenate %6, %7, %6 in 2 : vector<1x10x1x4xf32>, vector<1x10x8x4xf32>, vector<1x10x1x4xf32> -> vector<1x10x10x4xf32>
    %9 = vector.extract_strided_slice %8 {offsets = [0, 0, 0, 0], sizes = [1, 8, 8, 4], strides = [1, 1, 1, 1]} : vector<1x10x10x4xf32> to vector<1x8x8x4xf32>
    %10 = vector.extract_strided_slice %8 {offsets = [0, 0, 1, 0], sizes = [1, 8, 8, 4], strides = [1, 1, 1, 1]} : vector<1x10x10x4xf32> to vector<1x8x8x4xf32>
    %11 = vector.extract_strided_slice %8 {offsets = [0, 0, 2, 0], sizes = [1, 8, 8, 4], strides = [1, 1, 1, 1]} : vector<1x10x10x4xf32> to vector<1x8x8x4xf32>
    %12 = vector.extract_strided_slice %8 {offsets = [0, 1, 0, 0], sizes = [1, 8, 8, 4], strides = [1, 1, 1, 1]} : vector<1x10x10x4xf32> to vector<1x8x8x4xf32>
    %13 = vector.extract_strided_slice %8 {offsets = [0, 1, 1, 0], sizes = [1, 8, 8, 4], strides = [1, 1, 1, 1]} : vector<1x10x10x4xf32> to vector<1x8x8x4xf32>
    %14 = vector.extract_strided_slice %8 {offsets = [0, 1, 2, 0], sizes = [1, 8, 8, 4], strides = [1, 1, 1, 1]} : vector<1x10x10x4xf32> to vector<1x8x8x4xf32>
    %15 = vector.extract_strided_slice %8 {offsets = [0, 2, 0, 0], sizes = [1, 8, 8, 4], strides = [1, 1, 1, 1]} : vector<1x10x10x4xf32> to vector<1x8x8x4xf32>
    %16 = vector.extract_strided_slice %8 {offsets = [0, 2, 1, 0], sizes = [1, 8, 8, 4], strides = [1, 1, 1, 1]} : vector<1x10x10x4xf32> to vector<1x8x8x4xf32>
    %17 = vector.extract_strided_slice %8 {offsets = [0, 2, 2, 0], sizes = [1, 8, 8, 4], strides = [1, 1, 1, 1]} : vector<1x10x10x4xf32> to vector<1x8x8x4xf32>
    %18 = tpu.concatenate %9, %10, %11, %12, %13, %14, %15, %16, %17 in 3 : vector<1x8x8x4xf32>, vector<1x8x8x4xf32>, vector<1x8x8x4xf32>, vector<1x8x8x4xf32>, vector<1x8x8x4xf32>, vector<1x8x8x4xf32>, vector<1x8x8x4xf32>, vector<1x8x8x4xf32>, vector<1x8x8x4xf32> -> vector<1x8x8x36xf32>
    %19 = vector.shape_cast %18 : vector<1x8x8x36xf32> to vector<64x36xf32>
    %c0_6 = arith.constant 0 : index
    %c0_7 = arith.constant 0 : index
    %20 = vector.load %arg2[%c0_6, %c0_7] : memref<36x8xf32, #tpu.memory_space<vmem>>, vector<36x8xf32>
    %cst_8 = arith.constant dense<0.000000e+00> : vector<64x8xf32>
    %21 = tpu.matmul %19, %20, %cst_8 {dimension_numbers = #tpu.dot_dimension_numbers<[1], [0], [0], [1], [0, 0, 1, 1], [], []>} : vector<64x36xf32>, vector<36x8xf32>, vector<64x8xf32> -> vector<64x8xf32>
    %c0_9 = arith.constant 0 : index
    %c0_10 = arith.constant 0 : index
    %22 = vector.load %arg3[%c0_9, %c0_10] : memref<1x8xf32, #tpu.memory_space<vmem>>, vector<1x8xf32>
    %23 = vector.broadcast %22 : vector<1x8xf32> to vector<64x8xf32>
    %24 = arith.addf %21, %23 : vector<64x8xf32>
    %cst_11 = arith.constant 0.000000e+00 : f32
    %25 = vector.broadcast %cst_11 : f32 to vector<64x8xf32>
    %26 = arith.maximumf %24, %25 : vector<64x8xf32>
    %27 = vector.shape_cast %26 : vector<64x8xf32> to vector<1x8x8x8xf32>
    %cst_12 = arith.constant 0.000000e+00 : f32
    %28 = vector.broadcast %cst_12 : f32 to vector<1x1x8x8xf32>
    %cst_13 = arith.constant 0.000000e+00 : f32
    %29 = vector.broadcast %cst_13 : f32 to vector<1x10x1x8xf32>
    %30 = tpu.concatenate %28, %27, %28 in 1 : vector<1x1x8x8xf32>, vector<1x8x8x8xf32>, vector<1x1x8x8xf32> -> vector<1x10x8x8xf32>
    %31 = tpu.concatenate %29, %30, %29 in 2 : vector<1x10x1x8xf32>, vector<1x10x8x8xf32>, vector<1x10x1x8xf32> -> vector<1x10x10x8xf32>
    %32 = vector.extract_strided_slice %31 {offsets = [0, 0, 0, 0], sizes = [1, 8, 8, 8], strides = [1, 1, 1, 1]} : vector<1x10x10x8xf32> to vector<1x8x8x8xf32>
    %33 = vector.extract_strided_slice %31 {offsets = [0, 0, 1, 0], sizes = [1, 8, 8, 8], strides = [1, 1, 1, 1]} : vector<1x10x10x8xf32> to vector<1x8x8x8xf32>
    %34 = vector.extract_strided_slice %31 {offsets = [0, 0, 2, 0], sizes = [1, 8, 8, 8], strides = [1, 1, 1, 1]} : vector<1x10x10x8xf32> to vector<1x8x8x8xf32>
    %35 = vector.extract_strided_slice %31 {offsets = [0, 1, 0, 0], sizes = [1, 8, 8, 8], strides = [1, 1, 1, 1]} : vector<1x10x10x8xf32> to vector<1x8x8x8xf32>
    %36 = vector.extract_strided_slice %31 {offsets = [0, 1, 1, 0], sizes = [1, 8, 8, 8], strides = [1, 1, 1, 1]} : vector<1x10x10x8xf32> to vector<1x8x8x8xf32>
    %37 = vector.extract_strided_slice %31 {offsets = [0, 1, 2, 0], sizes = [1, 8, 8, 8], strides = [1, 1, 1, 1]} : vector<1x10x10x8xf32> to vector<1x8x8x8xf32>
    %38 = vector.extract_strided_slice %31 {offsets = [0, 2, 0, 0], sizes = [1, 8, 8, 8], strides = [1, 1, 1, 1]} : vector<1x10x10x8xf32> to vector<1x8x8x8xf32>
    %39 = vector.extract_strided_slice %31 {offsets = [0, 2, 1, 0], sizes = [1, 8, 8, 8], strides = [1, 1, 1, 1]} : vector<1x10x10x8xf32> to vector<1x8x8x8xf32>
    %40 = vector.extract_strided_slice %31 {offsets = [0, 2, 2, 0], sizes = [1, 8, 8, 8], strides = [1, 1, 1, 1]} : vector<1x10x10x8xf32> to vector<1x8x8x8xf32>
    %41 = tpu.concatenate %32, %33, %34, %35, %36, %37, %38, %39, %40 in 3 : vector<1x8x8x8xf32>, vector<1x8x8x8xf32>, vector<1x8x8x8xf32>, vector<1x8x8x8xf32>, vector<1x8x8x8xf32>, vector<1x8x8x8xf32>, vector<1x8x8x8xf32>, vector<1x8x8x8xf32>, vector<1x8x8x8xf32> -> vector<1x8x8x72xf32>
    %42 = vector.shape_cast %41 : vector<1x8x8x72xf32> to vector<64x72xf32>
    %c0_14 = arith.constant 0 : index
    %c0_15 = arith.constant 0 : index
    %43 = vector.load %arg4[%c0_14, %c0_15] : memref<72x8xf32, #tpu.memory_space<vmem>>, vector<72x8xf32>
    %cst_16 = arith.constant dense<0.000000e+00> : vector<64x8xf32>
    %44 = tpu.matmul %42, %43, %cst_16 {dimension_numbers = #tpu.dot_dimension_numbers<[1], [0], [0], [1], [0, 0, 1, 1], [], []>} : vector<64x72xf32>, vector<72x8xf32>, vector<64x8xf32> -> vector<64x8xf32>
    %c0_17 = arith.constant 0 : index
    %c0_18 = arith.constant 0 : index
    %45 = vector.load %arg5[%c0_17, %c0_18] : memref<1x8xf32, #tpu.memory_space<vmem>>, vector<1x8xf32>
    %46 = vector.broadcast %45 : vector<1x8xf32> to vector<64x8xf32>
    %47 = arith.addf %44, %46 : vector<64x8xf32>
    %cst_19 = arith.constant 0.000000e+00 : f32
    %48 = vector.broadcast %cst_19 : f32 to vector<64x8xf32>
    %49 = arith.maximumf %47, %48 : vector<64x8xf32>
    %50 = vector.shape_cast %49 : vector<64x8xf32> to vector<1x8x8x8xf32>
    %51 = vector.shape_cast %50 : vector<1x8x8x8xf32> to vector<1x64x8xf32>
    %c0_20 = arith.constant 0 : index
    %c0_21 = arith.constant 0 : index
    %c0_22 = arith.constant 0 : index
    %52 = vector.load %arg6[%c0_20, %c0_21, %c0_22] : memref<1x64x8xf32, #tpu.memory_space<vmem>>, vector<1x64x8xf32>
    tpu.vector_store %arg6[%c0_20, %c0_21, %c0_22], %51 {strides = array<i32>} : memref<1x64x8xf32, #tpu.memory_space<vmem>>, vector<1x64x8xf32>,
    return
  }
  func.func @transform_0(%arg0: i32) -> (i32, i32, i32, i32) {
    %c0_i32 = arith.constant 0 : i32
    %c0_i32_0 = arith.constant 0 : i32
    %c0_i32_1 = arith.constant 0 : i32
    %c0_i32_2 = arith.constant 0 : i32
    return %arg0, %c0_i32, %c0_i32_0, %c0_i32_1 : i32, i32, i32, i32
  }
  func.func @transform_1(%arg0: i32) -> (i32, i32) {
    %c0_i32 = arith.constant 0 : i32
    %c0_i32_0 = arith.constant 0 : i32
    %c0_i32_1 = arith.constant 0 : i32
    return %c0_i32, %c0_i32_0 : i32, i32
  }
  func.func @transform_2(%arg0: i32) -> (i32, i32) {
    %c0_i32 = arith.constant 0 : i32
    %c0_i32_0 = arith.constant 0 : i32
    %c0_i32_1 = arith.constant 0 : i32
    return %c0_i32, %c0_i32_0 : i32, i32
  }
  func.func @transform_3(%arg0: i32) -> (i32, i32) {
    %c0_i32 = arith.constant 0 : i32
    %c0_i32_0 = arith.constant 0 : i32
    %c0_i32_1 = arith.constant 0 : i32
    return %c0_i32, %c0_i32_0 : i32, i32
  }
  func.func @transform_4(%arg0: i32) -> (i32, i32) {
    %c0_i32 = arith.constant 0 : i32
    %c0_i32_0 = arith.constant 0 : i32
    %c0_i32_1 = arith.constant 0 : i32
    return %c0_i32, %c0_i32_0 : i32, i32
  }
  func.func @transform_5(%arg0: i32) -> (i32, i32, i32) {
    %c0_i32 = arith.constant 0 : i32
    %c0_i32_0 = arith.constant 0 : i32
    %c0_i32_1 = arith.constant 0 : i32
    return %arg0, %c0_i32, %c0_i32_0 : i32, i32, i32
  }
}

module attributes {stable_mosaic.version = 11 : i64} {
  func.func @_downblock_kernel(%arg0: i32, %arg1: memref<1x16x16x4xf32, #tpu.memory_space<vmem>>, %arg2: memref<36x8xf32, #tpu.memory_space<vmem>>, %arg3: memref<1x8xf32, #tpu.memory_space<vmem>>, %arg4: memref<72x8xf32, #tpu.memory_space<vmem>>, %arg5: memref<1x8xf32, #tpu.memory_space<vmem>>, %arg6: memref<1x64x8xf32, #tpu.memory_space<vmem>>) attributes {dimension_semantics = [#tpu.dimension_semantics<parallel>], iteration_bounds = array<i64: 2>, scalar_prefetch = 0 : i64, scratch_operands = 0 : i64, tpu.core_type = #tpu.core_type<tc>, window_params = [{transform_indices = @transform_0, window_bounds = array<i64: 1, 16, 16, 4>}, {pipeline_mode = #tpu.pipeline_mode<synchronous>, transform_indices = @transform_1, window_bounds = array<i64: 36, 8>}, {pipeline_mode = #tpu.pipeline_mode<synchronous>, transform_indices = @transform_2, window_bounds = array<i64: 1, 8>}, {pipeline_mode = #tpu.pipeline_mode<synchronous>, transform_indices = @transform_3, window_bounds = array<i64: 72, 8>}, {pipeline_mode = #tpu.pipeline_mode<synchronous>, transform_indices = @transform_4, window_bounds = array<i64: 1, 8>}, {transform_indices = @transform_5, window_bounds = array<i64: 1, 64, 8>}]} {
    %c0 = arith.constant 0 : index
    %c0_0 = arith.constant 0 : index
    %c0_1 = arith.constant 0 : index
    %c0_2 = arith.constant 0 : index
    %0 = vector.load %arg1[%c0, %c0_0, %c0_1, %c0_2] : memref<1x16x16x4xf32, #tpu.memory_space<vmem>>, vector<1x16x16x4xf32>
    %1 = vector.shape_cast %0 : vector<1x16x16x4xf32> to vector<1x8x2x16x4xf32>
    %cst = arith.constant dense<0xFF800000> : vector<1x8x16x4xf32>
    %2 = vector.multi_reduction <maximumf>, %1, %cst [2] : vector<1x8x2x16x4xf32> to vector<1x8x16x4xf32>
    %3 = vector.shape_cast %2 : vector<1x8x16x4xf32> to vector<1x8x8x2x4xf32>
    %cst_3 = arith.constant dense<0xFF800000> : vector<1x8x8x4xf32>
    %4 = vector.multi_reduction <maximumf>, %3, %cst_3 [3] : vector<1x8x8x2x4xf32> to vector<1x8x8x4xf32>
    %cst_4 = arith.constant 0.000000e+00 : f32
    %5 = vector.broadcast %cst_4 : f32 to vector<1x1x8x4xf32>
    %cst_5 = arith.constant 0.000000e+00 : f32
    %6 = vector.broadcast %cst_5 : f32 to vector<1x10x1x4xf32>
    %7 = tpu.concatenate %5, %4, %5 in 1 : vector<1x1x8x4xf32>, vector<1x8x8x4xf32>, vector<1x1x8x4xf32> -> vector<1x10x8x4xf32>
    %8 = tpu.concatenate %6, %7, %6 in 2 : vector<1x10x1x4xf32>, vector<1x10x8x4xf32>, vector<1x10x1x4xf32> -> vector<1x10x10x4xf32>
    %9 = vector.extract_strided_slice %8 {offsets = [0, 0, 0, 0], sizes = [1, 8, 8, 4], strides = [1, 1, 1, 1]} : vector<1x10x10x4xf32> to vector<1x8x8x4xf32>
    %10 = vector.extract_strided_slice %8 {offsets = [0, 0, 1, 0], sizes = [1, 8, 8, 4], strides = [1, 1, 1, 1]} : vector<1x10x10x4xf32> to vector<1x8x8x4xf32>
    %11 = vector.extract_strided_slice %8 {offsets = [0, 0, 2, 0], sizes = [1, 8, 8, 4], strides = [1, 1, 1, 1]} : vector<1x10x10x4xf32> to vector<1x8x8x4xf32>
    %12 = vector.extract_strided_slice %8 {offsets = [0, 1, 0, 0], sizes = [1, 8, 8, 4], strides = [1, 1, 1, 1]} : vector<1x10x10x4xf32> to vector<1x8x8x4xf32>
    %13 = vector.extract_strided_slice %8 {offsets = [0, 1, 1, 0], sizes = [1, 8, 8, 4], strides = [1, 1, 1, 1]} : vector<1x10x10x4xf32> to vector<1x8x8x4xf32>
    %14 = vector.extract_strided_slice %8 {offsets = [0, 1, 2, 0], sizes = [1, 8, 8, 4], strides = [1, 1, 1, 1]} : vector<1x10x10x4xf32> to vector<1x8x8x4xf32>
    %15 = vector.extract_strided_slice %8 {offsets = [0, 2, 0, 0], sizes = [1, 8, 8, 4], strides = [1, 1, 1, 1]} : vector<1x10x10x4xf32> to vector<1x8x8x4xf32>
    %16 = vector.extract_strided_slice %8 {offsets = [0, 2, 1, 0], sizes = [1, 8, 8, 4], strides = [1, 1, 1, 1]} : vector<1x10x10x4xf32> to vector<1x8x8x4xf32>
    %17 = vector.extract_strided_slice %8 {offsets = [0, 2, 2, 0], sizes = [1, 8, 8, 4], strides = [1, 1, 1, 1]} : vector<1x10x10x4xf32> to vector<1x8x8x4xf32>
    %cst_6 = arith.constant 0.000000e+00 : f32
    %18 = vector.broadcast %cst_6 : f32 to vector<64x8xf32>
    %19 = vector.shape_cast %9 : vector<1x8x8x4xf32> to vector<64x4xf32>
    %c0_7 = arith.constant 0 : index
    %c0_8 = arith.constant 0 : index
    %20 = vector.load %arg2[%c0_7, %c0_8] : memref<36x8xf32, #tpu.memory_space<vmem>>, vector<4x8xf32>
    %cst_9 = arith.constant dense<0.000000e+00> : vector<64x8xf32>
    %21 = tpu.matmul %19, %20, %cst_9 {dimension_numbers = #tpu.dot_dimension_numbers<[1], [0], [0], [1], [0, 0, 1, 1], [], []>} : vector<64x4xf32>, vector<4x8xf32>, vector<64x8xf32> -> vector<64x8xf32>
    %22 = arith.addf %18, %21 : vector<64x8xf32>
    %23 = vector.shape_cast %10 : vector<1x8x8x4xf32> to vector<64x4xf32>
    %c4 = arith.constant 4 : index
    %c0_10 = arith.constant 0 : index
    %24 = vector.load %arg2[%c4, %c0_10] : memref<36x8xf32, #tpu.memory_space<vmem>>, vector<4x8xf32>
    %cst_11 = arith.constant dense<0.000000e+00> : vector<64x8xf32>
    %25 = tpu.matmul %23, %24, %cst_11 {dimension_numbers = #tpu.dot_dimension_numbers<[1], [0], [0], [1], [0, 0, 1, 1], [], []>} : vector<64x4xf32>, vector<4x8xf32>, vector<64x8xf32> -> vector<64x8xf32>
    %26 = arith.addf %22, %25 : vector<64x8xf32>
    %27 = vector.shape_cast %11 : vector<1x8x8x4xf32> to vector<64x4xf32>
    %c8 = arith.constant 8 : index
    %c0_12 = arith.constant 0 : index
    %28 = vector.load %arg2[%c8, %c0_12] : memref<36x8xf32, #tpu.memory_space<vmem>>, vector<4x8xf32>
    %cst_13 = arith.constant dense<0.000000e+00> : vector<64x8xf32>
    %29 = tpu.matmul %27, %28, %cst_13 {dimension_numbers = #tpu.dot_dimension_numbers<[1], [0], [0], [1], [0, 0, 1, 1], [], []>} : vector<64x4xf32>, vector<4x8xf32>, vector<64x8xf32> -> vector<64x8xf32>
    %30 = arith.addf %26, %29 : vector<64x8xf32>
    %31 = vector.shape_cast %12 : vector<1x8x8x4xf32> to vector<64x4xf32>
    %c12 = arith.constant 12 : index
    %c0_14 = arith.constant 0 : index
    %32 = vector.load %arg2[%c12, %c0_14] : memref<36x8xf32, #tpu.memory_space<vmem>>, vector<4x8xf32>
    %cst_15 = arith.constant dense<0.000000e+00> : vector<64x8xf32>
    %33 = tpu.matmul %31, %32, %cst_15 {dimension_numbers = #tpu.dot_dimension_numbers<[1], [0], [0], [1], [0, 0, 1, 1], [], []>} : vector<64x4xf32>, vector<4x8xf32>, vector<64x8xf32> -> vector<64x8xf32>
    %34 = arith.addf %30, %33 : vector<64x8xf32>
    %35 = vector.shape_cast %13 : vector<1x8x8x4xf32> to vector<64x4xf32>
    %c16 = arith.constant 16 : index
    %c0_16 = arith.constant 0 : index
    %36 = vector.load %arg2[%c16, %c0_16] : memref<36x8xf32, #tpu.memory_space<vmem>>, vector<4x8xf32>
    %cst_17 = arith.constant dense<0.000000e+00> : vector<64x8xf32>
    %37 = tpu.matmul %35, %36, %cst_17 {dimension_numbers = #tpu.dot_dimension_numbers<[1], [0], [0], [1], [0, 0, 1, 1], [], []>} : vector<64x4xf32>, vector<4x8xf32>, vector<64x8xf32> -> vector<64x8xf32>
    %38 = arith.addf %34, %37 : vector<64x8xf32>
    %39 = vector.shape_cast %14 : vector<1x8x8x4xf32> to vector<64x4xf32>
    %c20 = arith.constant 20 : index
    %c0_18 = arith.constant 0 : index
    %40 = vector.load %arg2[%c20, %c0_18] : memref<36x8xf32, #tpu.memory_space<vmem>>, vector<4x8xf32>
    %cst_19 = arith.constant dense<0.000000e+00> : vector<64x8xf32>
    %41 = tpu.matmul %39, %40, %cst_19 {dimension_numbers = #tpu.dot_dimension_numbers<[1], [0], [0], [1], [0, 0, 1, 1], [], []>} : vector<64x4xf32>, vector<4x8xf32>, vector<64x8xf32> -> vector<64x8xf32>
    %42 = arith.addf %38, %41 : vector<64x8xf32>
    %43 = vector.shape_cast %15 : vector<1x8x8x4xf32> to vector<64x4xf32>
    %c24 = arith.constant 24 : index
    %c0_20 = arith.constant 0 : index
    %44 = vector.load %arg2[%c24, %c0_20] : memref<36x8xf32, #tpu.memory_space<vmem>>, vector<4x8xf32>
    %cst_21 = arith.constant dense<0.000000e+00> : vector<64x8xf32>
    %45 = tpu.matmul %43, %44, %cst_21 {dimension_numbers = #tpu.dot_dimension_numbers<[1], [0], [0], [1], [0, 0, 1, 1], [], []>} : vector<64x4xf32>, vector<4x8xf32>, vector<64x8xf32> -> vector<64x8xf32>
    %46 = arith.addf %42, %45 : vector<64x8xf32>
    %47 = vector.shape_cast %16 : vector<1x8x8x4xf32> to vector<64x4xf32>
    %c28 = arith.constant 28 : index
    %c0_22 = arith.constant 0 : index
    %48 = vector.load %arg2[%c28, %c0_22] : memref<36x8xf32, #tpu.memory_space<vmem>>, vector<4x8xf32>
    %cst_23 = arith.constant dense<0.000000e+00> : vector<64x8xf32>
    %49 = tpu.matmul %47, %48, %cst_23 {dimension_numbers = #tpu.dot_dimension_numbers<[1], [0], [0], [1], [0, 0, 1, 1], [], []>} : vector<64x4xf32>, vector<4x8xf32>, vector<64x8xf32> -> vector<64x8xf32>
    %50 = arith.addf %46, %49 : vector<64x8xf32>
    %51 = vector.shape_cast %17 : vector<1x8x8x4xf32> to vector<64x4xf32>
    %c32 = arith.constant 32 : index
    %c0_24 = arith.constant 0 : index
    %52 = vector.load %arg2[%c32, %c0_24] : memref<36x8xf32, #tpu.memory_space<vmem>>, vector<4x8xf32>
    %cst_25 = arith.constant dense<0.000000e+00> : vector<64x8xf32>
    %53 = tpu.matmul %51, %52, %cst_25 {dimension_numbers = #tpu.dot_dimension_numbers<[1], [0], [0], [1], [0, 0, 1, 1], [], []>} : vector<64x4xf32>, vector<4x8xf32>, vector<64x8xf32> -> vector<64x8xf32>
    %54 = arith.addf %50, %53 : vector<64x8xf32>
    %c0_26 = arith.constant 0 : index
    %c0_27 = arith.constant 0 : index
    %55 = vector.load %arg3[%c0_26, %c0_27] : memref<1x8xf32, #tpu.memory_space<vmem>>, vector<1x8xf32>
    %56 = vector.broadcast %55 : vector<1x8xf32> to vector<64x8xf32>
    %57 = arith.addf %54, %56 : vector<64x8xf32>
    %cst_28 = arith.constant 0.000000e+00 : f32
    %58 = vector.broadcast %cst_28 : f32 to vector<64x8xf32>
    %59 = arith.maximumf %57, %58 : vector<64x8xf32>
    %60 = vector.shape_cast %59 : vector<64x8xf32> to vector<1x8x8x8xf32>
    %cst_29 = arith.constant 0.000000e+00 : f32
    %61 = vector.broadcast %cst_29 : f32 to vector<1x1x8x8xf32>
    %cst_30 = arith.constant 0.000000e+00 : f32
    %62 = vector.broadcast %cst_30 : f32 to vector<1x10x1x8xf32>
    %63 = tpu.concatenate %61, %60, %61 in 1 : vector<1x1x8x8xf32>, vector<1x8x8x8xf32>, vector<1x1x8x8xf32> -> vector<1x10x8x8xf32>
    %64 = tpu.concatenate %62, %63, %62 in 2 : vector<1x10x1x8xf32>, vector<1x10x8x8xf32>, vector<1x10x1x8xf32> -> vector<1x10x10x8xf32>
    %65 = vector.extract_strided_slice %64 {offsets = [0, 0, 0, 0], sizes = [1, 8, 8, 8], strides = [1, 1, 1, 1]} : vector<1x10x10x8xf32> to vector<1x8x8x8xf32>
    %66 = vector.extract_strided_slice %64 {offsets = [0, 0, 1, 0], sizes = [1, 8, 8, 8], strides = [1, 1, 1, 1]} : vector<1x10x10x8xf32> to vector<1x8x8x8xf32>
    %67 = vector.extract_strided_slice %64 {offsets = [0, 0, 2, 0], sizes = [1, 8, 8, 8], strides = [1, 1, 1, 1]} : vector<1x10x10x8xf32> to vector<1x8x8x8xf32>
    %68 = vector.extract_strided_slice %64 {offsets = [0, 1, 0, 0], sizes = [1, 8, 8, 8], strides = [1, 1, 1, 1]} : vector<1x10x10x8xf32> to vector<1x8x8x8xf32>
    %69 = vector.extract_strided_slice %64 {offsets = [0, 1, 1, 0], sizes = [1, 8, 8, 8], strides = [1, 1, 1, 1]} : vector<1x10x10x8xf32> to vector<1x8x8x8xf32>
    %70 = vector.extract_strided_slice %64 {offsets = [0, 1, 2, 0], sizes = [1, 8, 8, 8], strides = [1, 1, 1, 1]} : vector<1x10x10x8xf32> to vector<1x8x8x8xf32>
    %71 = vector.extract_strided_slice %64 {offsets = [0, 2, 0, 0], sizes = [1, 8, 8, 8], strides = [1, 1, 1, 1]} : vector<1x10x10x8xf32> to vector<1x8x8x8xf32>
    %72 = vector.extract_strided_slice %64 {offsets = [0, 2, 1, 0], sizes = [1, 8, 8, 8], strides = [1, 1, 1, 1]} : vector<1x10x10x8xf32> to vector<1x8x8x8xf32>
    %73 = vector.extract_strided_slice %64 {offsets = [0, 2, 2, 0], sizes = [1, 8, 8, 8], strides = [1, 1, 1, 1]} : vector<1x10x10x8xf32> to vector<1x8x8x8xf32>
    %cst_31 = arith.constant 0.000000e+00 : f32
    %74 = vector.broadcast %cst_31 : f32 to vector<64x8xf32>
    %75 = vector.shape_cast %65 : vector<1x8x8x8xf32> to vector<64x8xf32>
    %c0_32 = arith.constant 0 : index
    %c0_33 = arith.constant 0 : index
    %76 = vector.load %arg4[%c0_32, %c0_33] : memref<72x8xf32, #tpu.memory_space<vmem>>, vector<8x8xf32>
    %cst_34 = arith.constant dense<0.000000e+00> : vector<64x8xf32>
    %77 = tpu.matmul %75, %76, %cst_34 {dimension_numbers = #tpu.dot_dimension_numbers<[1], [0], [0], [1], [0, 0, 1, 1], [], []>} : vector<64x8xf32>, vector<8x8xf32>, vector<64x8xf32> -> vector<64x8xf32>
    %78 = arith.addf %74, %77 : vector<64x8xf32>
    %79 = vector.shape_cast %66 : vector<1x8x8x8xf32> to vector<64x8xf32>
    %c8_35 = arith.constant 8 : index
    %c0_36 = arith.constant 0 : index
    %80 = vector.load %arg4[%c8_35, %c0_36] : memref<72x8xf32, #tpu.memory_space<vmem>>, vector<8x8xf32>
    %cst_37 = arith.constant dense<0.000000e+00> : vector<64x8xf32>
    %81 = tpu.matmul %79, %80, %cst_37 {dimension_numbers = #tpu.dot_dimension_numbers<[1], [0], [0], [1], [0, 0, 1, 1], [], []>} : vector<64x8xf32>, vector<8x8xf32>, vector<64x8xf32> -> vector<64x8xf32>
    %82 = arith.addf %78, %81 : vector<64x8xf32>
    %83 = vector.shape_cast %67 : vector<1x8x8x8xf32> to vector<64x8xf32>
    %c16_38 = arith.constant 16 : index
    %c0_39 = arith.constant 0 : index
    %84 = vector.load %arg4[%c16_38, %c0_39] : memref<72x8xf32, #tpu.memory_space<vmem>>, vector<8x8xf32>
    %cst_40 = arith.constant dense<0.000000e+00> : vector<64x8xf32>
    %85 = tpu.matmul %83, %84, %cst_40 {dimension_numbers = #tpu.dot_dimension_numbers<[1], [0], [0], [1], [0, 0, 1, 1], [], []>} : vector<64x8xf32>, vector<8x8xf32>, vector<64x8xf32> -> vector<64x8xf32>
    %86 = arith.addf %82, %85 : vector<64x8xf32>
    %87 = vector.shape_cast %68 : vector<1x8x8x8xf32> to vector<64x8xf32>
    %c24_41 = arith.constant 24 : index
    %c0_42 = arith.constant 0 : index
    %88 = vector.load %arg4[%c24_41, %c0_42] : memref<72x8xf32, #tpu.memory_space<vmem>>, vector<8x8xf32>
    %cst_43 = arith.constant dense<0.000000e+00> : vector<64x8xf32>
    %89 = tpu.matmul %87, %88, %cst_43 {dimension_numbers = #tpu.dot_dimension_numbers<[1], [0], [0], [1], [0, 0, 1, 1], [], []>} : vector<64x8xf32>, vector<8x8xf32>, vector<64x8xf32> -> vector<64x8xf32>
    %90 = arith.addf %86, %89 : vector<64x8xf32>
    %91 = vector.shape_cast %69 : vector<1x8x8x8xf32> to vector<64x8xf32>
    %c32_44 = arith.constant 32 : index
    %c0_45 = arith.constant 0 : index
    %92 = vector.load %arg4[%c32_44, %c0_45] : memref<72x8xf32, #tpu.memory_space<vmem>>, vector<8x8xf32>
    %cst_46 = arith.constant dense<0.000000e+00> : vector<64x8xf32>
    %93 = tpu.matmul %91, %92, %cst_46 {dimension_numbers = #tpu.dot_dimension_numbers<[1], [0], [0], [1], [0, 0, 1, 1], [], []>} : vector<64x8xf32>, vector<8x8xf32>, vector<64x8xf32> -> vector<64x8xf32>
    %94 = arith.addf %90, %93 : vector<64x8xf32>
    %95 = vector.shape_cast %70 : vector<1x8x8x8xf32> to vector<64x8xf32>
    %c40 = arith.constant 40 : index
    %c0_47 = arith.constant 0 : index
    %96 = vector.load %arg4[%c40, %c0_47] : memref<72x8xf32, #tpu.memory_space<vmem>>, vector<8x8xf32>
    %cst_48 = arith.constant dense<0.000000e+00> : vector<64x8xf32>
    %97 = tpu.matmul %95, %96, %cst_48 {dimension_numbers = #tpu.dot_dimension_numbers<[1], [0], [0], [1], [0, 0, 1, 1], [], []>} : vector<64x8xf32>, vector<8x8xf32>, vector<64x8xf32> -> vector<64x8xf32>
    %98 = arith.addf %94, %97 : vector<64x8xf32>
    %99 = vector.shape_cast %71 : vector<1x8x8x8xf32> to vector<64x8xf32>
    %c48 = arith.constant 48 : index
    %c0_49 = arith.constant 0 : index
    %100 = vector.load %arg4[%c48, %c0_49] : memref<72x8xf32, #tpu.memory_space<vmem>>, vector<8x8xf32>
    %cst_50 = arith.constant dense<0.000000e+00> : vector<64x8xf32>
    %101 = tpu.matmul %99, %100, %cst_50 {dimension_numbers = #tpu.dot_dimension_numbers<[1], [0], [0], [1], [0, 0, 1, 1], [], []>} : vector<64x8xf32>, vector<8x8xf32>, vector<64x8xf32> -> vector<64x8xf32>
    %102 = arith.addf %98, %101 : vector<64x8xf32>
    %103 = vector.shape_cast %72 : vector<1x8x8x8xf32> to vector<64x8xf32>
    %c56 = arith.constant 56 : index
    %c0_51 = arith.constant 0 : index
    %104 = vector.load %arg4[%c56, %c0_51] : memref<72x8xf32, #tpu.memory_space<vmem>>, vector<8x8xf32>
    %cst_52 = arith.constant dense<0.000000e+00> : vector<64x8xf32>
    %105 = tpu.matmul %103, %104, %cst_52 {dimension_numbers = #tpu.dot_dimension_numbers<[1], [0], [0], [1], [0, 0, 1, 1], [], []>} : vector<64x8xf32>, vector<8x8xf32>, vector<64x8xf32> -> vector<64x8xf32>
    %106 = arith.addf %102, %105 : vector<64x8xf32>
    %107 = vector.shape_cast %73 : vector<1x8x8x8xf32> to vector<64x8xf32>
    %c64 = arith.constant 64 : index
    %c0_53 = arith.constant 0 : index
    %108 = vector.load %arg4[%c64, %c0_53] : memref<72x8xf32, #tpu.memory_space<vmem>>, vector<8x8xf32>
    %cst_54 = arith.constant dense<0.000000e+00> : vector<64x8xf32>
    %109 = tpu.matmul %107, %108, %cst_54 {dimension_numbers = #tpu.dot_dimension_numbers<[1], [0], [0], [1], [0, 0, 1, 1], [], []>} : vector<64x8xf32>, vector<8x8xf32>, vector<64x8xf32> -> vector<64x8xf32>
    %110 = arith.addf %106, %109 : vector<64x8xf32>
    %c0_55 = arith.constant 0 : index
    %c0_56 = arith.constant 0 : index
    %111 = vector.load %arg5[%c0_55, %c0_56] : memref<1x8xf32, #tpu.memory_space<vmem>>, vector<1x8xf32>
    %112 = vector.broadcast %111 : vector<1x8xf32> to vector<64x8xf32>
    %113 = arith.addf %110, %112 : vector<64x8xf32>
    %cst_57 = arith.constant 0.000000e+00 : f32
    %114 = vector.broadcast %cst_57 : f32 to vector<64x8xf32>
    %115 = arith.maximumf %113, %114 : vector<64x8xf32>
    %116 = vector.shape_cast %115 : vector<64x8xf32> to vector<1x8x8x8xf32>
    %117 = vector.shape_cast %116 : vector<1x8x8x8xf32> to vector<1x64x8xf32>
    %c0_58 = arith.constant 0 : index
    %c0_59 = arith.constant 0 : index
    %c0_60 = arith.constant 0 : index
    %118 = vector.load %arg6[%c0_58, %c0_59, %c0_60] : memref<1x64x8xf32, #tpu.memory_space<vmem>>, vector<1x64x8xf32>
    tpu.vector_store %arg6[%c0_58, %c0_59, %c0_60], %117 {strides = array<i32>} : memref<1x64x8xf32, #tpu.memory_space<vmem>>, vector<1x64x8xf32>,
    return
  }
  func.func @transform_0(%arg0: i32) -> (i32, i32, i32, i32) {
    %c0_i32 = arith.constant 0 : i32
    %c0_i32_0 = arith.constant 0 : i32
    %c0_i32_1 = arith.constant 0 : i32
    %c0_i32_2 = arith.constant 0 : i32
    return %arg0, %c0_i32, %c0_i32_0, %c0_i32_1 : i32, i32, i32, i32
  }
  func.func @transform_1(%arg0: i32) -> (i32, i32) {
    %c0_i32 = arith.constant 0 : i32
    %c0_i32_0 = arith.constant 0 : i32
    %c0_i32_1 = arith.constant 0 : i32
    return %c0_i32, %c0_i32_0 : i32, i32
  }
  func.func @transform_2(%arg0: i32) -> (i32, i32) {
    %c0_i32 = arith.constant 0 : i32
    %c0_i32_0 = arith.constant 0 : i32
    %c0_i32_1 = arith.constant 0 : i32
    return %c0_i32, %c0_i32_0 : i32, i32
  }
  func.func @transform_3(%arg0: i32) -> (i32, i32) {
    %c0_i32 = arith.constant 0 : i32
    %c0_i32_0 = arith.constant 0 : i32
    %c0_i32_1 = arith.constant 0 : i32
    return %c0_i32, %c0_i32_0 : i32, i32
  }
  func.func @transform_4(%arg0: i32) -> (i32, i32) {
    %c0_i32 = arith.constant 0 : i32
    %c0_i32_0 = arith.constant 0 : i32
    %c0_i32_1 = arith.constant 0 : i32
    return %c0_i32, %c0_i32_0 : i32, i32
  }
  func.func @transform_5(%arg0: i32) -> (i32, i32, i32) {
    %c0_i32 = arith.constant 0 : i32
    %c0_i32_0 = arith.constant 0 : i32
    %c0_i32_1 = arith.constant 0 : i32
    return %arg0, %c0_i32, %c0_i32_0 : i32, i32, i32
  }
}

</mosaic_0001>

<bundles_post_ra>
// kernel: tpu_custom_call.1
= control target key start
LH: loop header
LB: loop body
LE: loop exit
PB: predicated region body
PF: predicated region fallthrough
CT: control target
= control target key end

     0   :  { %s2556_s18 = smov 0   ;;  %s3458_s0 = inlined_call_operand.vmem [shape: f32[2,16,16,4], index: 0, kind: input, shape index: {}]   ;;  %s3459_s1 = inlined_call_operand.vmem [shape: f32[36,8], index: 1, kind: input, shape index: {}]   ;;  %s3460_s2 = inlined_call_operand.vmem [shape: f32[1,8], index: 2, kind: input, shape index: {}]   ;;  %s3461_s3 = inlined_call_operand.vmem [shape: f32[72,8], index: 3, kind: input, shape index: {}]   ;;  %s3462_s4 = inlined_call_operand.vmem [shape: f32[1,8], index: 4, kind: input, shape index: {}]   ;;  %s3463_s5 = inlined_call_operand.vmem [shape: f32[2,64,8], index: 5, kind: output, shape index: {}]  }
   0x1 LB: > { %s2344_s19 = sadd.s32 4294967295, %s2510_s18   ;;  %p2348_p0 = scmp.ge.s32.totalorder %s2510_s18, 1  ;;  %s2510_s18 = sphi %s2556_s18, %s15_s18  }
   0x2   : > { %p187_p1 = scmp.lt.s32.totalorder %s2510_s18, 3 }
   0x4   : > { %p188_p2 = pnand %p2348_p0, %p187_p1 }
   0x5   : > { %vm1253_vm0 = vcmask (!%p188_p2), 1040384   ;;  %v2512_v0 = vmov (!%p188_p2), 0.0   ;;  %p215_p3 = scmp.lt.s32.totalorder (!%p188_p2), %s2344_s19, 1  ;;  %v326_v2 = vlaneseq (!%p188_p2)  ;;  %vm1288_vm1 = vcmask (!%p188_p2), 1046528   ;;  %s2514_s24 = smov (!%p188_p2), 4  }
   0x6   : > { %191 = sbr.rel (%p188_p2) target bundleno = 951 (0x3b7), region = 40  ;;  %v1235_v1 = vrot.slane (!%p188_p2), %v2512_v0, 7  ;;  %v2513_v3 = vmov (!%p188_p2), 1983009808   ;;  %vm1337_vm2 = vcmask (!%p188_p2), 1045504   ;;  %vm257_vm3 = vcmask (!%p188_p2), 31744  }
   0x7   : > { %v324_v4 = vunpack.c.l.s4 (!%p188_p2), %v2513_v3  ;;  %v327_v7 = vshrl.u32 (!%p188_p2), %v326_v2, 7  ;;  %s2515_s25 = smov (!%p188_p2), 8   ;;  %vm658_vm4 = vcmask (!%p188_p2), 25600   ;;  %vm1171_vm5 = vcmask (!%p188_p2), 1041409   ;;  %s2516_s26 = smov (!%p188_p2), 12  }
   0x8   : > { %v2565_v5 = vsel (!%p188_p2), %vm1253_vm0, 0.0, %v1235_v1  ;;  %v1263_v6 = vsel (!%p188_p2), %vm1253_vm0, %v1235_v1, 0.0  ;;  %vm1173_vm6 = vcmask (!%p188_p2), 1042434   ;;  %vm1175_vm7 = vcmask (!%p188_p2), 1043459   ;;  %s2517_s27 = smov (!%p188_p2), 24   ;;  %s2518_s28 = smov (!%p188_p2), 20  }
   0x9   : > { %v1289_v8 = vrot.slane (!%p188_p2), %v2565_v5, 1  ;;  %v1290_v9 = vrot.slane (!%p188_p2), %v1263_v6, 1  ;;  %v1338_v10 = vrot.slane (!%p188_p2), %v2565_v5, 2  ;;  %v1339_v11 = vrot.slane (!%p188_p2), %v1263_v6, 2  ;;  %s2519_s29 = smov (!%p188_p2), 16   ;;  %s2520_s30 = smov (!%p188_p2), 28  }
   0xa   : > { %v325_v12 = vunpack.c.0.s8 (!%p188_p2), %v324_v4  ;;  %vm1177_vm8 = vcmask (!%p188_p2), 1044484   ;;  %vm1179_vm9 = vcmask (!%p188_p2), 1045509   ;;  %vm1181_vm10 = vcmask (!%p188_p2), 1046534   ;;  %s2521_s6 = smov (!%p188_p2), 32   ;;  %s2522_s17 = smov (!%p188_p2), 48  }
   0xb   : > { %v2574_v13 = vsel (!%p188_p2), %vm1288_vm1, %v1289_v8, %v1290_v9  ;;  %v2577_v14 = vsel (!%p188_p2), %vm1337_vm2, %v1338_v10, %v1339_v11  ;;  %vm1183_vm11 = vcmask (!%p188_p2), 1047559   ;;  %vm1646_vm12 = vcmask (!%p188_p2), 1043456  }
   0xc   : > { %1313 = vrot.lane.b32.xlu0 (!%p188_p2), %v2574_v13, %s2514_s24  ;;  %1362 = vrot.lane.b32.xlu1 (!%p188_p2), %v2577_v14, %s2515_s25  ;;  %v2594_v21 = vsub.s32 (!%p188_p2), %v325_v12, %v327_v7  ;;  %vm1546_vm13 = vcmask (!%p188_p2), 64512   ;;  %vm1555_vm14 = vcmask (!%p188_p2), 97280   ;;  %vm1564_vm15 = vcmask (!%p188_p2), 130048  }
   0xd   : > { %s3465_s19 = smov (!%p215_p3, %s2344_s19), 1 }
   0xe   : > { %s2374_s20 = sshll.u32 %s3465_s19, 8 }
   0xf   : > { %s2582_s23 = scalar_lea.vmem %s3458_s0, %s2374_s20  ;;  %s2523_s20 = smov 56  }
  0x10   : > { %v229_v15 = vld [vmem:[%s2582_s23 + $0x20] sm:$0xff]  ;;  %v230_v16 = vld [vmem:[%s2582_s23 + $0x28] sm:$0xff]  ;;  %v231_v17 = vld [vmem:[%s2582_s23 + $0x30] sm:$0xff] }
  0x11   : > { %v232_v18 = vld [vmem:[%s2582_s23 + $0x38] sm:$0xff]  ;;  %v264_v19 = vsel %vm257_vm3, %v229_v15, -inf  ;;  %v267_v20 = vsel %vm257_vm3, %v230_v16, -inf  ;;  %v225_v22 = vld [vmem:[%s2582_s23] sm:$0xff]  ;;  %v265_v23 = vsel %vm257_vm3, %v231_v17, -inf  ;;  %v226_v25 = vld [vmem:[%s2582_s23 + $0x8] sm:$0xff] }
  0x12   : > { %v268_v24 = vsel %vm257_vm3, %v232_v18, -inf  ;;  %v227_v26 = vld [vmem:[%s2582_s23 + $0x10] sm:$0xff]  ;;  %v228_v27 = vld [vmem:[%s2582_s23 + $0x18] sm:$0xff]  ;;  %v258_v28 = vsel %vm257_vm3, %v225_v22, -inf  ;;  %v266_v29 = vmax.f32 %v264_v19, %v265_v23  ;;  %v261_v32 = vsel %vm257_vm3, %v226_v25, -inf  ;;  %v233_v33 = vld [vmem:[%s2582_s23 + $0x40] sm:$0xff] }
  0x13   : > { %v269_v30 = vmax.f32 %v267_v20, %v268_v24  ;;  %v259_v31 = vsel %vm257_vm3, %v227_v26, -inf  ;;  %v235_v34 = vld [vmem:[%s2582_s23 + $0x50] sm:$0xff]  ;;  %v262_v36 = vsel %vm257_vm3, %v228_v27, -inf  ;;  %v270_v37 = vsel %vm257_vm3, %v233_v33, -inf }
  0x14   : > { %v260_v35 = vmax.f32 %v258_v28, %v259_v31  ;;  %v271_v38 = vsel %vm257_vm3, %v235_v34, -inf  ;;  %v356_v39 = vcombine.high %v266_v29, %v266_v29  ;;  %v363_v40 = vrot.slane %v266_v29, %v2594_v21 }
  0x15   : > { %v373_v41 = vcombine.high %v269_v30, %v269_v30  ;;  %v380_v42 = vrot.slane %v269_v30, %v2594_v21  ;;  %v2612_v43 = vmax.f32 %v261_v32, %v262_v36  ;;  %v2617_v46 = vmax.f32 %v270_v37, %v271_v38 }
  0x16   : > { %v322_v44 = vcombine.high %v260_v35, %v260_v35  ;;  %v2615_v45 = vrot.slane %v260_v35, %v2594_v21  ;;  %v370_v47 = vrot.slane %v356_v39, %v2594_v21  ;;  %v371_v48 = vcombine.high %v363_v40, %v363_v40 }
  0x17   : > { %v387_v49 = vrot.slane %v373_v41, %v2594_v21  ;;  %v388_v50 = vcombine.high %v380_v42, %v380_v42  ;;  %v715_v51 = vsel %vm658_vm4, %v363_v40, -inf  ;;  %v743_v52 = vsel %vm658_vm4, %v380_v42, -inf }
  0x18   : > { %v2624_v53 = vrot.slane %v322_v44, %v2594_v21  ;;  %v337_v54 = vcombine.high %v2615_v45, %v2615_v45  ;;  %v372_v55 = vcombine.high %v370_v47, %v370_v47  ;;  %v716_v57 = vrot.slane %v715_v51, 4 }
  0x19   : > { %v389_v56 = vcombine.high %v387_v49, %v387_v49  ;;  %v722_v58 = vsel %vm658_vm4, %v371_v48, -inf  ;;  %v729_v60 = vsel %vm658_vm4, %v370_v47, -inf  ;;  %v744_v61 = vrot.slane %v743_v52, 4 }
  0x1a   : > { %v723_v59 = vrot.slane %v722_v58, 4  ;;  %v750_v62 = vsel %vm658_vm4, %v388_v50, -inf  ;;  %v717_v63 = vmax.f32 %v715_v51, %v716_v57  ;;  %v730_v0 = vrot.slane %v729_v60, 4 }
  0x1b   : > { %v736_v1 = vsel %vm658_vm4, %v372_v55, -inf  ;;  %v751_v2 = vrot.slane %v750_v62, 4  ;;  %v745_v6 = vmax.f32 %v743_v52, %v744_v61  ;;  %v757_v7 = vsel %vm658_vm4, %v387_v49, -inf }
  0x1c   : > { %v724_v3 = vmax.f32 %v722_v58, %v723_v59  ;;  %v737_v4 = vrot.slane %v736_v1, 4  ;;  %v718_v8 = vrot.slane %v717_v63, 2  ;;  %v731_v9 = vmax.f32 %v729_v60, %v730_v0 }
  0x1d   : > { %v752_v10 = vmax.f32 %v750_v62, %v751_v2  ;;  %v758_v11 = vrot.slane %v757_v7, 4  ;;  %v746_v16 = vrot.slane %v745_v6, 2  ;;  %v764_v17 = vsel %vm658_vm4, %v389_v56, -inf }
  0x1e   : > { %v725_v12 = vrot.slane %v724_v3, 2  ;;  %v738_v15 = vmax.f32 %v736_v1, %v737_v4  ;;  %v719_v18 = vmax.f32 %v717_v63, %v718_v8  ;;  %v732_v19 = vrot.slane %v731_v9, 2 }
  0x1f   : > { %v753_v20 = vrot.slane %v752_v10, 2  ;;  %v759_v22 = vmax.f32 %v757_v7, %v758_v11  ;;  %v747_v25 = vmax.f32 %v745_v6, %v746_v16  ;;  %v765_v26 = vrot.slane %v764_v17, 4 }
  0x20   : > { %v726_v23 = vmax.f32 %v724_v3, %v725_v12  ;;  %v739_v24 = vrot.slane %v738_v15, 2  ;;  %v720_v27 = vrot.slane %v719_v18, 1  ;;  %v733_v28 = vmax.f32 %v731_v9, %v732_v19 }
  0x21   : > { %v754_v29 = vmax.f32 %v752_v10, %v753_v20  ;;  %v760_v30 = vrot.slane %v759_v22, 2  ;;  %v748_v33 = vrot.slane %v747_v25, 1  ;;  %v766_v34 = vmax.f32 %v764_v17, %v765_v26 }
  0x22   : > { %v727_v31 = vrot.slane %v726_v23, 1  ;;  %v740_v32 = vmax.f32 %v738_v15, %v739_v24  ;;  %v721_v35 = vmax.f32 %v719_v18, %v720_v27  ;;  %v734_v36 = vrot.slane %v733_v28, 1 }
  0x23   : > { %v755_v37 = vrot.slane %v754_v29, 1  ;;  %v761_v38 = vmax.f32 %v759_v22, %v760_v30  ;;  %v749_v41 = vmax.f32 %v747_v25, %v748_v33  ;;  %v767_v42 = vrot.slane %v766_v34, 2 }
  0x24   : > { %v728_v39 = vmax.f32 %v726_v23, %v727_v31  ;;  %v741_v40 = vrot.slane %v740_v32, 1  ;;  %v735_v44 = vmax.f32 %v733_v28, %v734_v36  ;;  %v338_v49 = vcombine.high %v2624_v53, %v2624_v53  ;;  %v234_v36 = vld [vmem:[%s2582_s23 + $0x48] sm:$0xff] }
  0x25   : > { %v756_v47 = vmax.f32 %v754_v29, %v755_v37  ;;  %v762_v48 = vrot.slane %v761_v38, 1  ;;  %v768_v51 = vmax.f32 %v766_v34, %v767_v42  ;;  %v339_v55 = vcombine.high %v2612_v43, %v2612_v43 }
  0x26   : > { %v742_v50 = vmax.f32 %v740_v32, %v741_v40  ;;  %v1185_v52 = vsel %vm1171_vm5, %v728_v39, %v721_v35  ;;  %v346_v58 = vrot.slane %v2612_v43, %v2594_v21  ;;  %v659_v59 = vsel %vm658_vm4, %v2615_v45, -inf }
  0x27   : > { %v763_v56 = vmax.f32 %v761_v38, %v762_v48  ;;  %v1186_v57 = vsel %vm1173_vm6, %v735_v44, %v1185_v52  ;;  %v769_v60 = vrot.slane %v768_v51, 1  ;;  %v353_v62 = vrot.slane %v339_v55, %v2594_v21  ;;  %v236_v48 = vld [vmem:[%s2582_s23 + $0x58] sm:$0xff] }
  0x28   : > { %v1187_v61 = vsel %vm1175_vm7, %v742_v50, %v1186_v57  ;;  %v660_v63 = vrot.slane %v659_v59, 4  ;;  %v354_v1 = vcombine.high %v346_v58, %v346_v58  ;;  %v666_v2 = vsel %vm658_vm4, %v337_v54, -inf }
  0x29   : > { %v1188_v0 = vsel %vm1177_vm8, %v749_v41, %v1187_v61  ;;  %v673_v43 = vsel %vm658_vm4, %v2624_v53, -inf  ;;  %v770_v3 = vmax.f32 %v768_v51, %v769_v60  ;;  %v355_v6 = vcombine.high %v353_v62, %v353_v62 }
  0x2a   : > { %v1189_v4 = vsel %vm1179_vm9, %v756_v47, %v1188_v0  ;;  %v661_v7 = vmax.f32 %v659_v59, %v660_v63  ;;  %v667_v9 = vrot.slane %v666_v2, 4  ;;  %v674_v10 = vrot.slane %v673_v43, 4 }
  0x2b   : > { %v1190_v8 = vsel %vm1181_vm10, %v763_v56, %v1189_v4  ;;  %v680_v11 = vsel %vm658_vm4, %v338_v49, -inf  ;;  %v687_v54 = vsel %vm658_vm4, %v346_v58, -inf  ;;  %v694_v22 = vsel %vm658_vm4, %v354_v1, -inf }
  0x2c   : > { %v2657_v12 = vsel %vm1183_vm11, %v770_v3, %v1190_v8  ;;  %v662_v45 = vrot.slane %v661_v7, 2  ;;  %v681_v15 = vrot.slane %v680_v11, 4  ;;  %v668_v16 = vmax.f32 %v666_v2, %v667_v9 }
  0x2d   : > { %v1237_v53 = vrot.slane %v2657_v12, 7  ;;  %v675_v17 = vmax.f32 %v673_v43, %v674_v10  ;;  %v688_v18 = vrot.slane %v687_v54, 4  ;;  %v701_v23 = vsel %vm658_vm4, %v353_v62, -inf }
  0x2e   : > { %v663_v19 = vmax.f32 %v661_v7, %v662_v45  ;;  %v682_v20 = vmax.f32 %v680_v11, %v681_v15  ;;  %v669_v25 = vrot.slane %v668_v16, 2  ;;  %v695_v30 = vrot.slane %v694_v22, 4 }
  0x2f   : > { %v2666_v24 = vsel %vm1253_vm0, 0.0, %v1237_v53  ;;  %v676_v26 = vrot.slane %v675_v17, 2  ;;  %v689_v27 = vmax.f32 %v687_v54, %v688_v18  ;;  %v702_v31 = vrot.slane %v701_v23, 4 }
  0x30   : > { %1389 = vrot.lane.b32.xlu1 %v2666_v24, %s2516_s26  ;;  %v664_v28 = vrot.slane %v663_v19, 1  ;;  %v683_v29 = vrot.slane %v682_v20, 2  ;;  %v670_v32 = vmax.f32 %v668_v16, %v669_v25  ;;  %v708_v35 = vsel %vm658_vm4, %v355_v6, -inf }
  0x31   : > { %v677_v33 = vmax.f32 %v675_v17, %v676_v26  ;;  %v690_v34 = vrot.slane %v689_v27, 2  ;;  %v696_v39 = vmax.f32 %v694_v22, %v695_v30  ;;  %v703_v40 = vmax.f32 %v701_v23, %v702_v31 }
  0x32   : > { %v665_v37 = vmax.f32 %v663_v19, %v664_v28  ;;  %v684_v38 = vmax.f32 %v682_v20, %v683_v29  ;;  %v671_v41 = vrot.slane %v670_v32, 1  ;;  %v709_v47 = vrot.slane %v708_v35, 4 }
  0x33   : > { %v678_v42 = vrot.slane %v677_v33, 1  ;;  %v691_v44 = vmax.f32 %v689_v27, %v690_v34  ;;  %v697_v50 = vrot.slane %v696_v39, 2  ;;  %v704_v51 = vrot.slane %v703_v40, 2 }
  0x34   : > { %v685_v49 = vrot.slane %v684_v38, 1  ;;  %1466 = vrot.lane.b32.xlu1 %v2666_v24, %s2517_s27  ;;  %v273_v52 = vsel %vm257_vm3, %v234_v36, -inf  ;;  %v672_v55 = vmax.f32 %v670_v32, %v671_v41  ;;  %v710_v58 = vmax.f32 %v708_v35, %v709_v47 }
  0x35   : > { %v679_v56 = vmax.f32 %v677_v33, %v678_v42  ;;  %v692_v57 = vrot.slane %v691_v44, 1  ;;  %v698_v60 = vmax.f32 %v696_v39, %v697_v50  ;;  %v705_v61 = vmax.f32 %v703_v40, %v704_v51 }
  0x36   : > { %v686_v59 = vmax.f32 %v684_v38, %v685_v49  ;;  %v274_v62 = vsel %vm257_vm3, %v236_v48, -inf  ;;  %v711_v0 = vrot.slane %v710_v58, 2  ;;  %v1172_v1 = vsel %vm1171_vm5, %v672_v55, %v665_v37 }
  0x37   : > { %v693_v63 = vmax.f32 %v691_v44, %v692_v57  ;;  %v275_v2 = vmax.f32 %v273_v52, %v274_v62  ;;  %v699_v43 = vrot.slane %v698_v60, 1  ;;  %v706_v3 = vrot.slane %v705_v61, 1 }
  0x38   : > { %v1174_v4 = vsel %vm1173_vm6, %v679_v56, %v1172_v1  ;;  %v390_v6 = vcombine.high %v2617_v46, %v2617_v46  ;;  %v712_v7 = vmax.f32 %v710_v58, %v711_v0  ;;  %v397_v9 = vrot.slane %v2617_v46, %v2594_v21 }
  0x39   : > { %v1176_v8 = vsel %vm1175_vm7, %v686_v59, %v1174_v4  ;;  %v407_v10 = vcombine.high %v275_v2, %v275_v2  ;;  %v700_v11 = vmax.f32 %v698_v60, %v699_v43  ;;  %v707_v45 = vmax.f32 %v705_v61, %v706_v3 }
  0x3a   : > { %v1178_v15 = vsel %vm1177_vm8, %v693_v63, %v1176_v8  ;;  %v404_v54 = vrot.slane %v390_v6, %v2594_v21  ;;  %v713_v16 = vrot.slane %v712_v7, 1  ;;  %v405_v17 = vcombine.high %v397_v9, %v397_v9 }
  0x3b   : > { %v414_v18 = vrot.slane %v275_v2, %v2594_v21  ;;  %v421_v19 = vrot.slane %v407_v10, %v2594_v21  ;;  %v1180_v20 = vsel %vm1179_vm9, %v700_v11, %v1178_v15  ;;  %v771_v23 = vsel %vm658_vm4, %v397_v9, -inf  ;;  %v237_v10 = vld [vmem:[%s2582_s23 + $0x60] sm:$0xff]  ;;  %v239_v11 = vld [vmem:[%s2582_s23 + $0x70] sm:$0xff] }
  0x3c   : > { %v406_v22 = vcombine.high %v404_v54, %v404_v54  ;;  %v785_v46 = vsel %vm658_vm4, %v404_v54, -inf  ;;  %v714_v25 = vmax.f32 %v712_v7, %v713_v16  ;;  %v1182_v26 = vsel %vm1181_vm10, %v707_v45, %v1180_v20 }
  0x3d   : > { %v422_v27 = vcombine.high %v414_v18, %v414_v18  ;;  %v423_v28 = vcombine.high %v421_v19, %v421_v19  ;;  %v772_v29 = vrot.slane %v771_v23, 4  ;;  %v778_v30 = vsel %vm658_vm4, %v405_v17, -inf }
  0x3e   : > { %v786_v31 = vrot.slane %v785_v46, 4  ;;  %v792_v32 = vsel %vm658_vm4, %v406_v22, -inf  ;;  %v2695_v33 = vsel %vm1183_vm11, %v714_v25, %v1182_v26  ;;  %v779_v34 = vrot.slane %v778_v30, 4  ;;  %v238_v22 = vld [vmem:[%s2582_s23 + $0x68] sm:$0xff] }
  0x3f   : > { %v793_v35 = vrot.slane %v792_v32, 4  ;;  %v799_v36 = vsel %vm658_vm4, %v414_v18, -inf  ;;  %v1236_v37 = vrot.slane %v2695_v33, 7  ;;  %v773_v38 = vmax.f32 %v771_v23, %v772_v29  ;;  %v240_v23 = vld [vmem:[%s2582_s23 + $0x78] sm:$0xff] }
  0x40   : > { %v787_v39 = vmax.f32 %v785_v46, %v786_v31  ;;  %v800_v40 = vrot.slane %v799_v36, 4  ;;  %v780_v41 = vmax.f32 %v778_v30, %v779_v34  ;;  %v806_v44 = vsel %vm658_vm4, %v422_v27, -inf }
  0x41   : > { %v794_v42 = vmax.f32 %v792_v32, %v793_v35  ;;  %v813_v47 = vsel %vm658_vm4, %v421_v19, -inf  ;;  %v2704_v48 = vsel %vm1253_vm0, 0.0, %v1236_v37  ;;  %v774_v49 = vrot.slane %v773_v38, 2 }
  0x42   : > { %v788_v50 = vrot.slane %v787_v39, 2  ;;  %v801_v51 = vmax.f32 %v799_v36, %v800_v40  ;;  %1387 = vrot.lane.b32.xlu0 %v2704_v48, %s2516_s26  ;;  %v781_v52 = vrot.slane %v780_v41, 2  ;;  %v807_v56 = vrot.slane %v806_v44, 4 }
  0x43   : > { %v795_v55 = vrot.slane %v794_v42, 2  ;;  %v814_v57 = vrot.slane %v813_v47, 4  ;;  %v775_v58 = vmax.f32 %v773_v38, %v774_v49  ;;  %v820_v61 = vsel %vm658_vm4, %v423_v28, -inf }
  0x44   : > { %v789_v59 = vmax.f32 %v787_v39, %v788_v50  ;;  %v802_v60 = vrot.slane %v801_v51, 2  ;;  %v782_v62 = vmax.f32 %v780_v41, %v781_v52  ;;  %v808_v0 = vmax.f32 %v806_v44, %v807_v56 }
  0x45   : > { %v796_v63 = vmax.f32 %v794_v42, %v795_v55  ;;  %v815_v1 = vmax.f32 %v813_v47, %v814_v57  ;;  %v776_v2 = vrot.slane %v775_v58, 1  ;;  %v821_v4 = vrot.slane %v820_v61, 4 }
  0x46   : > { %v790_v43 = vrot.slane %v789_v59, 1  ;;  %v803_v3 = vmax.f32 %v801_v51, %v802_v60  ;;  %v783_v6 = vrot.slane %v782_v62, 1  ;;  %v809_v8 = vrot.slane %v808_v0, 2 }
  0x47   : > { %v797_v7 = vrot.slane %v796_v63, 1  ;;  %v816_v9 = vrot.slane %v815_v1, 2  ;;  %v777_v45 = vmax.f32 %v775_v58, %v776_v2  ;;  %v822_v16 = vmax.f32 %v820_v61, %v821_v4 }
  0x48   : > { %v791_v15 = vmax.f32 %v789_v59, %v790_v43  ;;  %v804_v54 = vrot.slane %v803_v3, 1  ;;  %v784_v17 = vmax.f32 %v782_v62, %v783_v6  ;;  %v810_v19 = vmax.f32 %v808_v0, %v809_v8 }
  0x49   : > { %v798_v18 = vmax.f32 %v796_v63, %v797_v7  ;;  %v817_v20 = vmax.f32 %v815_v1, %v816_v9  ;;  %v823_v25 = vrot.slane %v822_v16, 2  ;;  %v276_v26 = vsel %vm257_vm3, %v237_v10, -inf }
  0x4a   : > { %v805_v46 = vmax.f32 %v803_v3, %v804_v54  ;;  %v277_v27 = vsel %vm257_vm3, %v239_v11, -inf  ;;  %v811_v28 = vrot.slane %v810_v19, 1  ;;  %v1192_v30 = vsel %vm1171_vm5, %v784_v17, %v777_v45 }
  0x4b   : > { %v818_v29 = vrot.slane %v817_v20, 1  ;;  %v278_v31 = vmax.f32 %v276_v26, %v277_v27  ;;  %v824_v32 = vmax.f32 %v822_v16, %v823_v25  ;;  %v1193_v34 = vsel %vm1173_vm6, %v791_v15, %v1192_v30 }
  0x4c   : > { %v279_v35 = vsel %vm257_vm3, %v238_v22, -inf  ;;  %v280_v36 = vsel %vm257_vm3, %v240_v23, -inf  ;;  %v812_v38 = vmax.f32 %v810_v19, %v811_v28  ;;  %v1194_v40 = vsel %vm1175_vm7, %v798_v18, %v1193_v34 }
  0x4d   : > { %v819_v39 = vmax.f32 %v817_v20, %v818_v29  ;;  %v281_v41 = vmax.f32 %v279_v35, %v280_v36  ;;  %v825_v42 = vrot.slane %v824_v32, 1  ;;  %v1195_v44 = vsel %vm1177_vm8, %v805_v46, %v1194_v40 }
  0x4e   : > { %v424_v47 = vcombine.high %v278_v31, %v278_v31  ;;  %v431_v49 = vrot.slane %v278_v31, %v2594_v21  ;;  %v1196_v50 = vsel %vm1179_vm9, %v812_v38, %v1195_v44  ;;  %v2727_v55 = vsel %vm1253_vm0, %v1236_v37, 0.0 }
  0x4f   : > { %v441_v51 = vcombine.high %v281_v41, %v281_v41  ;;  %v448_v52 = vrot.slane %v281_v41, %v2594_v21  ;;  %v826_v56 = vmax.f32 %v824_v32, %v825_v42  ;;  %v1197_v57 = vsel %vm1181_vm10, %v819_v39, %v1196_v50 }
  0x50   : > { %v438_v58 = vrot.slane %v424_v47, %v2594_v21  ;;  %v439_v59 = vcombine.high %v431_v49, %v431_v49  ;;  %v827_v62 = vsel %vm658_vm4, %v431_v49, -inf }
  0x51   : > { %v455_v60 = vrot.slane %v441_v51, %v2594_v21  ;;  %v456_v61 = vcombine.high %v448_v52, %v448_v52  ;;  %v855_v63 = vsel %vm658_vm4, %v448_v52, -inf  ;;  %v2735_v0 = vsel %vm1183_vm11, %v826_v56, %v1197_v57 }
  0x52   : > { %v440_v33 = vcombine.high %v438_v58, %v438_v58  ;;  %v828_v1 = vrot.slane %v827_v62, 4  ;;  %v834_v37 = vsel %vm658_vm4, %v439_v59, -inf  ;;  %v1238_v2 = vrot.slane %v2735_v0, 7 }
  0x53   : > { %v457_v43 = vcombine.high %v455_v60, %v455_v60  ;;  %v835_v3 = vrot.slane %v834_v37, 4  ;;  %v841_v4 = vsel %vm658_vm4, %v438_v58, -inf  ;;  %v856_v9 = vrot.slane %v855_v63, 4 }
  0x54   : > { %v829_v6 = vmax.f32 %v827_v62, %v828_v1  ;;  %v842_v7 = vrot.slane %v841_v4, 4  ;;  %v848_v8 = vsel %vm658_vm4, %v440_v33, -inf  ;;  %v2744_v10 = vsel %vm1253_vm0, 0.0, %v1238_v2 }
  0x55   : > { %v836_v11 = vmax.f32 %v834_v37, %v835_v3  ;;  %v849_v45 = vrot.slane %v848_v8, 4  ;;  %v862_v15 = vsel %vm658_vm4, %v456_v61, -inf  ;;  %1468 = vrot.lane.b32.xlu0 %v2744_v10, %s2517_s27  ;;  %1391 = vrot.lane.b32.xlu1 %v2744_v10, %s2516_s26  ;;  %v857_v17 = vmax.f32 %v855_v63, %v856_v9 }
  0x56   : > { %v830_v54 = vrot.slane %v829_v6, 2  ;;  %v843_v16 = vmax.f32 %v841_v4, %v842_v7  ;;  %v863_v18 = vrot.slane %v862_v15, 4  ;;  %v869_v22 = vsel %vm658_vm4, %v455_v60, -inf }
  0x57   : > { %v837_v19 = vrot.slane %v836_v11, 2  ;;  %v850_v20 = vmax.f32 %v848_v8, %v849_v45  ;;  %v876_v23 = vsel %vm658_vm4, %v457_v43, -inf  ;;  %v858_v26 = vrot.slane %v857_v17, 2 }
  0x58   : > { %v831_v46 = vmax.f32 %v829_v6, %v830_v54  ;;  %v844_v25 = vrot.slane %v843_v16, 2  ;;  %v864_v27 = vmax.f32 %v862_v15, %v863_v18  ;;  %v870_v30 = vrot.slane %v869_v22, 4 }
  0x59   : > { %v838_v28 = vmax.f32 %v836_v11, %v837_v19  ;;  %v851_v29 = vrot.slane %v850_v20, 2  ;;  %v877_v31 = vrot.slane %v876_v23, 4  ;;  %v859_v35 = vmax.f32 %v857_v17, %v858_v26 }
  0x5a   : > { %v832_v32 = vrot.slane %v831_v46, 1  ;;  %v845_v34 = vmax.f32 %v843_v16, %v844_v25  ;;  %v865_v36 = vrot.slane %v864_v27, 2  ;;  %v871_v40 = vmax.f32 %v869_v22, %v870_v30  ;;  %v243_v22 = vld [vmem:[%s2582_s23 + $0x90] sm:$0xff] }
  0x5b   : > { %v839_v38 = vrot.slane %v838_v28, 1  ;;  %v852_v39 = vmax.f32 %v850_v20, %v851_v29  ;;  %v878_v41 = vmax.f32 %v876_v23, %v877_v31  ;;  %v860_v47 = vrot.slane %v859_v35, 1  ;;  %v241_v20 = vld [vmem:[%s2582_s23 + $0x80] sm:$0xff] }
  0x5c   : > { %v833_v42 = vmax.f32 %v831_v46, %v832_v32  ;;  %v846_v44 = vrot.slane %v845_v34, 1  ;;  %v866_v49 = vmax.f32 %v864_v27, %v865_v36  ;;  %v872_v52 = vrot.slane %v871_v40, 2  ;;  %v242_v27 = vld [vmem:[%s2582_s23 + $0x88] sm:$0xff]  ;;  %v245_v31 = vld [vmem:[%s2582_s23 + $0xa0] sm:$0xff] }
  0x5d   : > { %v840_v50 = vmax.f32 %v838_v28, %v839_v38  ;;  %v853_v51 = vrot.slane %v852_v39, 1  ;;  %v879_v56 = vrot.slane %v878_v41, 2  ;;  %v861_v58 = vmax.f32 %v859_v35, %v860_v47  ;;  %v244_v28 = vld [vmem:[%s2582_s23 + $0x98] sm:$0xff] }
  0x5e   : > { %v847_v57 = vmax.f32 %v845_v34, %v846_v44  ;;  %v867_v59 = vrot.slane %v866_v49, 1  ;;  %v1341_v60 = vrot.slane %v2704_v48, 2  ;;  %v873_v62 = vmax.f32 %v871_v40, %v872_v52 }
  0x5f   : > { %v854_v61 = vmax.f32 %v852_v39, %v853_v51  ;;  %v880_v63 = vmax.f32 %v878_v41, %v879_v56  ;;  %v1199_v33 = vsel %vm1171_vm5, %v840_v50, %v833_v42  ;;  %v1342_v43 = vrot.slane %v2727_v55, 2  ;;  %v247_v50 = vld [vmem:[%s2582_s23 + $0xb0] sm:$0xff] }
  0x60   : > { %v868_v1 = vmax.f32 %v866_v49, %v867_v59  ;;  %v1200_v37 = vsel %vm1173_vm6, %v847_v57, %v1199_v33  ;;  %v1292_v3 = vrot.slane %v2704_v48, 1  ;;  %v874_v4 = vrot.slane %v873_v62, 1  ;;  %v246_v49 = vld [vmem:[%s2582_s23 + $0xa8] sm:$0xff] }
  0x61   : > { %v881_v6 = vrot.slane %v880_v63, 1  ;;  %v1201_v7 = vsel %vm1175_vm7, %v854_v61, %v1200_v37  ;;  %v1293_v8 = vrot.slane %v2727_v55, 1  ;;  %v1343_v11 = vsel %vm1337_vm2, %v1341_v60, %v1342_v43 }
  0x62   : > { %v1202_v9 = vsel %vm1177_vm8, %v861_v58, %v1201_v7  ;;  %v1265_v45 = vsel %vm1253_vm0, %v1237_v53, 0.0  ;;  %v1295_v15 = vrot.slane %v2666_v24, 1  ;;  %v875_v54 = vmax.f32 %v873_v62, %v874_v4  ;;  %1364 = vrot.lane.b32.xlu1 %v1343_v11, %s2515_s25 }
  0x63   : > { %v882_v16 = vmax.f32 %v880_v63, %v881_v6  ;;  %v1203_v17 = vsel %vm1179_vm9, %v868_v1, %v1202_v9  ;;  %v2769_v55 = vsel %vm1288_vm1, %v1292_v3, %v1293_v8  ;;  %v1296_v18 = vrot.slane %v1265_v45, 1  ;;  %v248_v63 = vld [vmem:[%s2582_s23 + $0xb8] sm:$0xff] }
  0x64   : > { %v1344_v19 = vrot.slane %v2666_v24, 2  ;;  %v1345_v12 = vrot.slane %v1265_v45, 2  ;;  %v1266_v53 = vsel %vm1253_vm0, %v1238_v2, 0.0  ;;  %v1204_v23 = vsel %vm1181_vm10, %v875_v54, %v1203_v17 }
  0x65   : > { %v1298_v46 = vrot.slane %v2744_v10, 1  ;;  %v1299_v25 = vrot.slane %v1266_v53, 1  ;;  %v1347_v26 = vrot.slane %v2744_v10, 2  ;;  %v1205_v29 = vsel %vm1183_vm11, %v882_v16, %v1204_v23 }
  0x66   : > { %v2784_v30 = vsel %vm1288_vm1, %v1295_v15, %v1296_v18  ;;  %v2787_v0 = vsel %vm1337_vm2, %v1344_v19, %v1345_v12  ;;  %v1348_v2 = vrot.slane %v1266_v53, 2  ;;  %v1239_v32 = vrot.slane %v1205_v29, 7 }
  0x67   : > { %1317 = vrot.lane.b32.xlu1 %v2784_v30, %s2514_s24  ;;  %v2793_v34 = vsel %vm1288_vm1, %v1298_v46, %v1299_v25  ;;  %v282_v35 = vsel %vm257_vm3, %v241_v20, -inf  ;;  %v283_v36 = vsel %vm257_vm3, %v243_v22, -inf  ;;  %v285_v40 = vsel %vm257_vm3, %v242_v27, -inf }
  0x68   : > { %v2798_v38 = vsel %vm1337_vm2, %v1347_v26, %v1348_v2  ;;  %v284_v39 = vmax.f32 %v282_v35, %v283_v36  ;;  %v286_v41 = vsel %vm257_vm3, %v244_v28, -inf  ;;  %v2803_v42 = vsel %vm1253_vm0, 0.0, %v1239_v32 }
  0x69   : > { %v1267_v44 = vsel %vm1253_vm0, %v1239_v32, 0.0  ;;  %v287_v47 = vmax.f32 %v285_v40, %v286_v41  ;;  %v288_v51 = vsel %vm257_vm3, %v245_v31, -inf  ;;  %1393 = vrot.lane.b32.xlu0 %v2803_v42, %s2516_s26  ;;  %v1301_v52 = vrot.slane %v2803_v42, 1 }
  0x6a   : > { %v1302_v56 = vrot.slane %v1267_v44, 1  ;;  %v1350_v57 = vrot.slane %v2803_v42, 2  ;;  %v1351_v58 = vrot.slane %v1267_v44, 2  ;;  %v458_v59 = vcombine.high %v284_v39, %v284_v39 }
  0x6b   : > { %1442 = vrot.lane.b32.xlu1 %v1343_v11, %s2518_s28  ;;  %v465_v60 = vrot.slane %v284_v39, %v2594_v21  ;;  %v475_v61 = vcombine.high %v287_v47, %v287_v47  ;;  %v482_v62 = vrot.slane %v287_v47, %v2594_v21  ;;  %v289_v37 = vsel %vm257_vm3, %v247_v50, -inf }
  0x6c   : > { %v2818_v33 = vsel %vm1288_vm1, %v1301_v52, %v1302_v56  ;;  %v2821_v1 = vsel %vm1337_vm2, %v1350_v57, %v1351_v58  ;;  %v2825_v43 = vsel %vm257_vm3, %v246_v49, -inf  ;;  %v472_v3 = vrot.slane %v458_v59, %v2594_v21 }
  0x6d   : > { %v473_v4 = vcombine.high %v465_v60, %v465_v60  ;;  %v489_v6 = vrot.slane %v475_v61, %v2594_v21  ;;  %v490_v7 = vcombine.high %v482_v62, %v482_v62  ;;  %1315 = vrot.lane.b32.xlu0 %v2769_v55, %s2514_s24  ;;  %v883_v8 = vsel %vm658_vm4, %v465_v60, -inf }
  0x6e   : > { %v911_v9 = vsel %vm658_vm4, %v482_v62, -inf  ;;  %v2833_v11 = vmax.f32 %v288_v51, %v289_v37  ;;  %v292_v45 = vsel %vm257_vm3, %v248_v63, -inf  ;;  %v474_v15 = vcombine.high %v472_v3, %v472_v3 }
  0x6f   : > { %1366 = vrot.lane.b32.xlu1 %v2787_v0, %s2515_s25  ;;  %v491_v54 = vcombine.high %v489_v6, %v489_v6  ;;  %v884_v16 = vrot.slane %v883_v8, 4  ;;  %v890_v17 = vsel %vm658_vm4, %v473_v4, -inf  ;;  %v897_v19 = vsel %vm658_vm4, %v472_v3, -inf }
  0x70   : > { %v891_v18 = vrot.slane %v890_v17, 4  ;;  %v912_v12 = vrot.slane %v911_v9, 4  ;;  %v918_v53 = vsel %vm658_vm4, %v490_v7, -inf  ;;  %v898_v22 = vrot.slane %v897_v19, 4 }
  0x71   : > { %v885_v20 = vmax.f32 %v883_v8, %v884_v16  ;;  %v904_v23 = vsel %vm658_vm4, %v474_v15, -inf  ;;  %v919_v46 = vrot.slane %v918_v53, 4  ;;  %1415 = vrot.lane.b32.xlu0 %v2769_v55, %s2519_s29  ;;  %v925_v28 = vsel %vm658_vm4, %v489_v6, -inf }
  0x72   : > { %v892_v25 = vmax.f32 %v890_v17, %v891_v18  ;;  %v905_v26 = vrot.slane %v904_v23, 4  ;;  %v913_v27 = vmax.f32 %v911_v9, %v912_v12  ;;  %v899_v2 = vmax.f32 %v897_v19, %v898_v22 }
  0x73   : > { %1490 = vrot.lane.b32.xlu1 %v2784_v30, %s2520_s30  ;;  %v886_v29 = vrot.slane %v885_v20, 2  ;;  %v920_v31 = vmax.f32 %v918_v53, %v919_v46  ;;  %v926_v32 = vrot.slane %v925_v28, 4  ;;  %v932_v40 = vsel %vm658_vm4, %v491_v54, -inf }
  0x74   : > { %v893_v35 = vrot.slane %v892_v25, 2  ;;  %v906_v36 = vmax.f32 %v904_v23, %v905_v26  ;;  %v914_v39 = vrot.slane %v913_v27, 2  ;;  %v900_v55 = vrot.slane %v899_v2, 2 }
  0x75   : > { %v887_v41 = vmax.f32 %v885_v20, %v886_v29  ;;  %v921_v44 = vrot.slane %v920_v31, 2  ;;  %v927_v47 = vmax.f32 %v925_v28, %v926_v32  ;;  %1417 = vrot.lane.b32.xlu0 %v2784_v30, %s2519_s29  ;;  %v933_v52 = vrot.slane %v932_v40, 4 }
  0x76   : > { %v894_v49 = vmax.f32 %v892_v25, %v893_v35  ;;  %v907_v50 = vrot.slane %v906_v36, 2  ;;  %v915_v51 = vmax.f32 %v913_v27, %v914_v39  ;;  %v901_v57 = vmax.f32 %v899_v2, %v900_v55 }
  0x77   : > { %1419 = vrot.lane.b32.xlu1 %v2793_v34, %s2519_s29  ;;  %v888_v56 = vrot.slane %v887_v41, 1  ;;  %v922_v58 = vmax.f32 %v920_v31, %v921_v44  ;;  %v928_v59 = vrot.slane %v927_v47, 2  ;;  %v934_v63 = vmax.f32 %v932_v40, %v933_v52 }
  0x78   : > { %v895_v60 = vrot.slane %v894_v49, 1  ;;  %v908_v61 = vmax.f32 %v906_v36, %v907_v50  ;;  %v916_v62 = vrot.slane %v915_v51, 1  ;;  %v902_v3 = vrot.slane %v901_v57, 1 }
  0x79   : > { %v889_v37 = vmax.f32 %v887_v41, %v888_v56  ;;  %v923_v4 = vrot.slane %v922_v58, 1  ;;  %v929_v6 = vmax.f32 %v927_v47, %v928_v59  ;;  %1319 = vrot.lane.b32.xlu0 %v2793_v34, %s2514_s24  ;;  %v935_v9 = vrot.slane %v934_v63, 2 }
  0x7a   : > { %v896_v30 = vmax.f32 %v894_v49, %v895_v60  ;;  %v909_v7 = vrot.slane %v908_v61, 1  ;;  %v917_v8 = vmax.f32 %v915_v51, %v916_v62  ;;  %v903_v15 = vmax.f32 %v901_v57, %v902_v3 }
  0x7b   : > { %1514 = vrot.lane.b32.xlu1 %v2787_v0, %s2521_s6  ;;  %v924_v54 = vmax.f32 %v922_v58, %v923_v4  ;;  %v930_v16 = vrot.slane %v929_v6, 1  ;;  %v293_v17 = vmax.f32 %v2825_v43, %v292_v45  ;;  %v936_v19 = vmax.f32 %v934_v63, %v935_v9 }
  0x7c   : > { %v910_v18 = vmax.f32 %v908_v61, %v909_v7  ;;  %v1206_v12 = vsel %vm1171_vm5, %v896_v30, %v889_v37  ;;  %v492_v53 = vcombine.high %v2833_v11, %v2833_v11  ;;  %v499_v23 = vrot.slane %v2833_v11, %v2594_v21 }
  0x7d   : > { %v931_v20 = vmax.f32 %v929_v6, %v930_v16  ;;  %v1207_v22 = vsel %vm1173_vm6, %v903_v15, %v1206_v12  ;;  %v509_v46 = vcombine.high %v293_v17, %v293_v17  ;;  %1444 = vrot.lane.b32.xlu0 %v2787_v0, %s2518_s28  ;;  %v937_v25 = vrot.slane %v936_v19, 1 }
  0x7e   : > { %v1208_v43 = vsel %vm1175_vm7, %v910_v18, %v1207_v22  ;;  %v506_v45 = vrot.slane %v492_v53, %v2594_v21  ;;  %v516_v26 = vrot.slane %v293_v17, %v2594_v21  ;;  %v507_v28 = vcombine.high %v499_v23, %v499_v23 }
  0x7f   : > { %1421 = vrot.lane.b32.xlu1 %v2818_v33, %s2519_s29  ;;  %v1209_v27 = vsel %vm1177_vm8, %v917_v8, %v1208_v43  ;;  %v523_v29 = vrot.slane %v509_v46, %v2594_v21  ;;  %v939_v11 = vsel %vm658_vm4, %v499_v23, -inf  ;;  %v938_v2 = vmax.f32 %v936_v19, %v937_v25  ;;  %v249_v46 = vld [vmem:[%s2582_s23 + $0xc0] sm:$0xff] }
  0x80   : > { %v1210_v0 = vsel %vm1179_vm9, %v924_v54, %v1209_v27  ;;  %v508_v31 = vcombine.high %v506_v45, %v506_v45  ;;  %v524_v32 = vcombine.high %v516_v26, %v516_v26  ;;  %v940_v39 = vrot.slane %v939_v11, 4 }
  0x81   : > { %v1211_v35 = vsel %vm1181_vm10, %v931_v20, %v1210_v0  ;;  %v525_v36 = vcombine.high %v523_v29, %v523_v29  ;;  %v946_v40 = vsel %vm658_vm4, %v507_v28, -inf  ;;  %1368 = vrot.lane.b32.xlu0 %v2798_v38, %s2515_s25  ;;  %v953_v44 = vsel %vm658_vm4, %v506_v45, -inf  ;;  %v251_v0 = vld [vmem:[%s2582_s23 + $0xd0] sm:$0xff] }
  0x82   : > { %v1212_v41 = vsel %vm1183_vm11, %v938_v2, %v1211_v35  ;;  %v947_v55 = vrot.slane %v946_v40, 4  ;;  %v960_v47 = vsel %vm658_vm4, %v508_v31, -inf  ;;  %v941_v50 = vmax.f32 %v939_v11, %v940_v39  ;;  %v250_v2 = vld [vmem:[%s2582_s23 + $0xc8] sm:$0xff] }
  0x83   : > { %1516 = vrot.lane.b32.xlu1 %v2798_v38, %s2521_s6  ;;  %v1240_v49 = vrot.slane %v1212_v41, 7  ;;  %v954_v51 = vrot.slane %v953_v44, 4  ;;  %v961_v52 = vrot.slane %v960_v47, 4  ;;  %v967_v57 = vsel %vm658_vm4, %v516_v26, -inf }
  0x84   : > { %v948_v56 = vmax.f32 %v946_v40, %v947_v55  ;;  %v974_v58 = vsel %vm658_vm4, %v524_v32, -inf  ;;  %v981_v59 = vsel %vm658_vm4, %v523_v29, -inf  ;;  %v942_v62 = vrot.slane %v941_v50, 2 }
  0x85   : > { %v2887_v60 = vsel %vm1253_vm0, 0.0, %v1240_v49  ;;  %v1268_v61 = vsel %vm1253_vm0, %v1240_v49, 0.0  ;;  %v955_v63 = vmax.f32 %v953_v44, %v954_v51  ;;  %1492 = vrot.lane.b32.xlu0 %v2793_v34, %s2520_s30  ;;  %v962_v9 = vmax.f32 %v960_v47, %v961_v52  ;;  %v252_v44 = vld [vmem:[%s2582_s23 + $0xd8] sm:$0xff]  ;;  %v253_v47 = vld [vmem:[%s2582_s23 + $0xe0] sm:$0xff] }
  0x86   : > { %v1304_v37 = vrot.slane %v2887_v60, 1  ;;  %v1305_v3 = vrot.slane %v1268_v61, 1  ;;  %v1353_v4 = vrot.slane %v2887_v60, 2  ;;  %v1354_v6 = vrot.slane %v1268_v61, 2 }
  0x87   : > { %1370 = vrot.lane.b32.xlu1 %v2821_v1, %s2515_s25  ;;  %v943_v30 = vmax.f32 %v941_v50, %v942_v62  ;;  %v949_v7 = vrot.slane %v948_v56, 2  ;;  %v956_v8 = vrot.slane %v955_v63, 2  ;;  %v968_v34 = vrot.slane %v967_v57, 4 }
  0x88   : > { %v2897_v15 = vsel %vm1288_vm1, %v1304_v37, %v1305_v3  ;;  %v2900_v54 = vsel %vm1337_vm2, %v1353_v4, %v1354_v6  ;;  %v975_v16 = vrot.slane %v974_v58, 4  ;;  %v963_v12 = vrot.slane %v962_v9, 2 }
  0x89   : > { %v944_v17 = vrot.slane %v943_v30, 1  ;;  %v950_v18 = vmax.f32 %v948_v56, %v949_v7  ;;  %v957_v19 = vmax.f32 %v955_v63, %v956_v8  ;;  %1321 = vrot.lane.b32.xlu0 %v2818_v33, %s2514_s24  ;;  %v969_v53 = vmax.f32 %v967_v57, %v968_v34  ;;  %v255_v63 = vld [vmem:[%s2582_s23 + $0xf0] sm:$0xff] }
  0x8a   : > { %v976_v20 = vmax.f32 %v974_v58, %v975_v16  ;;  %v982_v22 = vrot.slane %v981_v59, 4  ;;  %v988_v23 = vsel %vm658_vm4, %v525_v36, -inf  ;;  %v964_v26 = vmax.f32 %v962_v9, %v963_v12 }
  0x8b   : > { %1470 = vrot.lane.b32.xlu1 %v2803_v42, %s2517_s27  ;;  %v945_v25 = vmax.f32 %v943_v30, %v944_v17  ;;  %v951_v43 = vrot.slane %v950_v18, 1  ;;  %v958_v45 = vrot.slane %v957_v19, 1  ;;  %v970_v27 = vrot.slane %v969_v53, 2 }
  0x8c   : > { %v977_v28 = vrot.slane %v976_v20, 2  ;;  %v983_v29 = vmax.f32 %v981_v59, %v982_v22  ;;  %v989_v11 = vrot.slane %v988_v23, 4  ;;  %v965_v35 = vrot.slane %v964_v26, 1 }
  0x8d   : > { %v952_v31 = vmax.f32 %v950_v18, %v951_v43  ;;  %v959_v32 = vmax.f32 %v957_v19, %v958_v45  ;;  %v294_v36 = vsel %vm257_vm3, %v249_v46, -inf  ;;  %1446 = vrot.lane.b32.xlu0 %v2798_v38, %s2518_s28  ;;  %v971_v39 = vmax.f32 %v969_v53, %v970_v27 }
  0x8e   : > { %v978_v40 = vmax.f32 %v976_v20, %v977_v28  ;;  %v984_v41 = vrot.slane %v983_v29, 2  ;;  %v990_v55 = vmax.f32 %v988_v23, %v989_v11  ;;  %v966_v49 = vmax.f32 %v964_v26, %v965_v35 }
  0x8f   : > { %1395 = vrot.lane.b32.xlu1 %v2887_v60, %s2516_s26  ;;  %v1213_v50 = vsel %vm1171_vm5, %v952_v31, %v945_v25  ;;  %v295_v51 = vsel %vm257_vm3, %v251_v0, -inf  ;;  %v297_v52 = vsel %vm257_vm3, %v250_v2, -inf  ;;  %v972_v56 = vrot.slane %v971_v39, 1 }
  0x90   : > { %v979_v57 = vrot.slane %v978_v40, 1  ;;  %v985_v38 = vmax.f32 %v983_v29, %v984_v41  ;;  %v991_v58 = vrot.slane %v990_v55, 2  ;;  %v1214_v59 = vsel %vm1173_vm6, %v959_v32, %v1213_v50 }
  0x91   : > { %v296_v61 = vmax.f32 %v294_v36, %v295_v51  ;;  %v298_v62 = vsel %vm257_vm3, %v252_v44, -inf  ;;  %v2924_v37 = vsel %vm257_vm3, %v253_v47, -inf  ;;  %1323 = vrot.lane.b32.xlu0 %v2897_v15, %s2514_s24  ;;  %v973_v3 = vmax.f32 %v971_v39, %v972_v56 }
  0x92   : > { %v980_v4 = vmax.f32 %v978_v40, %v979_v57  ;;  %v986_v6 = vrot.slane %v985_v38, 1  ;;  %v992_v30 = vmax.f32 %v990_v55, %v991_v58  ;;  %v1215_v7 = vsel %vm1175_vm7, %v966_v49, %v1214_v59 }
  0x93   : > { %1494 = vrot.lane.b32.xlu1 %v2818_v33, %s2520_s30  ;;  %v299_v8 = vmax.f32 %v297_v52, %v298_v62  ;;  %v526_v9 = vcombine.high %v296_v61, %v296_v61  ;;  %v533_v34 = vrot.slane %v296_v61, %v2594_v21  ;;  %v1216_v18 = vsel %vm1177_vm8, %v973_v3, %v1215_v7 }
  0x94   : > { %v987_v16 = vmax.f32 %v985_v38, %v986_v6  ;;  %v993_v17 = vrot.slane %v992_v30, 1  ;;  %v2934_v19 = vsel %vm257_vm3, %v255_v63, -inf  ;;  %v1217_v12 = vsel %vm1179_vm9, %v980_v4, %v1216_v18 }
  0x95   : > { %v540_v53 = vrot.slane %v526_v9, %v2594_v21  ;;  %v541_v20 = vcombine.high %v533_v34, %v533_v34  ;;  %v543_v22 = vcombine.high %v299_v8, %v299_v8  ;;  %1448 = vrot.lane.b32.xlu0 %v2821_v1, %s2518_s28  ;;  %v550_v46 = vrot.slane %v299_v8, %v2594_v21 }
  0x96   : > { %v994_v33 = vmax.f32 %v992_v30, %v993_v17  ;;  %v1218_v23 = vsel %vm1181_vm10, %v987_v16, %v1217_v12  ;;  %v995_v25 = vsel %vm658_vm4, %v533_v34, -inf }
  0x97   : > { %1423 = vrot.lane.b32.xlu1 %v2897_v15, %s2519_s29  ;;  %v542_v43 = vcombine.high %v540_v53, %v540_v53  ;;  %v557_v45 = vrot.slane %v543_v22, %v2594_v21  ;;  %v996_v26 = vrot.slane %v995_v25, 4  ;;  %v1002_v27 = vsel %vm658_vm4, %v541_v20, -inf }
  0x98   : > { %v1219_v28 = vsel %vm1183_vm11, %v994_v33, %v1218_v23  ;;  %v558_v29 = vcombine.high %v550_v46, %v550_v46  ;;  %v1003_v11 = vrot.slane %v1002_v27, 4  ;;  %v1009_v2 = vsel %vm658_vm4, %v540_v53, -inf  ;;  %v254_v23 = vld [vmem:[%s2582_s23 + $0xe8] sm:$0xff] }
  0x99   : > { %v1241_v0 = vrot.slane %v1219_v28, 7  ;;  %v559_v31 = vcombine.high %v557_v45, %v557_v45  ;;  %v997_v32 = vmax.f32 %v995_v25, %v996_v26  ;;  %v1010_v35 = vrot.slane %v1009_v2, 4  ;;  %1372 = vrot.lane.b32.xlu0 %v2900_v54, %s2515_s25 }
  0x9a   : > { %v1004_v36 = vmax.f32 %v1002_v27, %v1003_v11  ;;  %v1016_v39 = vsel %vm658_vm4, %v542_v43, -inf  ;;  %v1023_v40 = vsel %vm658_vm4, %v550_v46, -inf  ;;  %v1030_v41 = vsel %vm658_vm4, %v558_v29, -inf  ;;  %v256_v46 = vld [vmem:[%s2582_s23 + $0xf8] sm:$0xff]  ;;  %s2524_s23 = smov 40  }
  0x9b   : > { %v2955_v55 = vsel %vm1253_vm0, 0.0, %v1241_v0  ;;  %1518 = vrot.lane.b32.xlu1 %v2821_v1, %s2521_s6  ;;  %v1269_v44 = vsel %vm1253_vm0, %v1241_v0, 0.0  ;;  %v998_v47 = vrot.slane %v997_v32, 2  ;;  %v1011_v49 = vmax.f32 %v1009_v2, %v1010_v35 }
  0x9c   : > { %v1307_v50 = vrot.slane %v2955_v55, 1  ;;  %v1308_v51 = vrot.slane %v1269_v44, 1  ;;  %v1356_v52 = vrot.slane %v2955_v55, 2  ;;  %v1357_v56 = vrot.slane %v1269_v44, 2 }
  0x9d   : > { %v999_v57 = vmax.f32 %v997_v32, %v998_v47  ;;  %v1005_v38 = vrot.slane %v1004_v36, 2  ;;  %v1012_v58 = vrot.slane %v1011_v49, 2  ;;  %v1017_v59 = vrot.slane %v1016_v39, 4  ;;  %1472 = vrot.lane.b32.xlu0 %v2887_v60, %s2517_s27 }
  0x9e   : > { %v2965_v61 = vsel %vm1288_vm1, %v1307_v50, %v1308_v51  ;;  %v2968_v1 = vsel %vm1337_vm2, %v1356_v52, %v1357_v56  ;;  %v1024_v62 = vrot.slane %v1023_v40, 4  ;;  %v1031_v63 = vrot.slane %v1030_v41, 4 }
  0x9f   : > { %1425 = vrot.lane.b32.xlu1 %v2965_v61, %s2519_s29  ;;  %v1000_v3 = vrot.slane %v999_v57, 1  ;;  %v1006_v4 = vmax.f32 %v1004_v36, %v1005_v38  ;;  %v1013_v6 = vmax.f32 %v1011_v49, %v1012_v58  ;;  %v1018_v30 = vmax.f32 %v1016_v39, %v1017_v59 }
  0xa0   : > { %v1025_v7 = vmax.f32 %v1023_v40, %v1024_v62  ;;  %v1032_v8 = vmax.f32 %v1030_v41, %v1031_v63  ;;  %v1037_v9 = vsel %vm658_vm4, %v557_v45, -inf  ;;  %v1044_v34 = vsel %vm658_vm4, %v559_v31, -inf }
  0xa1   : > { %v1001_v16 = vmax.f32 %v999_v57, %v1000_v3  ;;  %v1007_v17 = vrot.slane %v1006_v4, 1  ;;  %v1014_v18 = vrot.slane %v1013_v6, 1  ;;  %v1019_v12 = vrot.slane %v1018_v30, 2  ;;  %1397 = vrot.lane.b32.xlu0 %v2955_v55, %s2516_s26 }
  0xa2   : > { %v1026_v53 = vrot.slane %v1025_v7, 2  ;;  %v1033_v20 = vrot.slane %v1032_v8, 2  ;;  %v1038_v22 = vrot.slane %v1037_v9, 4  ;;  %v1045_v33 = vrot.slane %v1044_v34, 4 }
  0xa3   : > { %1520 = vrot.lane.b32.xlu1 %v2900_v54, %s2521_s6  ;;  %v1008_v25 = vmax.f32 %v1006_v4, %v1007_v17  ;;  %v1015_v43 = vmax.f32 %v1013_v6, %v1014_v18  ;;  %v1020_v45 = vmax.f32 %v1018_v30, %v1019_v12  ;;  %v302_v26 = vmax.f32 %v2924_v37, %v2934_v19 }
  0xa4   : > { %v1027_v27 = vmax.f32 %v1025_v7, %v1026_v53  ;;  %v1034_v28 = vmax.f32 %v1032_v8, %v1033_v20  ;;  %v1039_v29 = vmax.f32 %v1037_v9, %v1038_v22  ;;  %v1046_v11 = vmax.f32 %v1044_v34, %v1045_v33 }
  0xa5   : > { %v1021_v2 = vrot.slane %v1020_v45, 1  ;;  %v1220_v0 = vsel %vm1171_vm5, %v1008_v25, %v1001_v16  ;;  %v303_v31 = vsel %vm257_vm3, %v254_v23, -inf  ;;  %v304_v32 = vsel %vm257_vm3, %v256_v46, -inf  ;;  %1496 = vrot.lane.b32.xlu0 %v2897_v15, %s2520_s30 }
  0xa6   : > { %v1028_v35 = vrot.slane %v1027_v27, 1  ;;  %v1035_v36 = vrot.slane %v1034_v28, 1  ;;  %v1040_v39 = vrot.slane %v1039_v29, 2  ;;  %v1047_v40 = vrot.slane %v1046_v11, 2 }
  0xa7   : > { %1374 = vrot.lane.b32.xlu1 %v2968_v1, %s2515_s25  ;;  %v1022_v37 = vmax.f32 %v1020_v45, %v1021_v2  ;;  %v1221_v19 = vsel %vm1173_vm6, %v1015_v43, %v1220_v0  ;;  %v305_v41 = vmax.f32 %v303_v31, %v304_v32  ;;  %v560_v44 = vcombine.high %v302_v26, %v302_v26 }
  0xa8   : > { %v1029_v47 = vmax.f32 %v1027_v27, %v1028_v35  ;;  %v1036_v49 = vmax.f32 %v1034_v28, %v1035_v36  ;;  %v1041_v50 = vmax.f32 %v1039_v29, %v1040_v39  ;;  %v1048_v51 = vmax.f32 %v1046_v11, %v1047_v40 }
  0xa9   : > { %v1222_v52 = vsel %vm1175_vm7, %v1022_v37, %v1221_v19  ;;  %v567_v15 = vrot.slane %v302_v26, %v2594_v21  ;;  %v574_v56 = vrot.slane %v560_v44, %v2594_v21  ;;  %v577_v57 = vcombine.high %v305_v41, %v305_v41  ;;  %1325 = vrot.lane.b32.xlu0 %v2965_v61, %s2514_s24 }
  0xaa   : > { %v1042_v38 = vrot.slane %v1041_v50, 1  ;;  %v1049_v58 = vrot.slane %v1048_v51, 1  ;;  %v1223_v59 = vsel %vm1177_vm8, %v1029_v47, %v1222_v52  ;;  %v584_v62 = vrot.slane %v305_v41, %v2594_v21 }
  0xab   : > { %v1224_v63 = vsel %vm1179_vm9, %v1036_v49, %v1223_v59  ;;  %1474 = vrot.lane.b32.xlu1 %v2955_v55, %s2517_s27  ;;  %v575_v3 = vcombine.high %v567_v15, %v567_v15  ;;  %v576_v4 = vcombine.high %v574_v56, %v574_v56  ;;  %v591_v7 = vrot.slane %v577_v57, %v2594_v21 }
  0xac   : > { %v1043_v6 = vmax.f32 %v1041_v50, %v1042_v38  ;;  %v1050_v30 = vmax.f32 %v1048_v51, %v1049_v58  ;;  %v1051_v8 = vsel %vm658_vm4, %v567_v15, -inf  ;;  %v592_v9 = vcombine.high %v584_v62, %v584_v62 }
  0xad   : > { %v1052_v34 = vrot.slane %v1051_v8, 4  ;;  %v1058_v16 = vsel %vm658_vm4, %v575_v3, -inf  ;;  %v1065_v17 = vsel %vm658_vm4, %v574_v56, -inf  ;;  %1450 = vrot.lane.b32.xlu0 %v2900_v54, %s2518_s28  ;;  %v1072_v20 = vsel %vm658_vm4, %v576_v4, -inf }
  0xae   : > { %v1225_v18 = vsel %vm1181_vm10, %v1043_v6, %v1224_v63  ;;  %v1059_v12 = vrot.slane %v1058_v16, 4  ;;  %v1066_v53 = vrot.slane %v1065_v17, 4  ;;  %v1073_v33 = vrot.slane %v1072_v20, 4 }
  0xaf   : > { %v1226_v22 = vsel %vm1183_vm11, %v1050_v30, %v1225_v18  ;;  %v1053_v21 = vmax.f32 %v1051_v8, %v1052_v34  ;;  %v1079_v23 = vsel %vm658_vm4, %v584_v62, -inf  ;;  %v593_v25 = vcombine.high %v591_v7, %v591_v7 }
  0xb0   : > { %v1242_v46 = vrot.slane %v1226_v22, 7  ;;  %v1060_v43 = vmax.f32 %v1058_v16, %v1059_v12  ;;  %v1067_v45 = vmax.f32 %v1065_v17, %v1066_v53  ;;  %v1074_v27 = vmax.f32 %v1072_v20, %v1073_v33  ;;  %v3035_v33 = vpop.permute.xlu1 %1362 }
  0xb1   : > { %v1054_v26 = vrot.slane %v1053_v21, 2  ;;  %v1080_v28 = vrot.slane %v1079_v23, 4  ;;  %v1086_v54 = vsel %vm658_vm4, %v592_v9, -inf  ;;  %v1093_v36 = vsel %vm658_vm4, %v591_v7, -inf }
  0xb2   : > { %v3012_v29 = vsel %vm1253_vm0, 0.0, %v1242_v46  ;;  %v1270_v11 = vsel %vm1253_vm0, %v1242_v46, 0.0  ;;  %v1061_v2 = vrot.slane %v1060_v43, 2  ;;  %v1068_v0 = vrot.slane %v1067_v45, 2  ;;  %v1610_v46 = vld [vmem:[%s3459_s1 + $0x8] sm:$0xff] }
  0xb3   : > { %v1310_v31 = vrot.slane %v3012_v29, 1  ;;  %v1311_v32 = vrot.slane %v1270_v11, 1  ;;  %1399 = vrot.lane.b32.xlu1 %v3012_v29, %s2516_s26  ;;  %v1359_v35 = vrot.slane %v3012_v29, 2  ;;  %v1055_v39 = vmax.f32 %v1053_v21, %v1054_v26 }
  0xb4   : > { %v1062_v40 = vmax.f32 %v1060_v43, %v1061_v2  ;;  %v1069_v37 = vmax.f32 %v1067_v45, %v1068_v0  ;;  %v1075_v19 = vrot.slane %v1074_v27, 2  ;;  %v1360_v44 = vrot.slane %v1270_v11, 2  ;;  %v1611_v43 = vld [vmem:[%s3459_s1 + $0x10] sm:$0xff]  ;;  %v1612_v45 = vld [vmem:[%s3459_s1 + $0x18] sm:$0xff] }
  0xb5   : > { %v3021_v41 = vsel %vm1288_vm1, %v1310_v31, %v1311_v32  ;;  %v1081_v47 = vmax.f32 %v1079_v23, %v1080_v28  ;;  %v1087_v49 = vrot.slane %v1086_v54, 4  ;;  %v1056_v50 = vrot.slane %v1055_v39, 1  ;;  %v1609_v23 = vld [vmem:[%s3459_s1] sm:$0xff] }
  0xb6   : > { %1327 = vrot.lane.b32.xlu0 %v3021_v41, %s2514_s24  ;;  %v1063_v51 = vrot.slane %v1062_v40, 1  ;;  %v1070_v52 = vrot.slane %v1069_v37, 1  ;;  %v1076_v15 = vmax.f32 %v1074_v27, %v1075_v19  ;;  %v1094_v38 = vrot.slane %v1093_v36, 4  ;;  %s2525_s24 = smov 64  }
  0xb7   : > { %1498 = vrot.lane.b32.xlu1 %v2965_v61, %s2520_s30  ;;  %v1082_v56 = vrot.slane %v1081_v47, 2  ;;  %v1088_v57 = vmax.f32 %v1086_v54, %v1087_v49  ;;  %v1100_v58 = vsel %vm658_vm4, %v593_v25, -inf  ;;  %v1057_v59 = vmax.f32 %v1055_v39, %v1056_v50  ;;  %v3059_v39 = vpop.permute.xlu1 %1389 }
  0xb8   : > { %v1064_v62 = vmax.f32 %v1062_v40, %v1063_v51  ;;  %v1071_v63 = vmax.f32 %v1069_v37, %v1070_v52  ;;  %v1077_v3 = vrot.slane %v1076_v15, 1  ;;  %v1095_v30 = vmax.f32 %v1093_v36, %v1094_v38  ;;  %v1613_v40 = vld [vmem:[%s3459_s1 + $0x20] sm:$0xf] }
  0xb9   : > { %v1083_v4 = vmax.f32 %v1081_v47, %v1082_v56  ;;  %v1089_v6 = vrot.slane %v1088_v57, 2  ;;  %v1101_v7 = vrot.slane %v1100_v58, 4  ;;  %v1361_v8 = vsel %vm1337_vm2, %v1359_v35, %v1360_v44 }
  0xba   : > { %1452 = vrot.lane.b32.xlu0 %v2968_v1, %s2518_s28  ;;  %v1078_v9 = vmax.f32 %v1076_v15, %v1077_v3  ;;  %v1227_v61 = vsel %vm1171_vm5, %v1064_v62, %v1057_v59  ;;  %v1096_v17 = vrot.slane %v1095_v30, 2  ;;  %v2458_v11 = vpack.c.bf16 %v1610_v46, %v1609_v23  ;;  %v1314_v15 = vpop.permute.xlu0 %1313 }
  0xbb   : > { %1427 = vrot.lane.b32.xlu1 %v3021_v41, %s2519_s29  ;;  %v1084_v34 = vrot.slane %v1083_v4, 1  ;;  %v1090_v16 = vmax.f32 %v1088_v57, %v1089_v6  ;;  %v1102_v18 = vmax.f32 %v1100_v58, %v1101_v7  ;;  %v1228_v12 = vsel %vm1173_vm6, %v1071_v63, %v1227_v61  ;;  %v1467_v50 = vpop.permute.xlu1 %1466 }
  0xbc   : > { %v1097_v22 = vmax.f32 %v1095_v30, %v1096_v17  ;;  %v1229_v25 = vsel %vm1175_vm7, %v1078_v9, %v1228_v12  ;;  %v2462_v32 = vpack.c.bf16 %v1612_v45, %v1611_v43  ;;  %2459 = vmatprep.subr.bf16.mxu0 %v2458_v11  ;;  %v1538_v30 = vsel %vm257_vm3, %v2565_v5, %v1314_v15 }
  0xbd   : > { %v1085_v53 = vmax.f32 %v1083_v4, %v1084_v34  ;;  %v1091_v20 = vrot.slane %v1090_v16, 1  ;;  %v1103_v21 = vrot.slane %v1102_v18, 2  ;;  %2461 = vmatpush3.bf16.msra.mxu0 %v2458_v11  ;;  %v1547_v9 = vsel %vm1546_vm13, %v1538_v30, %v3035_v33 }
  0xbe   : > { %1376 = vrot.lane.b32.xlu0 %v1361_v8, %s2515_s25  ;;  %v1098_v27 = vrot.slane %v1097_v22, 1  ;;  %2463 = vmatprep.subr.bf16.mxu0 %v2462_v32  ;;  %v1388_v58 = vpop.permute.xlu0 %1387  ;;  %vm1573_vm4 = vcmask 162816   ;;  %vm1582_vm5 = vcmask 195584   ;;  %vm1591_vm6 = vcmask 228352  }
  0xbf   : > { %v1092_v26 = vmax.f32 %v1090_v16, %v1091_v20  ;;  %v1104_v28 = vmax.f32 %v1102_v18, %v1103_v21  ;;  %v1230_v54 = vsel %vm1177_vm8, %v1085_v53, %v1229_v25  ;;  %1522 = vrot.lane.b32.xlu1 %v2968_v1, %s2521_s6  ;;  %v1556_v61 = vsel %vm1555_vm14, %v1547_v9, %v1388_v58 }
  0xc0   : > { %v1099_v2 = vmax.f32 %v1097_v22, %v1098_v27  ;;  %vm1600_vm7 = vcmask 261120   ;;  %vm1621_vm8 = vcmask 293888  }
  0xc1   : > { %v1105_v0 = vrot.slane %v1104_v28, 1  ;;  %v1231_v31 = vsel %vm1179_vm9, %v1092_v26, %v1230_v54  ;;  %2465 = vmatpush3.bf16.msra.mxu0 %v2462_v32  ;;  %vm2143_vm9 = vcmask 588800  }
  0xc2   : > { %1476 = vrot.lane.b32.xlu0 %v3012_v29, %s2517_s27  ;;  %v1232_v36 = vsel %vm1181_vm10, %v1099_v2, %v1231_v31  ;;  %2414 = vmatprep.subr.msk.mxu0 %vm1646_vm12, %v1613_v40 }
  0xc3   : > { %v1106_v35 = vmax.f32 %v1104_v28, %v1105_v0  ;;  %1454 = vrot.lane.b32.xlu1 %v1361_v8, %s2518_s28 }
  0xc5   : > { %v1233_v1 = vsel %vm1183_vm11, %v1106_v35, %v1232_v36  ;;  %2415 = vmatpush3.msk.msra.mxu0 %vm1646_vm12, %v1613_v40 }
  0xc6   : > { %v1243_v37 = vrot.slane %v1233_v1, 7 }
  0xc7   : > { %v3073_v38 = vpop.permute.xlu1 %1391  ;;  %v1469_v62 = vpop.permute.xlu0 %1468 }
  0xc8   : > { %v1262_v19 = vsel %vm1253_vm0, 0.0, %v1243_v37  ;;  %v1271_v44 = vsel %vm1253_vm0, %v1243_v37, 0.0 }
  0xc9   : > { %1401 = vrot.lane.b32.xlu0 %v1262_v19, %s2516_s26  ;;  %v1439_v47 = vrot.slane %v1262_v19, 2  ;;  %v1440_v49 = vrot.slane %v1271_v44, 2  ;;  %v1412_v51 = vrot.slane %v1262_v19, 1  ;;  %v1413_v52 = vrot.slane %v1271_v44, 1 }
  0xcb   : > { %v1441_v56 = vsel %vm1337_vm2, %v1439_v47, %v1440_v49  ;;  %v1414_v57 = vsel %vm1288_vm1, %v1412_v51, %v1413_v52 }
  0xcc   : > { %1456 = vrot.lane.b32.xlu1 %v1441_v56, %s2518_s28 }
  0xcd   : > { %1500 = vrot.lane.b32.xlu0 %v3021_v41, %s2520_s30 }
  0xd0   : > { %1480 = vrot.lane.b32.xlu1 %v2565_v5, %s2517_s27 }
  0xd1   : > { %1429 = vrot.lane.b32.xlu0 %v1414_v57, %s2519_s29 }
  0xd4   : > { %1504 = vrot.lane.b32.xlu1 %v2574_v13, %s2520_s30  ;;  %v1365_v59 = vpop.permute.xlu1 %1364 }
  0xd5   : > { %1524 = vrot.lane.b32.xlu0 %v1361_v8, %s2521_s6 }
  0xd8   : > { %1528 = vrot.lane.b32.xlu1 %v2577_v14, %s2521_s6 }
  0xd9   : > { %1478 = vrot.lane.b32.xlu0 %v1262_v19, %s2517_s27  ;;  %v1318_v41 = vpop.permute.xlu1 %1317 }
  0xda   : > { %v1540_v1 = vsel %vm257_vm3, %v2666_v24, %v1318_v41 }
  0xdb   : > { %v3084_v63 = vpop.permute.xlu0 %1393 }
  0xdc   : > { %2001 = vrot.lane.b32.xlu1 %v2565_v5, %s2522_s17 }
  0xdd   : > { %1502 = vrot.lane.b32.xlu0 %v1414_v57, %s2520_s30  ;;  %v1443_v3 = vpop.permute.xlu1 %1442 }
  0xdf   : > { %v1316_v4 = vpop.permute.xlu0 %1315 }
  0xe0   : > { %v1539_v20 = vsel %vm257_vm3, %v2704_v48, %v1316_v4  ;;  %2025 = vrot.lane.b32.xlu1 %v2574_v13, %s2523_s20 }
  0xe1   : > { %1526 = vrot.lane.b32.xlu0 %v1441_v56, %s2521_s6  ;;  %v1367_v6 = vpop.permute.xlu1 %1366  ;;  %v1548_v23 = vsel %vm1546_vm13, %v1539_v20, %v1365_v59 }
  0xe2   : > { %v1557_v43 = vsel %vm1555_vm14, %v1548_v23, %v3059_v39  ;;  %v1549_v37 = vsel %vm1546_vm13, %v1540_v1, %v1367_v6 }
  0xe3   : > { %v1416_v7 = vpop.permute.xlu0 %1415  ;;  %v1558_v44 = vsel %vm1555_vm14, %v1549_v37, %v3073_v38 }
  0xe4   : > { %v1565_v34 = vsel %vm1564_vm15, %v1556_v61, %v1416_v7 }
  0xe5   : > { %v1491_v8 = vpop.permute.xlu1 %1490  ;;  %1838 = vrot.lane.b32.xlu0 %v2574_v13, %s2515_s25  ;;  %v1574_v17 = vsel %vm1573_vm4, %v1565_v34, %v1443_v3 }
  0xe6   : > { %v1583_v53 = vsel %vm1582_vm5, %v1574_v17, %v1467_v50 }
  0xe7   : > { %v1418_v16 = vpop.permute.xlu0 %1417  ;;  %v1592_v22 = vsel %vm1591_vm6, %v1583_v53, %v1491_v8 }
  0xe8   : > { %v1566_v45 = vsel %vm1564_vm15, %v1557_v43, %v1418_v16 }
  0xe9   : > { %v1420_v18 = vpop.permute.xlu1 %1419  ;;  %1883 = vrot.lane.b32.xlu0 %v2577_v14, %s2519_s29 }
  0xea   : > { %v1567_v49 = vsel %vm1564_vm15, %v1558_v44, %v1420_v18 }
  0xeb   : > { %v1320_v12 = vpop.permute.xlu0 %1319 }
  0xec   : > { %v1541_v58 = vsel %vm257_vm3, %v2744_v10, %v1320_v12 }
  0xed   : > { %v1515_v21 = vpop.permute.xlu1 %1514 }
  0xee   : > { %v1601_v33 = vsel %vm1600_vm7, %v1592_v22, %v1515_v21 }
  0xef   : > { %2416 = vmatprep.mubr.msk.f32.mxu0 %vm1621_vm8, %v1601_v33  ;;  %v1445_v46 = vpop.permute.xlu0 %1444 }
  0xf0   : > { %v1575_v27 = vsel %vm1573_vm4, %v1566_v45, %v1445_v46 }
  0xf1   : > { %v1422_v25 = vpop.permute.xlu1 %1421  ;;  %v1584_v28 = vsel %vm1582_vm5, %v1575_v27, %v1469_v62 }
  0xf3   : > { %v1369_v26 = vpop.permute.xlu0 %1368 }
  0xf4   : > { %v1550_v59 = vsel %vm1546_vm13, %v1541_v58, %v1369_v26 }
  0xf5   : > { %v1517_v48 = vpop.permute.xlu1 %1516  ;;  %v1559_v41 = vsel %vm1555_vm14, %v1550_v59, %v3084_v63 }
  0xf6   : > { %v1568_v4 = vsel %vm1564_vm15, %v1559_v41, %v1422_v25 }
  0xf7   : > { %v1493_v54 = vpop.permute.xlu0 %1492 }
  0xf8   : > { %v1593_v11 = vsel %vm1591_vm6, %v1584_v28, %v1493_v54 }
  0xf9   : > { %v1371_v2 = vpop.permute.xlu1 %1370  ;;  %v1602_v0 = vsel %vm1600_vm7, %v1593_v11, %v1517_v48 }
  0xfa   : > { %2417 = vmatmul.mubr.msk.f32.vlgmr.msra.gmra.mrb[0].mxu0 %vm1621_vm8, %v1602_v0 }
  0xfb   : > { %v1322_v31 = vpop.permute.xlu0 %1321 }
  0xfc   : > { %v1542_v12 = vsel %vm257_vm3, %v2803_v42, %v1322_v31 }
  0xfd   : > { %v1471_v32 = vpop.permute.xlu1 %1470  ;;  %v1551_v53 = vsel %vm1546_vm13, %v1542_v12, %v1371_v2 }
  0xff   : > { %v1447_v35 = vpop.permute.xlu0 %1446 }
 0x100   : > { %v1576_v50 = vsel %vm1573_vm4, %v1567_v49, %v1447_v35 }
 0x101   : > { %v1396_v36 = vpop.permute.xlu1 %1395  ;;  %v1585_v51 = vsel %vm1582_vm5, %v1576_v50, %v1471_v32 }
 0x102   : > { %v1560_v22 = vsel %vm1555_vm14, %v1551_v53, %v1396_v36 }
 0x103   : > { %v1324_v39 = vpop.permute.xlu0 %1323 }
 0x104   : > { %v1543_v11 = vsel %vm257_vm3, %v2887_v60, %v1324_v39 }
 0x105   : > { %v1495_v40 = vpop.permute.xlu1 %1494 }
 0x106   : > { %v1594_v15 = vsel %vm1591_vm6, %v1585_v51, %v1495_v40 }
 0x107   : > { %v1449_v19 = vpop.permute.xlu0 %1448 }
 0x108   : > { %v1577_v6 = vsel %vm1573_vm4, %v1568_v4, %v1449_v19 }
 0x109   : > { %v1424_v47 = vpop.permute.xlu1 %1423 }
 0x10a   : > { %v1569_v33 = vsel %vm1564_vm15, %v1560_v22, %v1424_v47 }
 0x10b   : > { %v1373_v52 = vpop.permute.xlu0 %1372 }
 0x10c   : > { %v1552_v2 = vsel %vm1546_vm13, %v1543_v11, %v1373_v52 }
 0x10d   : > { %v1519_v56 = vpop.permute.xlu1 %1518 }
 0x10e   : > { %v1603_v24 = vsel %vm1600_vm7, %v1594_v15, %v1519_v56 }
 0x10f   : > { %2419 = vmatprep.mubr.msk.f32.mxu0 %vm1621_vm8, %v1603_v24  ;;  %v1473_v57 = vpop.permute.xlu0 %1472 }
 0x110   : > { %v1586_v30 = vsel %vm1582_vm5, %v1577_v6, %v1473_v57  ;;  %v3183_v6 = vld [vmem:[%s3460_s2] ss:$0 sm:$0xff] }
 0x111   : > { %v1426_v38 = vpop.permute.xlu1 %1425 }
 0x113   : > { %v1398_v62 = vpop.permute.xlu0 %1397 }
 0x114   : > { %v1561_v0 = vsel %vm1555_vm14, %v1552_v2, %v1398_v62 }
 0x115   : > { %v1521_v3 = vpop.permute.xlu1 %1520  ;;  %v1570_v32 = vsel %vm1564_vm15, %v1561_v0, %v1426_v38  ;;  %v2127_v0 = vld [vmem:[%s3461_s3] sm:$0xff] }
 0x117   : > { %v1497_v7 = vpop.permute.xlu0 %1496 }
 0x118   : > { %v1595_v8 = vsel %vm1591_vm6, %v1586_v30, %v1497_v7 }
 0x119   : > { %v1375_v9 = vpop.permute.xlu1 %1374  ;;  %v1604_v10 = vsel %vm1600_vm7, %v1595_v8, %v1521_v3 }
 0x11a   : > { %2420 = vmatmul.mubr.msk.f32.gmra.mrb[2].mxu0 %vm1621_vm8, %v1604_v10 }
 0x11b   : > { %v1326_v61 = vpop.permute.xlu0 %1325 }
 0x11c   : > { %v1544_v47 = vsel %vm257_vm3, %v2955_v55, %v1326_v61 }
 0x11d   : > { %v1475_v34 = vpop.permute.xlu1 %1474  ;;  %v1553_v50 = vsel %vm1546_vm13, %v1544_v47, %v1375_v9 }
 0x11f   : > { %v1451_v16 = vpop.permute.xlu0 %1450 }
 0x120   : > { %v1578_v23 = vsel %vm1573_vm4, %v1569_v33, %v1451_v16 }
 0x121   : > { %v1587_v46 = vsel %vm1582_vm5, %v1578_v23, %v1475_v34 }
 0x125   : > { %v1400_v17 = vpop.permute.xlu1 %1399 }
 0x126   : > { %v1562_v52 = vsel %vm1555_vm14, %v1553_v50, %v1400_v17 }
 0x128   : > { %v1328_v63 = vpop.permute.xlu0 %1327 }
 0x129   : > { %v1499_v18 = vpop.permute.xlu1 %1498  ;;  %v1545_v44 = vsel %vm257_vm3, %v3012_v29, %v1328_v63  ;;  %vm2118_vm3 = vcmask 523264  }
 0x12a   : > { %v1596_v43 = vsel %vm1591_vm6, %v1587_v46, %v1499_v18 }
 0x12c   : > { %v1453_v20 = vpop.permute.xlu0 %1452 }
 0x12d   : > { %v1428_v21 = vpop.permute.xlu1 %1427  ;;  %v1579_v36 = vsel %vm1573_vm4, %v1570_v32, %v1453_v20 }
 0x12e   : > { %v1571_v24 = vsel %vm1564_vm15, %v1562_v52, %v1428_v21  ;;  %v2131_v52 = vld [vmem:[%s3461_s3 + $0x20] sm:$0xff] }
 0x130   : > { %v1377_v25 = vpop.permute.xlu0 %1376 }
 0x131   : > { %v1523_v45 = vpop.permute.xlu1 %1522  ;;  %v1554_v49 = vsel %vm1546_vm13, %v1545_v44, %v1377_v25 }
 0x132   : > { %v1605_v26 = vsel %vm1600_vm7, %v1596_v43, %v1523_v45 }
 0x133   : > { %2422 = vmatprep.mubr.msk.f32.mxu0 %vm1621_vm8, %v1605_v26 }
 0x134   : > { %v1477_v42 = vpop.permute.xlu0 %1476 }
 0x135   : > { %v1455_v27 = vpop.permute.xlu1 %1454  ;;  %v1588_v1 = vsel %vm1582_vm5, %v1579_v36, %v1477_v42 }
 0x136   : > { %v1580_v29 = vsel %vm1573_vm4, %v1571_v24, %v1455_v27 }
 0x13b   : > { %v1402_v48 = vpop.permute.xlu0 %1401 }
 0x13c   : > { %v1563_v51 = vsel %vm1555_vm14, %v1554_v49, %v1402_v48 }
 0x13e   : > { %v1457_v28 = vpop.permute.xlu1 %1456 }
 0x13f   : > { %v1501_v54 = vpop.permute.xlu0 %1500 }
 0x140   : > { %v1597_v40 = vsel %vm1591_vm6, %v1588_v1, %v1501_v54 }
 0x142   : > { %v1481_v35 = vpop.permute.xlu1 %1480 }
 0x143   : > { %v1430_v31 = vpop.permute.xlu0 %1429 }
 0x144   : > { %v1572_v15 = vsel %vm1564_vm15, %v1563_v51, %v1430_v31  ;;  %v2128_v31 = vld [vmem:[%s3461_s3 + $0x8] sm:$0xff] }
 0x145   : > { %v1581_v57 = vsel %vm1573_vm4, %v1572_v15, %v1457_v28  ;;  %v2466_v36 = vpack.c.bf16 %v2128_v31, %v2127_v0  ;;  %v2132_v15 = vld [vmem:[%s3461_s3 + $0x28] sm:$0xff] }
 0x146   : > { %v1505_v60 = vpop.permute.xlu1 %1504  ;;  %v1590_v55 = vsel %vm1582_vm5, %v1581_v57, %v1481_v35 }
 0x147   : > { %v1525_v37 = vpop.permute.xlu0 %1524  ;;  %v1599_v59 = vsel %vm1591_vm6, %v1590_v55, %v1505_v60  ;;  %2467 = vmatprep.subr.bf16.mxu1 %v2466_v36  ;;  %v2129_v60 = vld [vmem:[%s3461_s3 + $0x10] sm:$0xff]  ;;  %v2134_v55 = vld [vmem:[%s3461_s3 + $0x38] sm:$0xff] }
 0x148   : > { %v1606_v19 = vsel %vm1600_vm7, %v1597_v40, %v1525_v37  ;;  %2469 = vmatpush3.bf16.msra.mxu1 %v2466_v36 }
 0x149   : > { %2423 = vmatmul.mubr.msk.f32.gmra.mrb[4].mxu0 %vm1621_vm8, %v1606_v19 }
 0x14a   : > { %v1529_v58 = vpop.permute.xlu1 %1528 }
 0x14b   : > { %v1479_v39 = vpop.permute.xlu0 %1478  ;;  %v1608_v41 = vsel %vm1600_vm7, %v1599_v59, %v1529_v58 }
 0x14c   : > { %v1589_v38 = vsel %vm1582_vm5, %v1580_v29, %v1479_v39  ;;  %v2130_v39 = vld [vmem:[%s3461_s3 + $0x18] sm:$0xff]  ;;  %v2133_v29 = vld [vmem:[%s3461_s3 + $0x30] sm:$0xff] }
 0x14d   : > { %v2470_v44 = vpack.c.bf16 %v2130_v39, %v2129_v60 }
 0x14f   : > { %v1503_v56 = vpop.permute.xlu0 %1502  ;;  %2471 = vmatprep.subr.bf16.mxu1 %v2470_v44 }
 0x150   : > { %v1598_v62 = vsel %vm1591_vm6, %v1589_v38, %v1503_v56  ;;  %2473 = vmatpush3.bf16.msra.mxu1 %v2470_v44  ;;  %v2474_v56 = vpack.c.bf16 %v2132_v15, %v2131_v52  ;;  %v2478_v38 = vpack.c.bf16 %v2134_v55, %v2133_v29 }
 0x152   : > { %2475 = vmatprep.subr.bf16.mxu1 %v2474_v56 }
 0x153   : > { %v1527_v3 = vpop.permute.xlu0 %1526 }
 0x154   : > { %v1607_v4 = vsel %vm1600_vm7, %v1598_v62, %v1527_v3  ;;  %2477 = vmatpush3.bf16.msra.mxu1 %v2474_v56  ;;  %v2135_v3 = vld [vmem:[%s3461_s3 + $0x40] sm:$0xff] }
 0x155   : > { %2425 = vmatprep.mubr.msk.f32.mxu0 %vm1621_vm8, %v1607_v4  ;;  %2479 = vmatprep.subr.bf16.mxu1 %v2478_v38 }
 0x156   : > { %2426 = vmatmul.mubr.msk.f32.gmra.mrb[6].mxu0 %vm1621_vm8, %v1608_v41 }
 0x158   : > { %2481 = vmatpush3.bf16.msra.mxu1 %v2478_v38 }
 0x159   : > { %2444 = vmatprep.subr.mxu1 %v2135_v3 }
 0x15c   : > { %2445 = vmatpush3.msra.mxu1 %v2135_v3 }
 0x1cd   : > { %v2418_v30 = vpop.f32.mrb[0].mxu0 }
 0x1ce   : > { %v1722_v7 = vadd.f32 %v2418_v30, %v3183_v6  ;;  %v1716_v8 = vpop.f32.mrb[1].mxu0 }
 0x1cf   : > { %v1717_v9 = vadd.f32 %v3183_v6, %v1716_v8 }
 0x1d0   : > { %v1756_v10 = vmax.f32 %v1722_v7, 0.0 }
 0x1d1   : > { %v1755_v61 = vmax.f32 %v1717_v9, 0.0 }
 0x1d2   : > { %v1772_v34 = vrot.slane %v1756_v10, 7 }
 0x1d3   : > { %v1771_v16 = vrot.slane %v1755_v61, 7 }
 0x1d4   : > { %v3188_v17 = vsel %vm1253_vm0, 0.0, %v1772_v34  ;;  %v1796_v13 = vsel %vm1253_vm0, %v1772_v34, 0.0 }
 0x1d5   : > { %v1821_v63 = vrot.slane %v1796_v13, 1  ;;  %1910 = vrot.lane.b32.xlu1 %v3188_v17, %s2517_s27  ;;  %v3194_v18 = vsel %vm1253_vm0, 0.0, %v1771_v16  ;;  %v1820_v12 = vrot.slane %v3188_v17, 1  ;;  %v1866_v53 = vrot.slane %v1796_v13, 2 }
 0x1d6   : > { %1908 = vrot.lane.b32.xlu0 %v3194_v18, %s2517_s27  ;;  %v1865_v22 = vrot.slane %v3188_v17, 2  ;;  %v1795_v21 = vsel %vm1253_vm0, %v1771_v16, 0.0  ;;  %v1817_v46 = vrot.slane %v3194_v18, 1  ;;  %v1862_v45 = vrot.slane %v3194_v18, 2 }
 0x1d7   : > { %v1822_v20 = vsel %vm1288_vm1, %v1820_v12, %v1821_v63  ;;  %v1818_v33 = vrot.slane %v1795_v21, 1  ;;  %v1863_v43 = vrot.slane %v1795_v21, 2 }
 0x1d8   : > { %v1867_v23 = vsel %vm1337_vm2, %v1865_v22, %v1866_v53 }
 0x1d9   : > { %1987 = vrot.lane.b32.xlu1 %v3188_v17, %s2522_s17  ;;  %v1819_v25 = vsel %vm1288_vm1, %v1817_v46, %v1818_v33  ;;  %v1864_v54 = vsel %vm1337_vm2, %v1862_v45, %v1863_v43 }
 0x1da   : > { %1938 = vrot.lane.b32.xlu0 %v1822_v20, %s2521_s6 }
 0x1dd   : > { %1842 = vrot.lane.b32.xlu1 %v1822_v20, %s2515_s25 }
 0x1de   : > { %1965 = vrot.lane.b32.xlu0 %v1867_v23, %s2524_s23 }
 0x1e1   : > { %1887 = vrot.lane.b32.xlu1 %v1867_v23, %s2519_s29 }
 0x1e2   : > { %1936 = vrot.lane.b32.xlu0 %v1819_v25, %s2521_s6 }
 0x1e5   : > { %2011 = vrot.lane.b32.xlu1 %v1822_v20, %s2523_s20 }
 0x1e9   : > { %2035 = vrot.lane.b32.xlu1 %v1867_v23, %s2525_s24 }
 0x1ed   : > { %1840 = vrot.lane.b32.xlu1 %v1819_v25, %s2515_s25  ;;  %v2421_v26 = vpop.f32.mrb[2].mxu0 }
 0x1ee   : > { %v1732_v42 = vadd.f32 %v2421_v26, %v3183_v6  ;;  %v1726_v27 = vpop.f32.mrb[3].mxu0 }
 0x1ef   : > { %v1727_v48 = vadd.f32 %v3183_v6, %v1726_v27 }
 0x1f0   : > { %v1758_v28 = vmax.f32 %v1732_v42, 0.0 }
 0x1f1   : > { %v1757_v11 = vmax.f32 %v1727_v48, 0.0  ;;  %1885 = vrot.lane.b32.xlu1 %v1864_v54, %s2519_s29 }
 0x1f2   : > { %v1774_v2 = vrot.slane %v1758_v28, 7 }
 0x1f3   : > { %v1773_v35 = vrot.slane %v1757_v11, 7 }
 0x1f4   : > { %v3227_v32 = vsel %vm1253_vm0, 0.0, %v1774_v2  ;;  %v1798_v1 = vsel %vm1253_vm0, %v1774_v2, 0.0 }
 0x1f5   : > { %1963 = vrot.lane.b32.xlu1 %v1864_v54, %s2524_s23  ;;  %1914 = vrot.lane.b32.xlu0 %v3227_v32, %s2517_s27  ;;  %v1827_v40 = vrot.slane %v1798_v1, 1  ;;  %v3234_v37 = vsel %vm1253_vm0, 0.0, %v1773_v35  ;;  %v1826_v19 = vrot.slane %v3227_v32, 1  ;;  %v1872_v47 = vrot.slane %v1798_v1, 2 }
 0x1f6   : > { %v1871_v50 = vrot.slane %v3227_v32, 2  ;;  %v1797_v51 = vsel %vm1253_vm0, %v1773_v35, 0.0  ;;  %v1823_v58 = vrot.slane %v3234_v37, 1  ;;  %v1868_v41 = vrot.slane %v3234_v37, 2  ;;  %v3322_v35 = vpop.permute.xlu1 %2001 }
 0x1f7   : > { %v1828_v49 = vsel %vm1288_vm1, %v1826_v19, %v1827_v40  ;;  %v1824_v24 = vrot.slane %v1797_v51, 1  ;;  %v1869_v59 = vrot.slane %v1797_v51, 2 }
 0x1f8   : > { %v1873_v57 = vsel %vm1337_vm2, %v1871_v50, %v1872_v47  ;;  %v1839_v47 = vpop.permute.xlu0 %1838 }
 0x1f9   : > { %1991 = vrot.lane.b32.xlu1 %v3227_v32, %s2522_s17  ;;  %1989 = vrot.lane.b32.xlu0 %v3234_v37, %s2522_s17  ;;  %v1825_v62 = vsel %vm1288_vm1, %v1823_v58, %v1824_v24  ;;  %v1870_v4 = vsel %vm1337_vm2, %v1868_v41, %v1869_v59 }
 0x1fa   : > { %v3328_v40 = vpop.permute.xlu1 %2025 }
 0x1fc   : > { %v1884_v29 = vpop.permute.xlu0 %1883 }
 0x1fd   : > { %1846 = vrot.lane.b32.xlu0 %v1828_v49, %s2515_s25  ;;  %1912 = vrot.lane.b32.xlu1 %v3234_v37, %s2517_s27 }
 0x201   : > { %1969 = vrot.lane.b32.xlu0 %v1873_v57, %s2524_s23  ;;  %1942 = vrot.lane.b32.xlu1 %v1828_v49, %s2521_s6 }
 0x205   : > { %1891 = vrot.lane.b32.xlu1 %v1873_v57, %s2519_s29  ;;  %1844 = vrot.lane.b32.xlu0 %v1825_v62, %s2515_s25 }
 0x209   : > { %2015 = vrot.lane.b32.xlu1 %v1828_v49, %s2523_s20  ;;  %1889 = vrot.lane.b32.xlu0 %v1870_v4, %s2519_s29 }
 0x20d   : > { %2039 = vrot.lane.b32.xlu1 %v1873_v57, %s2525_s24  ;;  %2013 = vrot.lane.b32.xlu0 %v1825_v62, %s2523_s20 }
 0x211   : > { %1940 = vrot.lane.b32.xlu1 %v1825_v62, %s2521_s6  ;;  %1967 = vrot.lane.b32.xlu0 %v1870_v4, %s2524_s23 }
 0x215   : > { %2037 = vrot.lane.b32.xlu1 %v1870_v4, %s2525_s24 }
 0x21c   : > { %v2424_v30 = vpop.f32.mrb[4].mxu0 }
 0x21d   : > { %v1742_v7 = vadd.f32 %v2424_v30, %v3183_v6  ;;  %v1736_v8 = vpop.f32.mrb[5].mxu0 }
 0x21e   : > { %v1737_v9 = vadd.f32 %v3183_v6, %v1736_v8 }
 0x21f   : > { %v1760_v10 = vmax.f32 %v1742_v7, 0.0 }
 0x220   : > { %v1759_v61 = vmax.f32 %v1737_v9, 0.0 }
 0x221   : > { %v1776_v34 = vrot.slane %v1760_v10, 7  ;;  %v2059_v10 = vsel %vm1546_vm13, %v2565_v5, %v1839_v47 }
 0x222   : > { %v1775_v13 = vrot.slane %v1759_v61, 7  ;;  %v2067_v61 = vsel %vm1564_vm15, %v2059_v10, %v1884_v29 }
 0x223   : > { %v3287_v16 = vsel %vm1253_vm0, 0.0, %v1776_v34  ;;  %v1800_v63 = vsel %vm1253_vm0, %v1776_v34, 0.0 }
 0x224   : > { %1918 = vrot.lane.b32.xlu0 %v3287_v16, %s2517_s27  ;;  %1995 = vrot.lane.b32.xlu1 %v3287_v16, %s2522_s17  ;;  %v1833_v12 = vrot.slane %v1800_v63, 1  ;;  %v3295_v53 = vsel %vm1253_vm0, 0.0, %v1775_v13  ;;  %v1832_v20 = vrot.slane %v3287_v16, 1  ;;  %v1878_v33 = vrot.slane %v1800_v63, 2 }
 0x225   : > { %v1877_v46 = vrot.slane %v3287_v16, 2  ;;  %v1799_v25 = vsel %vm1253_vm0, %v1775_v13, 0.0  ;;  %v1829_v26 = vrot.slane %v3295_v53, 1  ;;  %v1874_v48 = vrot.slane %v3295_v53, 2 }
 0x226   : > { %v1834_v23 = vsel %vm1288_vm1, %v1832_v20, %v1833_v12  ;;  %v1830_v43 = vrot.slane %v1799_v25, 1  ;;  %v1875_v42 = vrot.slane %v1799_v25, 2 }
 0x227   : > { %v1879_v45 = vsel %vm1337_vm2, %v1877_v46, %v1878_v33 }
 0x228   : > { %1993 = vrot.lane.b32.xlu0 %v3295_v53, %s2522_s17  ;;  %1916 = vrot.lane.b32.xlu1 %v3295_v53, %s2517_s27  ;;  %v1831_v27 = vsel %vm1288_vm1, %v1829_v26, %v1830_v43  ;;  %v1876_v11 = vsel %vm1337_vm2, %v1874_v48, %v1875_v42 }
 0x229   : > { %v2427_v22 = vpop.f32.mrb[6].mxu0 }
 0x22a   : > { %v1746_v21 = vpop.f32.mrb[7].mxu0  ;;  %v1752_v28 = vadd.f32 %v2427_v22, %v3183_v6 }
 0x22b   : > { %v1747_v54 = vadd.f32 %v3183_v6, %v1746_v21 }
 0x22c   : > { %1850 = vrot.lane.b32.xlu0 %v1834_v23, %s2515_s25  ;;  %1946 = vrot.lane.b32.xlu1 %v1834_v23, %s2521_s6  ;;  %v1762_v2 = vmax.f32 %v1752_v28, 0.0 }
 0x22d   : > { %v1761_v0 = vmax.f32 %v1747_v54, 0.0 }
 0x22e   : > { %v1778_v31 = vrot.slane %v1762_v2, 7 }
 0x22f   : > { %v1777_v36 = vrot.slane %v1761_v0, 7 }
 0x230   : > { %1973 = vrot.lane.b32.xlu0 %v1879_v45, %s2524_s23  ;;  %1895 = vrot.lane.b32.xlu1 %v1879_v45, %s2519_s29  ;;  %v1802_v1 = vsel %vm1253_vm0, %v1778_v31, 0.0  ;;  %v1794_v6 = vsel %vm1253_vm0, 0.0, %v1778_v31 }
 0x231   : > { %v1961_v19 = vrot.slane %v1802_v1, 2  ;;  %v3331_v60 = vsel %vm1253_vm0, 0.0, %v1777_v36  ;;  %v1960_v39 = vrot.slane %v1794_v6, 2  ;;  %v1801_v44 = vsel %vm1253_vm0, %v1777_v36, 0.0 }
 0x232   : > { %v1836_v49 = vrot.slane %v1801_v44, 1  ;;  %v1835_v51 = vrot.slane %v3331_v60, 1  ;;  %v1934_v15 = vrot.slane %v1802_v1, 1  ;;  %v1881_v56 = vrot.slane %v1801_v44, 2 }
 0x233   : > { %v1962_v50 = vsel %vm1337_vm2, %v1960_v39, %v1961_v19  ;;  %v1933_v24 = vrot.slane %v1794_v6, 1  ;;  %v1880_v58 = vrot.slane %v3331_v60, 2  ;;  %vm2091_vm0 = vcmask 326656  }
 0x234   : > { %1848 = vrot.lane.b32.xlu0 %v1831_v27, %s2515_s25  ;;  %2019 = vrot.lane.b32.xlu1 %v1834_v23, %s2523_s20  ;;  %v1837_v57 = vsel %vm1288_vm1, %v1835_v51, %v1836_v49 }
 0x235   : > { %v1935_v38 = vsel %vm1288_vm1, %v1933_v24, %v1934_v15  ;;  %v1882_v59 = vsel %vm1337_vm2, %v1880_v58, %v1881_v56  ;;  %vm2100_vm1 = vcmask 392192   ;;  %vm2109_vm2 = vcmask 457728  }
 0x238   : > { %1893 = vrot.lane.b32.xlu0 %v1876_v11, %s2519_s29  ;;  %2043 = vrot.lane.b32.xlu1 %v1879_v45, %s2525_s24 }
 0x23c   : > { %2017 = vrot.lane.b32.xlu0 %v1831_v27, %s2523_s20  ;;  %1944 = vrot.lane.b32.xlu1 %v1831_v27, %s2521_s6 }
 0x240   : > { %1971 = vrot.lane.b32.xlu0 %v1876_v11, %s2524_s23  ;;  %2041 = vrot.lane.b32.xlu1 %v1876_v11, %s2525_s24 }
 0x244   : > { %1922 = vrot.lane.b32.xlu0 %v1794_v6, %s2517_s27  ;;  %1920 = vrot.lane.b32.xlu1 %v3331_v60, %s2517_s27 }
 0x247   : > { %v1911_v52 = vpop.permute.xlu1 %1910 }
 0x248   : > { %1999 = vrot.lane.b32.xlu0 %v1794_v6, %s2522_s17  ;;  %1977 = vrot.lane.b32.xlu1 %v1962_v50, %s2524_s23  ;;  %v1909_v41 = vpop.permute.xlu0 %1908 }
 0x249   : > { %v2075_v13 = vsel %vm1582_vm5, %v2067_v61, %v1909_v41 }
 0x24b   : > { %v1988_v55 = vpop.permute.xlu1 %1987 }
 0x24c   : > { %1997 = vrot.lane.b32.xlu0 %v3331_v60, %s2522_s17  ;;  %1948 = vrot.lane.b32.xlu1 %v1837_v57, %s2521_s6  ;;  %v1939_v4 = vpop.permute.xlu0 %1938 }
 0x24f   : > { %v1843_v62 = vpop.permute.xlu1 %1842 }
 0x250   : > { %1950 = vrot.lane.b32.xlu0 %v1935_v38, %s2521_s6  ;;  %1975 = vrot.lane.b32.xlu1 %v1882_v59, %s2524_s23  ;;  %v1966_v8 = vpop.permute.xlu0 %1965  ;;  %v2061_v36 = vsel %vm1546_vm13, %v3188_v17, %v1843_v62 }
 0x253   : > { %v1888_v3 = vpop.permute.xlu1 %1887 }
 0x254   : > { %2023 = vrot.lane.b32.xlu0 %v1935_v38, %s2523_s20  ;;  %2049 = vrot.lane.b32.xlu1 %v2577_v14, %s2525_s24  ;;  %v1937_v34 = vpop.permute.xlu0 %1936  ;;  %v2069_v1 = vsel %vm1564_vm15, %v2061_v36, %v1888_v3 }
 0x255   : > { %v2083_v63 = vsel %vm1600_vm7, %v2075_v13, %v1937_v34 }
 0x257   : > { %v2012_v30 = vpop.permute.xlu1 %2011 }
 0x258   : > { %1852 = vrot.lane.b32.xlu0 %v1837_v57, %s2515_s25 }
 0x25b   : > { %v2036_v7 = vpop.permute.xlu1 %2035 }
 0x25c   : > { %1897 = vrot.lane.b32.xlu0 %v1882_v59, %s2519_s29  ;;  %s2375_s29 = sshll.u32 %s3465_s19, 6 }
 0x25f   : > { %v1841_v9 = vpop.permute.xlu1 %1840 }
 0x260   : > { %2021 = vrot.lane.b32.xlu0 %v1837_v57, %s2523_s20  ;;  %v2060_v48 = vsel %vm1546_vm13, %v3194_v18, %v1841_v9  ;;  %s224_s20 = scalar_lea.vmem %s3463_s5, %s2375_s29 }
 0x263   : > { %v1886_v14 = vpop.permute.xlu1 %1885 }
 0x264   : > { %2045 = vrot.lane.b32.xlu0 %v1882_v59, %s2525_s24  ;;  %v2068_v11 = vsel %vm1564_vm15, %v2060_v48, %v1886_v14 }
 0x265   : > { %v2076_v2 = vsel %vm1582_vm5, %v2068_v11, %v1911_v52 }
 0x266   : > { %v2084_v6 = vsel %vm1600_vm7, %v2076_v2, %v1939_v4 }
 0x267   : > { %v1964_v12 = vpop.permute.xlu1 %1963  ;;  %v1915_v20 = vpop.permute.xlu0 %1914  ;;  %v2093_v47 = vsel %vm2091_vm0, %v2084_v6, %v1966_v8 }
 0x268   : > { %2047 = vrot.lane.b32.xlu0 %v1962_v50, %s2525_s24  ;;  %v2092_v22 = vsel %vm2091_vm0, %v2083_v63, %v1964_v12 }
 0x269   : > { %v2101_v5 = vsel %vm2100_vm1, %v2092_v22, %v1988_v55 }
 0x26a   : > { %v2110_v21 = vsel %vm2109_vm2, %v2101_v5, %v2012_v30 }
 0x26b   : > { %v1992_v33 = vpop.permute.xlu1 %1991  ;;  %v1990_v23 = vpop.permute.xlu0 %1989  ;;  %v2119_v46 = vsel %vm2118_vm3, %v2110_v21, %v2036_v7 }
 0x26c   : > { %2446 = vmatprep.mubr.msk.f32.mxu1 %vm2143_vm9, %v2119_v46  ;;  %v2102_v50 = vsel %vm2100_vm1, %v2093_v47, %v1990_v23 }
 0x26f   : > { %v1913_v25 = vpop.permute.xlu1 %1912  ;;  %v1847_v43 = vpop.permute.xlu0 %1846 }
 0x270   : > { %v2077_v19 = vsel %vm1582_vm5, %v2069_v1, %v1913_v25  ;;  %v2063_v61 = vsel %vm1546_vm13, %v3227_v32, %v1847_v43 }
 0x273   : > { %v1943_v45 = vpop.permute.xlu1 %1942  ;;  %v1970_v26 = vpop.permute.xlu0 %1969 }
 0x277   : > { %v1892_v42 = vpop.permute.xlu1 %1891  ;;  %v1845_v27 = vpop.permute.xlu0 %1844 }
 0x278   : > { %v2062_v3 = vsel %vm1546_vm13, %v3234_v37, %v1845_v27  ;;  %v2071_v14 = vsel %vm1564_vm15, %v2063_v61, %v1892_v42 }
 0x27b   : > { %v2016_v28 = vpop.permute.xlu1 %2015  ;;  %v1890_v54 = vpop.permute.xlu0 %1889 }
 0x27c   : > { %v2070_v7 = vsel %vm1564_vm15, %v2062_v3, %v1890_v54 }
 0x27d   : > { %v2078_v8 = vsel %vm1582_vm5, %v2070_v7, %v1915_v20 }
 0x27e   : > { %v2086_v34 = vsel %vm1600_vm7, %v2078_v8, %v1943_v45 }
 0x27f   : > { %v2040_v0 = vpop.permute.xlu1 %2039  ;;  %v2014_v31 = vpop.permute.xlu0 %2013  ;;  %v2095_v37 = vsel %vm2091_vm0, %v2086_v34, %v1970_v26 }
 0x280   : > { %v2111_v17 = vsel %vm2109_vm2, %v2102_v50, %v2014_v31 }
 0x283   : > { %v1941_v39 = vpop.permute.xlu1 %1940  ;;  %v1968_v44 = vpop.permute.xlu0 %1967 }
 0x284   : > { %v2085_v18 = vsel %vm1600_vm7, %v2077_v19, %v1941_v39 }
 0x285   : > { %v2094_v49 = vsel %vm2091_vm0, %v2085_v18, %v1968_v44 }
 0x286   : > { %v2103_v51 = vsel %vm2100_vm1, %v2094_v49, %v1992_v33 }
 0x287   : > { %v2038_v52 = vpop.permute.xlu1 %2037  ;;  %v2112_v15 = vsel %vm2109_vm2, %v2103_v51, %v2016_v28 }
 0x288   : > { %v2120_v56 = vsel %vm2118_vm3, %v2111_v17, %v2038_v52  ;;  %v2121_v24 = vsel %vm2118_vm3, %v2112_v15, %v2040_v0 }
 0x289   : > { %2447 = vmatmul.mubr.msk.f32.vlgmr.msra.gmra.mrb[0].mxu1 %vm2143_vm9, %v2120_v56 }
 0x28a   : > { %2449 = vmatprep.mubr.msk.f32.mxu1 %vm2143_vm9, %v2121_v24 }
 0x296   : > { %v1919_v57 = vpop.permute.xlu0 %1918  ;;  %v1996_v58 = vpop.permute.xlu1 %1995 }
 0x29a   : > { %v1994_v29 = vpop.permute.xlu0 %1993  ;;  %v1917_v55 = vpop.permute.xlu1 %1916 }
 0x29b   : > { %v2079_v12 = vsel %vm1582_vm5, %v2071_v14, %v1917_v55  ;;  %v2104_v5 = vsel %vm2100_vm1, %v2095_v37, %v1994_v29 }
 0x29e   : > { %v1851_v38 = vpop.permute.xlu0 %1850  ;;  %v1947_v59 = vpop.permute.xlu1 %1946 }
 0x29f   : > { %v2065_v39 = vsel %vm1546_vm13, %v3287_v16, %v1851_v38 }
 0x2a2   : > { %v1974_v62 = vpop.permute.xlu0 %1973  ;;  %v1896_v41 = vpop.permute.xlu1 %1895 }
 0x2a3   : > { %v2073_v18 = vsel %vm1564_vm15, %v2065_v39, %v1896_v41 }
 0x2a6   : > { %v1849_v4 = vpop.permute.xlu0 %1848  ;;  %v2020_v30 = vpop.permute.xlu1 %2019 }
 0x2a7   : > { %v2064_v11 = vsel %vm1546_vm13, %v3295_v53, %v1849_v4 }
 0x2aa   : > { %v1894_v9 = vpop.permute.xlu0 %1893  ;;  %v2044_v10 = vpop.permute.xlu1 %2043 }
 0x2ab   : > { %v2072_v0 = vsel %vm1564_vm15, %v2064_v11, %v1894_v9 }
 0x2ac   : > { %v2080_v36 = vsel %vm1582_vm5, %v2072_v0, %v1919_v57 }
 0x2ad   : > { %v2088_v53 = vsel %vm1600_vm7, %v2080_v36, %v1947_v59 }
 0x2ae   : > { %v2018_v13 = vpop.permute.xlu0 %2017  ;;  %v1945_v63 = vpop.permute.xlu1 %1944  ;;  %v2097_v52 = vsel %vm2091_vm0, %v2088_v53, %v1974_v62 }
 0x2af   : > { %v2087_v22 = vsel %vm1600_vm7, %v2079_v12, %v1945_v63  ;;  %v2113_v20 = vsel %vm2109_vm2, %v2104_v5, %v2018_v13 }
 0x2b2   : > { %v1972_v21 = vpop.permute.xlu0 %1971  ;;  %v2042_v33 = vpop.permute.xlu1 %2041 }
 0x2b3   : > { %v2096_v32 = vsel %vm2091_vm0, %v2087_v22, %v1972_v21  ;;  %v2122_v23 = vsel %vm2118_vm3, %v2113_v20, %v2042_v33 }
 0x2b4   : > { %v2105_v46 = vsel %vm2100_vm1, %v2096_v32, %v1996_v58  ;;  %2450 = vmatmul.mubr.msk.f32.gmra.mrb[2].mxu1 %vm2143_vm9, %v2122_v23 }
 0x2b5   : > { %v2114_v25 = vsel %vm2109_vm2, %v2105_v46, %v2020_v30 }
 0x2b6   : > { %v1923_v43 = vpop.permute.xlu0 %1922  ;;  %v2123_v45 = vsel %vm2118_vm3, %v2114_v25, %v2044_v10  ;;  %v1921_v27 = vpop.permute.xlu1 %1920 }
 0x2b7   : > { %2452 = vmatprep.mubr.msk.f32.mxu1 %vm2143_vm9, %v2123_v45  ;;  %v2081_v50 = vsel %vm1582_vm5, %v2073_v18, %v1921_v27 }
 0x2ba   : > { %v2000_v26 = vpop.permute.xlu0 %1999  ;;  %v1978_v28 = vpop.permute.xlu1 %1977 }
 0x2be   : > { %v1998_v42 = vpop.permute.xlu0 %1997  ;;  %v1949_v31 = vpop.permute.xlu1 %1948 }
 0x2bf   : > { %v2106_v15 = vsel %vm2100_vm1, %v2097_v52, %v1998_v42 }
 0x2c2   : > { %v1951_v48 = vpop.permute.xlu0 %1950  ;;  %v1976_v47 = vpop.permute.xlu1 %1975 }
 0x2c6   : > { %v2024_v54 = vpop.permute.xlu0 %2023  ;;  %v2050_v55 = vpop.permute.xlu1 %2049 }
 0x2ca   : > { %v1853_v2 = vpop.permute.xlu0 %1852 }
 0x2cb   : > { %v2066_v1 = vsel %vm1546_vm13, %v3331_v60, %v1853_v2  ;;  %v2089_v60 = vsel %vm1600_vm7, %v2081_v50, %v1949_v31 }
 0x2cc   : > { %v2098_v16 = vsel %vm2091_vm0, %v2089_v60, %v1976_v47 }
 0x2cd   : > { %v2107_v58 = vsel %vm2100_vm1, %v2098_v16, %v2000_v26 }
 0x2ce   : > { %v1898_v6 = vpop.permute.xlu0 %1897  ;;  %v2116_v59 = vsel %vm2109_vm2, %v2107_v58, %v2024_v54 }
 0x2cf   : > { %v2074_v19 = vsel %vm1564_vm15, %v2066_v1, %v1898_v6 }
 0x2d0   : > { %v2082_v44 = vsel %vm1582_vm5, %v2074_v19, %v1923_v43 }
 0x2d1   : > { %v2090_v49 = vsel %vm1600_vm7, %v2082_v44, %v1951_v48 }
 0x2d2   : > { %v2022_v51 = vpop.permute.xlu0 %2021  ;;  %v2099_v17 = vsel %vm2091_vm0, %v2090_v49, %v1978_v28 }
 0x2d3   : > { %v2115_v56 = vsel %vm2109_vm2, %v2106_v15, %v2022_v51  ;;  %v2108_v24 = vsel %vm2100_vm1, %v2099_v17, %v3322_v35  ;;  %v2363_v35 = vld [vmem:[%s3462_s4] ss:$0 sm:$0xff] }
 0x2d4   : > { %v2117_v38 = vsel %vm2109_vm2, %v2108_v24, %v3328_v40 }
 0x2d5   : > { %v2126_v3 = vsel %vm2118_vm3, %v2117_v38, %v2050_v55 }
 0x2d6   : > { %v2046_v57 = vpop.permute.xlu0 %2045 }
 0x2d7   : > { %v2124_v29 = vsel %vm2118_vm3, %v2115_v56, %v2046_v57 }
 0x2d8   : > { %2453 = vmatmul.mubr.msk.f32.gmra.mrb[4].mxu1 %vm2143_vm9, %v2124_v29 }
 0x2da   : > { %v2048_v62 = vpop.permute.xlu0 %2047 }
 0x2db   : > { %v2125_v41 = vsel %vm2118_vm3, %v2116_v59, %v2048_v62 }
 0x2dc   : > { %2455 = vmatprep.mubr.msk.f32.mxu1 %vm2143_vm9, %v2125_v41 }
 0x2dd   : > { %2456 = vmatmul.mubr.msk.f32.gmra.mrb[6].mxu1 %vm2143_vm9, %v2126_v3 }
 0x35c   : > { %v2448_v4 = vpop.f32.mrb[0].mxu1 }
 0x35d   : > { %v2240_v30 = vadd.f32 %v2448_v4, %v2363_v35  ;;  %v2234_v7 = vpop.f32.mrb[1].mxu1 }
 0x35e   : > { %v2235_v40 = vadd.f32 %v2363_v35, %v2234_v7 }
 0x35f   : > { %v2274_v8 = vmax.f32 %v2240_v30, 0.0 }
 0x360   : > { %v2273_v9 = vmax.f32 %v2235_v40, 0.0 }
 0x361   : > { %2282 = vst.msk [vmem:[%s224_s20 + $0x8] sm:$0xff] %vm1546_vm13, %v2274_v8 }
 0x362   : > { %2281 = vst.msk [vmem:[%s224_s20] sm:$0xff] %vm1546_vm13, %v2273_v9 }
 0x387   : > { %v2451_v10 = vpop.f32.mrb[2].mxu1 }
 0x388   : > { %v2250_v61 = vadd.f32 %v2451_v10, %v2363_v35  ;;  %v2244_v34 = vpop.f32.mrb[3].mxu1 }
 0x389   : > { %v2245_v14 = vadd.f32 %v2363_v35, %v2244_v34 }
 0x38a   : > { %v2276_v13 = vmax.f32 %v2250_v61, 0.0 }
 0x38b   : > { %v2275_v63 = vmax.f32 %v2245_v14, 0.0 }
 0x38c   : > { %2284 = vst.msk [vmem:[%s224_s20 + $0x18] sm:$0xff] %vm1546_vm13, %v2276_v13 }
 0x38d   : > { %2283 = vst.msk [vmem:[%s224_s20 + $0x10] sm:$0xff] %vm1546_vm13, %v2275_v63 }
 0x3ab   : > { %v2454_v12 = vpop.f32.mrb[4].mxu1 }
 0x3ac   : > { %v2260_v37 = vadd.f32 %v2454_v12, %v2363_v35  ;;  %v2254_v22 = vpop.f32.mrb[5].mxu1 }
 0x3ad   : > { %v2255_v5 = vadd.f32 %v2363_v35, %v2254_v22 }
 0x3ae   : > { %v2278_v20 = vmax.f32 %v2260_v37, 0.0 }
 0x3af   : > { %v2277_v21 = vmax.f32 %v2255_v5, 0.0 }
 0x3b0   : > { %2286 = vst.msk [vmem:[%s224_s20 + $0x28] sm:$0xff] %vm1546_vm13, %v2278_v20  ;;  %v2457_v33 = vpop.f32.mrb[6].mxu1 }
 0x3b1   : > { %2285 = vst.msk [vmem:[%s224_s20 + $0x20] sm:$0xff] %vm1546_vm13, %v2277_v21  ;;  %v2270_v32 = vadd.f32 %v2457_v33, %v2363_v35  ;;  %v2264_v23 = vpop.f32.mrb[7].mxu1 }
 0x3b2   : > { %v2265_v46 = vadd.f32 %v2363_v35, %v2264_v23 }
 0x3b3   : > { %v2280_v25 = vmax.f32 %v2270_v32, 0.0 }
 0x3b4   : > { %v2279_v43 = vmax.f32 %v2265_v46, 0.0 }
 0x3b5   : > { %2288 = vst.msk [vmem:[%s224_s20 + $0x38] sm:$0xff] %vm1546_vm13, %v2280_v25 }
 0x3b6   : > { %2287 = vst.msk [vmem:[%s224_s20 + $0x30] sm:$0xff] %vm1546_vm13, %v2279_v43 }
 0x3b7 PF: > { %s15_s18 = sadd.s32 1, %s2510_s18  }
 0x3b8   : > { %p12_p4 = scmp.ge.s32.totalorder %s15_s18, 4  }
 0x3ba   :  { %14 = sbr.rel (!%p12_p4) target bundleno = 1 (0x1), region = 70 }

// kernel: tpu_custom_call.1
= control target key start
LH: loop header
LB: loop body
LE: loop exit
PB: predicated region body
PF: predicated region fallthrough
CT: control target
= control target key end

     0   :  { %s4477_s18 = smov 0   ;;  %s5361_s0 = inlined_call_operand.vmem [shape: f32[2,16,16,4], index: 0, kind: input, shape index: {}]   ;;  %s5362_s1 = inlined_call_operand.vmem [shape: f32[36,8], index: 1, kind: input, shape index: {}]   ;;  %s5363_s2 = inlined_call_operand.vmem [shape: f32[1,8], index: 2, kind: input, shape index: {}]   ;;  %s5364_s3 = inlined_call_operand.vmem [shape: f32[72,8], index: 3, kind: input, shape index: {}]   ;;  %s5365_s4 = inlined_call_operand.vmem [shape: f32[1,8], index: 4, kind: input, shape index: {}]   ;;  %s5366_s5 = inlined_call_operand.vmem [shape: f32[2,64,8], index: 5, kind: output, shape index: {}]  }
   0x1 LB: > { %s3716_s19 = sadd.s32 4294967295, %s4443_s18   ;;  %p3720_p0 = scmp.ge.s32.totalorder %s4443_s18, 1  ;;  %s4443_s18 = sphi %s4477_s18, %s15_s18  }
   0x2   : > { %p187_p1 = scmp.lt.s32.totalorder %s4443_s18, 3 }
   0x4   : > { %p188_p2 = pnand %p3720_p0, %p187_p1 }
   0x5   : > { %v1314_v0 = vld [vmem:[%s5362_s1 + $0x4] sm:$0xf] (!%p188_p2)  ;;  %vm1331_vm0 = vcmask (!%p188_p2), 1043456   ;;  %vm1253_vm1 = vcmask (!%p188_p2), 1040384   ;;  %v4445_v1 = vmov (!%p188_p2), 0.0   ;;  %p215_p3 = scmp.lt.s32.totalorder (!%p188_p2), %s3716_s19, 1  ;;  %v326_v4 = vlaneseq (!%p188_p2) }
   0x6   : > { %191 = sbr.rel (%p188_p2) target bundleno = 876 (0x36c), region = 40  ;;  %4046 = vmatprep.subr.msk.mxu0 (!%p188_p2), %vm1331_vm0, %v1314_v0  ;;  %v1235_v2 = vrot.slane (!%p188_p2), %v4445_v1, 7  ;;  %v4492_v3 = vld [vmem:[%s5362_s1] sm:$0xf] (!%p188_p2)  ;;  %vm1289_vm2 = vcmask (!%p188_p2), 1046528   ;;  %vm257_vm3 = vcmask (!%p188_p2), 31744  }
   0x7   : > { %4047 = vmatpush3.msk.msra.mxu0 (!%p188_p2), %vm1331_vm0, %v1314_v0  ;;  %v4446_v7 = vmov (!%p188_p2), 1983009808   ;;  %v327_v9 = vshrl.u32 (!%p188_p2), %v326_v4, 7  ;;  %vm658_vm4 = vcmask (!%p188_p2), 25600   ;;  %vm1171_vm5 = vcmask (!%p188_p2), 1041409  }
   0x8   : > { %v4496_v5 = vsel (!%p188_p2), %vm1253_vm1, 0.0, %v1235_v2  ;;  %v4499_v6 = vsel (!%p188_p2), %vm1253_vm1, %v1235_v2, 0.0  ;;  %4060 = vmatprep.subr.msk.mxu0 (!%p188_p2), %vm1331_vm0, %v4492_v3  ;;  %v324_v8 = vunpack.c.l.s4 (!%p188_p2), %v4446_v7  ;;  %vm1173_vm6 = vcmask (!%p188_p2), 1042434  }
   0x9   : > { %v1290_v10 = vrot.slane (!%p188_p2), %v4496_v5, 1  ;;  %v1291_v11 = vrot.slane (!%p188_p2), %v4499_v6, 1  ;;  %vm1175_vm7 = vcmask (!%p188_p2), 1043459   ;;  %vm1177_vm8 = vcmask (!%p188_p2), 1044484  }
   0xa   : > { %v325_v12 = vunpack.c.0.s8 (!%p188_p2), %v324_v8  ;;  %vm1179_vm9 = vcmask (!%p188_p2), 1045509   ;;  %vm1181_vm10 = vcmask (!%p188_p2), 1046534   ;;  %vm1183_vm11 = vcmask (!%p188_p2), 1047559  }
   0xb   : > { %v4509_v13 = vsel (!%p188_p2), %vm1289_vm2, %v1290_v10, %v1291_v11  ;;  %vm1564_vm12 = vcmask (!%p188_p2), 1045504   ;;  %vm2538_vm13 = vcmask (!%p188_p2), 64512  }
   0xc   : > { %4048 = vmatprep.mubr.msk.f32.mxu0 (!%p188_p2), %vm257_vm3, %v4509_v13  ;;  %v4521_v17 = vsub.s32 (!%p188_p2), %v325_v12, %v327_v9  ;;  %4174 = vmatprep.mubr.msk.f32.mxu1 (!%p188_p2), %vm2538_vm13, %v4509_v13 }
   0xd   : > { %s5368_s19 = smov (!%p215_p3, %s3716_s19), 1 }
   0xe   : > { %s3882_s24 = sshll.u32 %s5368_s19, 8  ;;  %s3883_s20 = sshll.u32 %s5368_s19, 6 }
   0xf   : > { %s4514_s27 = scalar_lea.vmem %s5361_s0, %s3882_s24  ;;  %s224_s23 = scalar_lea.vmem %s5366_s5, %s3883_s20 }
  0x10   : > { %v225_v14 = vld [vmem:[%s4514_s27] sm:$0xff]  ;;  %v226_v15 = vld [vmem:[%s4514_s27 + $0x8] sm:$0xff]  ;;  %v227_v16 = vld [vmem:[%s4514_s27 + $0x10] sm:$0xff] }
  0x11   : > { %v228_v18 = vld [vmem:[%s4514_s27 + $0x18] sm:$0xff]  ;;  %v258_v19 = vsel %vm257_vm3, %v225_v14, -inf  ;;  %v259_v20 = vsel %vm257_vm3, %v227_v16, -inf  ;;  %v261_v21 = vsel %vm257_vm3, %v226_v15, -inf  ;;  %v229_v22 = vld [vmem:[%s4514_s27 + $0x20] sm:$0xff]  ;;  %v230_v23 = vld [vmem:[%s4514_s27 + $0x28] sm:$0xff] }
  0x12   : > { %v260_v24 = vmax.f32 %v258_v19, %v259_v20  ;;  %v262_v25 = vsel %vm257_vm3, %v228_v18, -inf  ;;  %v231_v26 = vld [vmem:[%s4514_s27 + $0x30] sm:$0xff]  ;;  %v232_v27 = vld [vmem:[%s4514_s27 + $0x38] sm:$0xff]  ;;  %v264_v28 = vsel %vm257_vm3, %v229_v22, -inf  ;;  %v267_v29 = vsel %vm257_vm3, %v230_v23, -inf  ;;  %v233_v30 = vld [vmem:[%s4514_s27 + $0x40] sm:$0xff] }
  0x13   : > { %v263_v31 = vmax.f32 %v261_v21, %v262_v25  ;;  %v265_v32 = vsel %vm257_vm3, %v231_v26, -inf  ;;  %v268_v33 = vsel %vm257_vm3, %v232_v27, -inf  ;;  %v235_v34 = vld [vmem:[%s4514_s27 + $0x50] sm:$0xff]  ;;  %v4542_v38 = vsel %vm257_vm3, %v233_v30, -inf }
  0x14   : > { %v322_v35 = vcombine.high %v260_v24, %v260_v24  ;;  %v329_v36 = vrot.slane %v260_v24, %v4521_v17  ;;  %v4539_v37 = vmax.f32 %v264_v28, %v265_v32  ;;  %v4545_v41 = vmax.f32 %v267_v29, %v268_v33 }
  0x15   : > { %v339_v39 = vcombine.high %v263_v31, %v263_v31  ;;  %v346_v40 = vrot.slane %v263_v31, %v4521_v17  ;;  %v4548_v42 = vsel %vm257_vm3, %v235_v34, -inf }
  0x16   : > { %v336_v43 = vrot.slane %v322_v35, %v4521_v17  ;;  %v337_v44 = vcombine.high %v329_v36, %v329_v36  ;;  %v659_v45 = vsel %vm658_vm4, %v329_v36, -inf  ;;  %v356_v46 = vcombine.high %v4539_v37, %v4539_v37 }
  0x17   : > { %v353_v47 = vrot.slane %v339_v39, %v4521_v17  ;;  %v354_v48 = vcombine.high %v346_v40, %v346_v40  ;;  %v660_v49 = vrot.slane %v659_v45, 4  ;;  %v687_v50 = vsel %vm658_vm4, %v346_v40, -inf }
  0x18   : > { %v338_v51 = vcombine.high %v336_v43, %v336_v43  ;;  %v666_v52 = vsel %vm658_vm4, %v337_v44, -inf  ;;  %v673_v53 = vsel %vm658_vm4, %v336_v43, -inf  ;;  %v688_v54 = vrot.slane %v687_v50, 4 }
  0x19   : > { %v355_v55 = vcombine.high %v353_v47, %v353_v47  ;;  %v661_v56 = vmax.f32 %v659_v45, %v660_v49  ;;  %v667_v57 = vrot.slane %v666_v52, 4  ;;  %v674_v58 = vrot.slane %v673_v53, 4  ;;  %v234_v49 = vld [vmem:[%s4514_s27 + $0x48] sm:$0xff] }
  0x1a   : > { %v680_v59 = vsel %vm658_vm4, %v338_v51, -inf  ;;  %v689_v60 = vmax.f32 %v687_v50, %v688_v54  ;;  %v694_v61 = vsel %vm658_vm4, %v354_v48, -inf  ;;  %v701_v62 = vsel %vm658_vm4, %v353_v47, -inf }
  0x1b   : > { %v662_v63 = vrot.slane %v661_v56, 2  ;;  %v668_v0 = vmax.f32 %v666_v52, %v667_v57  ;;  %v675_v1 = vmax.f32 %v673_v53, %v674_v58  ;;  %v681_v2 = vrot.slane %v680_v59, 4 }
  0x1c   : > { %v690_v4 = vrot.slane %v689_v60, 2  ;;  %v695_v7 = vrot.slane %v694_v61, 4  ;;  %v702_v8 = vrot.slane %v701_v62, 4  ;;  %v708_v9 = vsel %vm658_vm4, %v355_v55, -inf }
  0x1d   : > { %v663_v10 = vmax.f32 %v661_v56, %v662_v63  ;;  %v669_v11 = vrot.slane %v668_v0, 2  ;;  %v676_v12 = vrot.slane %v675_v1, 2  ;;  %v682_v14 = vmax.f32 %v680_v59, %v681_v2 }
  0x1e   : > { %v691_v15 = vmax.f32 %v689_v60, %v690_v4  ;;  %v696_v16 = vmax.f32 %v694_v61, %v695_v7  ;;  %v703_v18 = vmax.f32 %v701_v62, %v702_v8  ;;  %v709_v19 = vrot.slane %v708_v9, 4 }
  0x1f   : > { %v664_v20 = vrot.slane %v663_v10, 1  ;;  %v670_v21 = vmax.f32 %v668_v0, %v669_v11  ;;  %v677_v22 = vmax.f32 %v675_v1, %v676_v12  ;;  %v683_v23 = vrot.slane %v682_v14, 2 }
  0x20   : > { %v692_v24 = vrot.slane %v691_v15, 1  ;;  %v697_v25 = vrot.slane %v696_v16, 2  ;;  %v704_v26 = vrot.slane %v703_v18, 2  ;;  %v710_v27 = vmax.f32 %v708_v9, %v709_v19 }
  0x21   : > { %v665_v28 = vmax.f32 %v663_v10, %v664_v20  ;;  %v671_v29 = vrot.slane %v670_v21, 1  ;;  %v678_v30 = vrot.slane %v677_v22, 1  ;;  %v684_v31 = vmax.f32 %v682_v14, %v683_v23 }
  0x22   : > { %v693_v32 = vmax.f32 %v691_v15, %v692_v24  ;;  %v698_v33 = vmax.f32 %v696_v16, %v697_v25  ;;  %v705_v34 = vmax.f32 %v703_v18, %v704_v26  ;;  %v711_v35 = vrot.slane %v710_v27, 2 }
  0x23   : > { %v672_v36 = vmax.f32 %v670_v21, %v671_v29  ;;  %v679_v39 = vmax.f32 %v677_v22, %v678_v30  ;;  %v685_v40 = vrot.slane %v684_v31, 1  ;;  %v363_v43 = vrot.slane %v4539_v37, %v4521_v17 }
  0x24   : > { %v699_v44 = vrot.slane %v698_v33, 1  ;;  %v706_v45 = vrot.slane %v705_v34, 1  ;;  %v712_v47 = vmax.f32 %v710_v27, %v711_v35  ;;  %v370_v48 = vrot.slane %v356_v46, %v4521_v17 }
  0x25   : > { %v686_v50 = vmax.f32 %v684_v31, %v685_v40  ;;  %v1172_v51 = vsel %vm1171_vm5, %v672_v36, %v665_v28  ;;  %v371_v52 = vcombine.high %v363_v43, %v363_v43  ;;  %v373_v53 = vcombine.high %v4545_v41, %v4545_v41 }
  0x26   : > { %v700_v54 = vmax.f32 %v698_v33, %v699_v44  ;;  %v707_v55 = vmax.f32 %v705_v34, %v706_v45  ;;  %v713_v56 = vrot.slane %v712_v47, 1  ;;  %v1174_v57 = vsel %vm1173_vm6, %v679_v39, %v1172_v51 }
  0x27   : > { %v1176_v58 = vsel %vm1175_vm7, %v686_v50, %v1174_v57  ;;  %v372_v59 = vcombine.high %v370_v48, %v370_v48  ;;  %v380_v37 = vrot.slane %v4545_v41, %v4521_v17  ;;  %v4577_v46 = vsel %vm257_vm3, %v234_v49, -inf }
  0x28   : > { %v714_v60 = vmax.f32 %v712_v47, %v713_v56  ;;  %v1178_v61 = vsel %vm1177_vm8, %v693_v32, %v1176_v58  ;;  %v715_v62 = vsel %vm658_vm4, %v363_v43, -inf  ;;  %v722_v63 = vsel %vm658_vm4, %v371_v52, -inf  ;;  %v236_v58 = vld [vmem:[%s4514_s27 + $0x58] sm:$0xff] }
  0x29   : > { %v1180_v0 = vsel %vm1179_vm9, %v700_v54, %v1178_v61  ;;  %v387_v1 = vrot.slane %v373_v53, %v4521_v17  ;;  %v388_v2 = vcombine.high %v380_v37, %v380_v37  ;;  %v716_v4 = vrot.slane %v715_v62, 4  ;;  %v1589_v53 = vld [vmem:[%s5362_s1 + $0x8] sm:$0xf] }
  0x2a   : > { %v1182_v7 = vsel %vm1181_vm10, %v707_v55, %v1180_v0  ;;  %v723_v8 = vrot.slane %v722_v63, 4  ;;  %v729_v41 = vsel %vm658_vm4, %v370_v48, -inf  ;;  %v736_v9 = vsel %vm658_vm4, %v372_v59, -inf }
  0x2b   : > { %v1184_v10 = vsel %vm1183_vm11, %v714_v60, %v1182_v7  ;;  %v717_v11 = vmax.f32 %v715_v62, %v716_v4  ;;  %v730_v12 = vrot.slane %v729_v41, 4  ;;  %v737_v14 = vrot.slane %v736_v9, 4 }
  0x2c   : > { %v1236_v15 = vrot.slane %v1184_v10, 7  ;;  %v724_v16 = vmax.f32 %v722_v63, %v723_v8  ;;  %v743_v18 = vsel %vm658_vm4, %v380_v37, -inf  ;;  %v750_v19 = vsel %vm658_vm4, %v388_v2, -inf }
  0x2d   : > { %v718_v20 = vrot.slane %v717_v11, 2  ;;  %v731_v21 = vmax.f32 %v729_v41, %v730_v12  ;;  %v738_v22 = vmax.f32 %v736_v9, %v737_v14  ;;  %v744_v23 = vrot.slane %v743_v18, 4 }
  0x2e   : > { %v4591_v24 = vsel %vm1253_vm1, 0.0, %v1236_v15  ;;  %v4594_v25 = vsel %vm1253_vm1, %v1236_v15, 0.0  ;;  %v725_v26 = vrot.slane %v724_v16, 2  ;;  %v751_v27 = vrot.slane %v750_v19, 4 }
  0x2f   : > { %v1293_v28 = vrot.slane %v4591_v24, 1  ;;  %v1294_v29 = vrot.slane %v4594_v25, 1  ;;  %v389_v30 = vcombine.high %v387_v1, %v387_v1  ;;  %v719_v31 = vmax.f32 %v717_v11, %v718_v20 }
  0x30   : > { %v726_v32 = vmax.f32 %v724_v16, %v725_v26  ;;  %v732_v33 = vrot.slane %v731_v21, 2  ;;  %v739_v34 = vrot.slane %v738_v22, 2  ;;  %v745_v35 = vmax.f32 %v743_v18, %v744_v23 }
  0x31   : > { %v4599_v36 = vsel %vm1289_vm2, %v1293_v28, %v1294_v29  ;;  %v720_v39 = vrot.slane %v719_v31, 1  ;;  %v752_v40 = vmax.f32 %v750_v19, %v751_v27  ;;  %v757_v43 = vsel %vm658_vm4, %v387_v1, -inf }
  0x32   : > { %4049 = vmatmul.mubr.msk.f32.vlgmr.msra.gmra.mrb[0].mxu0 %vm257_vm3, %v4599_v36  ;;  %v727_v44 = vrot.slane %v726_v32, 1  ;;  %v733_v45 = vmax.f32 %v731_v21, %v732_v33  ;;  %v740_v47 = vmax.f32 %v738_v22, %v739_v34  ;;  %v746_v48 = vrot.slane %v745_v35, 2 }
  0x33   : > { %4061 = vmatpush3.msk.msra.mxu0 %vm1331_vm0, %v4492_v3  ;;  %v721_v49 = vmax.f32 %v719_v31, %v720_v39  ;;  %v753_v50 = vrot.slane %v752_v40, 2  ;;  %v758_v51 = vrot.slane %v757_v43, 4  ;;  %v764_v52 = vsel %vm658_vm4, %v389_v30, -inf }
  0x34   : > { %v728_v54 = vmax.f32 %v726_v32, %v727_v44  ;;  %v734_v55 = vrot.slane %v733_v45, 1  ;;  %v741_v56 = vrot.slane %v740_v47, 1  ;;  %v747_v57 = vmax.f32 %v745_v35, %v746_v48  ;;  %4074 = vmatprep.subr.msk.mxu0 %vm1331_vm0, %v1589_v53 }
  0x35   : > { %v754_v59 = vmax.f32 %v752_v40, %v753_v50  ;;  %v759_v37 = vmax.f32 %v757_v43, %v758_v51  ;;  %v765_v60 = vrot.slane %v764_v52, 4  ;;  %v272_v3 = vmax.f32 %v4542_v38, %v4548_v42 }
  0x36   : > { %v735_v61 = vmax.f32 %v733_v45, %v734_v55  ;;  %v742_v62 = vmax.f32 %v740_v47, %v741_v56  ;;  %v748_v63 = vrot.slane %v747_v57, 1  ;;  %v1185_v0 = vsel %vm1171_vm5, %v728_v54, %v721_v49 }
  0x37   : > { %v755_v1 = vrot.slane %v754_v59, 1  ;;  %v760_v2 = vrot.slane %v759_v37, 2  ;;  %v766_v4 = vmax.f32 %v764_v52, %v765_v60  ;;  %v274_v7 = vsel %vm257_vm3, %v236_v58, -inf }
  0x38   : > { %v749_v8 = vmax.f32 %v747_v57, %v748_v63  ;;  %v1186_v41 = vsel %vm1173_vm6, %v735_v61, %v1185_v0  ;;  %v275_v9 = vmax.f32 %v4577_v46, %v274_v7  ;;  %v390_v10 = vcombine.high %v272_v3, %v272_v3 }
  0x39   : > { %v756_v11 = vmax.f32 %v754_v59, %v755_v1  ;;  %v761_v12 = vmax.f32 %v759_v37, %v760_v2  ;;  %v767_v14 = vrot.slane %v766_v4, 2  ;;  %v1187_v38 = vsel %vm1175_vm7, %v742_v62, %v1186_v41 }
  0x3a   : > { %v1188_v42 = vsel %vm1177_vm8, %v749_v8, %v1187_v38  ;;  %v397_v15 = vrot.slane %v272_v3, %v4521_v17  ;;  %v404_v16 = vrot.slane %v390_v10, %v4521_v17  ;;  %v407_v18 = vcombine.high %v275_v9, %v275_v9  ;;  %v237_v10 = vld [vmem:[%s4514_s27 + $0x60] sm:$0xff] }
  0x3b   : > { %v762_v19 = vrot.slane %v761_v12, 1  ;;  %v768_v20 = vmax.f32 %v766_v4, %v767_v14  ;;  %v1189_v21 = vsel %vm1179_vm9, %v756_v11, %v1188_v42  ;;  %v414_v22 = vrot.slane %v275_v9, %v4521_v17 }
  0x3c   : > { %v405_v46 = vcombine.high %v397_v15, %v397_v15  ;;  %v406_v23 = vcombine.high %v404_v16, %v404_v16  ;;  %v421_v26 = vrot.slane %v407_v18, %v4521_v17  ;;  %v771_v27 = vsel %vm658_vm4, %v397_v15, -inf }
  0x3d   : > { %v763_v28 = vmax.f32 %v761_v12, %v762_v19  ;;  %v769_v29 = vrot.slane %v768_v20, 1  ;;  %v422_v30 = vcombine.high %v414_v22, %v414_v22  ;;  %v772_v31 = vrot.slane %v771_v27, 4  ;;  %v239_v19 = vld [vmem:[%s4514_s27 + $0x70] sm:$0xff] }
  0x3e   : > { %v423_v32 = vcombine.high %v421_v26, %v421_v26  ;;  %v778_v33 = vsel %vm658_vm4, %v405_v46, -inf  ;;  %v785_v34 = vsel %vm658_vm4, %v404_v16, -inf  ;;  %v792_v35 = vsel %vm658_vm4, %v406_v23, -inf }
  0x3f   : > { %v770_v39 = vmax.f32 %v768_v20, %v769_v29  ;;  %v1190_v40 = vsel %vm1181_vm10, %v763_v28, %v1189_v21  ;;  %v773_v43 = vmax.f32 %v771_v27, %v772_v31  ;;  %v779_v44 = vrot.slane %v778_v33, 4  ;;  %v238_v29 = vld [vmem:[%s4514_s27 + $0x68] sm:$0xff] }
  0x40   : > { %v786_v45 = vrot.slane %v785_v34, 4  ;;  %v793_v47 = vrot.slane %v792_v35, 4  ;;  %v799_v48 = vsel %vm658_vm4, %v414_v22, -inf  ;;  %v806_v49 = vsel %vm658_vm4, %v422_v30, -inf }
  0x41   : > { %v1191_v50 = vsel %vm1183_vm11, %v770_v39, %v1190_v40  ;;  %v774_v51 = vrot.slane %v773_v43, 2  ;;  %v780_v52 = vmax.f32 %v778_v33, %v779_v44  ;;  %v800_v53 = vrot.slane %v799_v48, 4 }
  0x42   : > { %v1237_v54 = vrot.slane %v1191_v50, 7  ;;  %v787_v55 = vmax.f32 %v785_v34, %v786_v45  ;;  %v794_v56 = vmax.f32 %v792_v35, %v793_v47  ;;  %v807_v57 = vrot.slane %v806_v49, 4  ;;  %v240_v34 = vld [vmem:[%s4514_s27 + $0x78] sm:$0xff]  ;;  %v243_v50 = vld [vmem:[%s4514_s27 + $0x90] sm:$0xff] }
  0x43   : > { %v775_v58 = vmax.f32 %v773_v43, %v774_v51  ;;  %v781_v59 = vrot.slane %v780_v52, 2  ;;  %v801_v37 = vmax.f32 %v799_v48, %v800_v53  ;;  %v813_v60 = vsel %vm658_vm4, %v421_v26, -inf }
  0x44   : > { %v4635_v3 = vsel %vm1253_vm1, 0.0, %v1237_v54  ;;  %v4638_v61 = vsel %vm1253_vm1, %v1237_v54, 0.0  ;;  %v788_v62 = vrot.slane %v787_v55, 2  ;;  %v795_v63 = vrot.slane %v794_v56, 2 }
  0x45   : > { %v1296_v0 = vrot.slane %v4635_v3, 1  ;;  %v1297_v1 = vrot.slane %v4638_v61, 1  ;;  %v776_v2 = vrot.slane %v775_v58, 1  ;;  %v782_v4 = vmax.f32 %v780_v52, %v781_v59 }
  0x46   : > { %v789_v7 = vmax.f32 %v787_v55, %v788_v62  ;;  %v796_v8 = vmax.f32 %v794_v56, %v795_v63  ;;  %v802_v41 = vrot.slane %v801_v37, 2  ;;  %v808_v9 = vmax.f32 %v806_v49, %v807_v57  ;;  %v241_v49 = vld [vmem:[%s4514_s27 + $0x80] sm:$0xff] }
  0x47   : > { %v4644_v11 = vsel %vm1289_vm2, %v1296_v0, %v1297_v1  ;;  %v777_v12 = vmax.f32 %v775_v58, %v776_v2  ;;  %v783_v14 = vrot.slane %v782_v4, 1  ;;  %v814_v38 = vrot.slane %v813_v60, 4 }
  0x48   : > { %4051 = vmatprep.mubr.msk.f32.mxu0 %vm257_vm3, %v4644_v11  ;;  %v790_v42 = vrot.slane %v789_v7, 1  ;;  %v797_v15 = vrot.slane %v796_v8, 1  ;;  %v803_v16 = vmax.f32 %v801_v37, %v802_v41  ;;  %v809_v18 = vrot.slane %v808_v9, 2 }
  0x49   : > { %v784_v20 = vmax.f32 %v782_v4, %v783_v14  ;;  %v815_v21 = vmax.f32 %v813_v60, %v814_v38  ;;  %v820_v22 = vsel %vm658_vm4, %v423_v32, -inf  ;;  %v276_v46 = vsel %vm257_vm3, %v237_v10, -inf }
  0x4a   : > { %v791_v23 = vmax.f32 %v789_v7, %v790_v42  ;;  %v798_v26 = vmax.f32 %v796_v8, %v797_v15  ;;  %v804_v27 = vrot.slane %v803_v16, 1  ;;  %v810_v28 = vmax.f32 %v808_v9, %v809_v18 }
  0x4b   : > { %v816_v30 = vrot.slane %v815_v21, 2  ;;  %v821_v31 = vrot.slane %v820_v22, 4  ;;  %v1192_v33 = vsel %vm1171_vm5, %v784_v20, %v777_v12  ;;  %v277_v35 = vsel %vm257_vm3, %v239_v19, -inf }
  0x4c   : > { %v805_v39 = vmax.f32 %v803_v16, %v804_v27  ;;  %v811_v40 = vrot.slane %v810_v28, 1  ;;  %v1193_v32 = vsel %vm1173_vm6, %v791_v23, %v1192_v33  ;;  %v278_v43 = vmax.f32 %v276_v46, %v277_v35 }
  0x4d   : > { %v817_v44 = vmax.f32 %v815_v21, %v816_v30  ;;  %v822_v45 = vmax.f32 %v820_v22, %v821_v31  ;;  %v1194_v47 = vsel %vm1175_vm7, %v798_v26, %v1193_v32  ;;  %v279_v48 = vsel %vm257_vm3, %v238_v29, -inf }
  0x4e   : > { %v812_v51 = vmax.f32 %v810_v28, %v811_v40  ;;  %v1195_v52 = vsel %vm1177_vm8, %v805_v39, %v1194_v47  ;;  %v280_v53 = vsel %vm257_vm3, %v240_v34, -inf  ;;  %v424_v54 = vcombine.high %v278_v43, %v278_v43 }
  0x4f   : > { %v818_v55 = vrot.slane %v817_v44, 1  ;;  %v823_v56 = vrot.slane %v822_v45, 2  ;;  %v281_v57 = vmax.f32 %v279_v48, %v280_v53  ;;  %v431_v58 = vrot.slane %v278_v43, %v4521_v17 }
  0x50   : > { %v1196_v59 = vsel %vm1179_vm9, %v812_v51, %v1195_v52  ;;  %v438_v37 = vrot.slane %v424_v54, %v4521_v17  ;;  %v4666_v60 = vsel %vm257_vm3, %v241_v49, -inf  ;;  %v4669_v62 = vsel %vm257_vm3, %v243_v50, -inf }
  0x51   : > { %v819_v63 = vmax.f32 %v817_v44, %v818_v55  ;;  %v824_v0 = vmax.f32 %v822_v45, %v823_v56  ;;  %v439_v1 = vcombine.high %v431_v58, %v431_v58  ;;  %v441_v2 = vcombine.high %v281_v57, %v281_v57 }
  0x52   : > { %v440_v4 = vcombine.high %v438_v37, %v438_v37  ;;  %v448_v7 = vrot.slane %v281_v57, %v4521_v17  ;;  %v827_v8 = vsel %vm658_vm4, %v431_v58, -inf  ;;  %v841_v41 = vsel %vm658_vm4, %v438_v37, -inf }
  0x53   : > { %v825_v9 = vrot.slane %v824_v0, 1  ;;  %v1197_v10 = vsel %vm1181_vm10, %v819_v63, %v1196_v59  ;;  %v455_v12 = vrot.slane %v441_v2, %v4521_v17  ;;  %v828_v14 = vrot.slane %v827_v8, 4 }
  0x54   : > { %v456_v38 = vcombine.high %v448_v7, %v448_v7  ;;  %v834_v42 = vsel %vm658_vm4, %v439_v1, -inf  ;;  %v842_v15 = vrot.slane %v841_v41, 4  ;;  %v848_v16 = vsel %vm658_vm4, %v440_v4, -inf  ;;  %v242_v4 = vld [vmem:[%s4514_s27 + $0x88] sm:$0xff] }
  0x55   : > { %v826_v18 = vmax.f32 %v824_v0, %v825_v9  ;;  %v457_v19 = vcombine.high %v455_v12, %v455_v12  ;;  %v829_v20 = vmax.f32 %v827_v8, %v828_v14  ;;  %v835_v21 = vrot.slane %v834_v42, 4 }
  0x56   : > { %v843_v22 = vmax.f32 %v841_v41, %v842_v15  ;;  %v849_v46 = vrot.slane %v848_v16, 4  ;;  %v855_v23 = vsel %vm658_vm4, %v448_v7, -inf  ;;  %v862_v26 = vsel %vm658_vm4, %v456_v38, -inf  ;;  %v244_v7 = vld [vmem:[%s4514_s27 + $0x98] sm:$0xff] }
  0x57   : > { %v1198_v27 = vsel %vm1183_vm11, %v826_v18, %v1197_v10  ;;  %v830_v28 = vrot.slane %v829_v20, 2  ;;  %v836_v29 = vmax.f32 %v834_v42, %v835_v21  ;;  %v856_v30 = vrot.slane %v855_v23, 4 }
  0x58   : > { %v1238_v31 = vrot.slane %v1198_v27, 7  ;;  %v844_v33 = vrot.slane %v843_v22, 2  ;;  %v850_v34 = vmax.f32 %v848_v16, %v849_v46  ;;  %v863_v35 = vrot.slane %v862_v26, 4 }
  0x59   : > { %v831_v39 = vmax.f32 %v829_v20, %v830_v28  ;;  %v837_v40 = vrot.slane %v836_v29, 2  ;;  %v857_v32 = vmax.f32 %v855_v23, %v856_v30  ;;  %v869_v43 = vsel %vm658_vm4, %v455_v12, -inf }
  0x5a   : > { %v4683_v44 = vsel %vm1253_vm1, 0.0, %v1238_v31  ;;  %v4686_v45 = vsel %vm1253_vm1, %v1238_v31, 0.0  ;;  %v845_v47 = vmax.f32 %v843_v22, %v844_v33  ;;  %v851_v48 = vrot.slane %v850_v34, 2 }
  0x5b   : > { %v1299_v49 = vrot.slane %v4683_v44, 1  ;;  %v1300_v50 = vrot.slane %v4686_v45, 1  ;;  %v832_v51 = vrot.slane %v831_v39, 1  ;;  %v838_v52 = vmax.f32 %v836_v29, %v837_v40 }
  0x5c   : > { %v846_v53 = vrot.slane %v845_v47, 1  ;;  %v852_v54 = vmax.f32 %v850_v34, %v851_v48  ;;  %v858_v55 = vrot.slane %v857_v32, 2  ;;  %v864_v56 = vmax.f32 %v862_v26, %v863_v35 }
  0x5d   : > { %v4691_v57 = vsel %vm1289_vm2, %v1299_v49, %v1300_v50  ;;  %v833_v58 = vmax.f32 %v831_v39, %v832_v51  ;;  %v839_v59 = vrot.slane %v838_v52, 1  ;;  %v870_v37 = vrot.slane %v869_v43, 4 }
  0x5e   : > { %4052 = vmatmul.mubr.msk.f32.gmra.mrb[2].mxu0 %vm257_vm3, %v4691_v57  ;;  %v847_v63 = vmax.f32 %v845_v47, %v846_v53  ;;  %v853_v0 = vrot.slane %v852_v54, 1  ;;  %v859_v1 = vmax.f32 %v857_v32, %v858_v55  ;;  %v865_v2 = vrot.slane %v864_v56, 2 }
  0x5f   : > { %v840_v8 = vmax.f32 %v838_v52, %v839_v59  ;;  %v871_v41 = vmax.f32 %v869_v43, %v870_v37  ;;  %v876_v9 = vsel %vm658_vm4, %v457_v19, -inf  ;;  %v284_v10 = vmax.f32 %v4666_v60, %v4669_v62 }
  0x60   : > { %v854_v12 = vmax.f32 %v852_v54, %v853_v0  ;;  %v860_v14 = vrot.slane %v859_v1, 1  ;;  %v866_v38 = vmax.f32 %v864_v56, %v865_v2  ;;  %v877_v42 = vrot.slane %v876_v9, 4 }
  0x61   : > { %v872_v15 = vrot.slane %v871_v41, 2  ;;  %v1199_v16 = vsel %vm1171_vm5, %v840_v8, %v833_v58  ;;  %v285_v18 = vsel %vm257_vm3, %v242_v4, -inf  ;;  %v286_v20 = vsel %vm257_vm3, %v244_v7, -inf }
  0x62   : > { %v861_v21 = vmax.f32 %v859_v1, %v860_v14  ;;  %v867_v22 = vrot.slane %v866_v38, 1  ;;  %v878_v46 = vmax.f32 %v876_v9, %v877_v42  ;;  %v1200_v23 = vsel %vm1173_vm6, %v847_v63, %v1199_v16 }
  0x63   : > { %v873_v19 = vmax.f32 %v871_v41, %v872_v15  ;;  %v1201_v26 = vsel %vm1175_vm7, %v854_v12, %v1200_v23  ;;  %v287_v60 = vmax.f32 %v285_v18, %v286_v20  ;;  %v458_v62 = vcombine.high %v284_v10, %v284_v10 }
  0x64   : > { %v868_v27 = vmax.f32 %v866_v38, %v867_v22  ;;  %v879_v28 = vrot.slane %v878_v46, 2  ;;  %v1202_v29 = vsel %vm1177_vm8, %v861_v21, %v1201_v26  ;;  %v465_v30 = vrot.slane %v284_v10, %v4521_v17 }
  0x65   : > { %v874_v31 = vrot.slane %v873_v19, 1  ;;  %v472_v33 = vrot.slane %v458_v62, %v4521_v17  ;;  %v475_v34 = vcombine.high %v287_v60, %v287_v60  ;;  %v482_v35 = vrot.slane %v287_v60, %v4521_v17 }
  0x66   : > { %v880_v39 = vmax.f32 %v878_v46, %v879_v28  ;;  %v1203_v40 = vsel %vm1179_vm9, %v868_v27, %v1202_v29  ;;  %v473_v32 = vcombine.high %v465_v30, %v465_v30  ;;  %v883_v43 = vsel %vm658_vm4, %v465_v30, -inf }
  0x67   : > { %v875_v47 = vmax.f32 %v873_v19, %v874_v31  ;;  %v474_v48 = vcombine.high %v472_v33, %v472_v33  ;;  %v489_v49 = vrot.slane %v475_v34, %v4521_v17  ;;  %v490_v50 = vcombine.high %v482_v35, %v482_v35 }
  0x68   : > { %v881_v51 = vrot.slane %v880_v39, 1  ;;  %v884_v52 = vrot.slane %v883_v43, 4  ;;  %v890_v53 = vsel %vm658_vm4, %v473_v32, -inf  ;;  %v897_v54 = vsel %vm658_vm4, %v472_v33, -inf  ;;  %v245_v33 = vld [vmem:[%s4514_s27 + $0xa0] sm:$0xff] }
  0x69   : > { %v1204_v55 = vsel %vm1181_vm10, %v875_v47, %v1203_v40  ;;  %v491_v56 = vcombine.high %v489_v49, %v489_v49  ;;  %v891_v58 = vrot.slane %v890_v53, 4  ;;  %v898_v59 = vrot.slane %v897_v54, 4 }
  0x6a   : > { %v882_v37 = vmax.f32 %v880_v39, %v881_v51  ;;  %v885_v63 = vmax.f32 %v883_v43, %v884_v52  ;;  %v904_v0 = vsel %vm658_vm4, %v474_v48, -inf  ;;  %v911_v1 = vsel %vm658_vm4, %v482_v35, -inf }
  0x6b   : > { %v892_v2 = vmax.f32 %v890_v53, %v891_v58  ;;  %v899_v4 = vmax.f32 %v897_v54, %v898_v59  ;;  %v905_v7 = vrot.slane %v904_v0, 4  ;;  %v912_v8 = vrot.slane %v911_v1, 4 }
  0x6c   : > { %v1205_v41 = vsel %vm1183_vm11, %v882_v37, %v1204_v55  ;;  %v886_v9 = vrot.slane %v885_v63, 2  ;;  %v918_v10 = vsel %vm658_vm4, %v490_v50, -inf  ;;  %v925_v12 = vsel %vm658_vm4, %v489_v49, -inf  ;;  %v247_v49 = vld [vmem:[%s4514_s27 + $0xb0] sm:$0xff]  ;;  %v246_v37 = vld [vmem:[%s4514_s27 + $0xa8] sm:$0xff] }
  0x6d   : > { %v1239_v14 = vrot.slane %v1205_v41, 7  ;;  %v893_v38 = vrot.slane %v892_v2, 2  ;;  %v900_v42 = vrot.slane %v899_v4, 2  ;;  %v906_v15 = vmax.f32 %v904_v0, %v905_v7 }
  0x6e   : > { %v887_v16 = vmax.f32 %v885_v63, %v886_v9  ;;  %v913_v18 = vmax.f32 %v911_v1, %v912_v8  ;;  %v919_v20 = vrot.slane %v918_v10, 4  ;;  %v926_v21 = vrot.slane %v925_v12, 4  ;;  %v248_v63 = vld [vmem:[%s4514_s27 + $0xb8] sm:$0xff]  ;;  %v249_v9 = vld [vmem:[%s4514_s27 + $0xc0] sm:$0xff] }
  0x6f   : > { %v4721_v22 = vsel %vm1253_vm1, 0.0, %v1239_v14  ;;  %v4724_v46 = vsel %vm1253_vm1, %v1239_v14, 0.0  ;;  %v894_v23 = vmax.f32 %v892_v2, %v893_v38  ;;  %v901_v19 = vmax.f32 %v899_v4, %v900_v42 }
  0x70   : > { %v1302_v26 = vrot.slane %v4721_v22, 1  ;;  %v1303_v60 = vrot.slane %v4724_v46, 1  ;;  %v888_v62 = vrot.slane %v887_v16, 1  ;;  %v907_v27 = vrot.slane %v906_v15, 2 }
  0x71   : > { %v895_v28 = vrot.slane %v894_v23, 1  ;;  %v902_v29 = vrot.slane %v901_v19, 1  ;;  %v914_v30 = vrot.slane %v913_v18, 2  ;;  %v920_v31 = vmax.f32 %v918_v10, %v919_v20 }
  0x72   : > { %v4730_v34 = vsel %vm1289_vm2, %v1302_v26, %v1303_v60  ;;  %v889_v35 = vmax.f32 %v887_v16, %v888_v62  ;;  %v908_v39 = vmax.f32 %v906_v15, %v907_v27  ;;  %v927_v40 = vmax.f32 %v925_v12, %v926_v21 }
  0x73   : > { %4054 = vmatprep.mubr.msk.f32.mxu0 %vm257_vm3, %v4730_v34  ;;  %v896_v32 = vmax.f32 %v894_v23, %v895_v28  ;;  %v903_v43 = vmax.f32 %v901_v19, %v902_v29  ;;  %v915_v47 = vmax.f32 %v913_v18, %v914_v30  ;;  %v921_v48 = vrot.slane %v920_v31, 2 }
  0x74   : > { %v909_v50 = vrot.slane %v908_v39, 1  ;;  %v928_v51 = vrot.slane %v927_v40, 2  ;;  %v932_v52 = vsel %vm658_vm4, %v491_v56, -inf  ;;  %v288_v53 = vsel %vm257_vm3, %v245_v33, -inf }
  0x75   : > { %v916_v54 = vrot.slane %v915_v47, 1  ;;  %v922_v55 = vmax.f32 %v920_v31, %v921_v48  ;;  %v933_v58 = vrot.slane %v932_v52, 4  ;;  %v1206_v59 = vsel %vm1171_vm5, %v896_v32, %v889_v35 }
  0x76   : > { %v910_v0 = vmax.f32 %v908_v39, %v909_v50  ;;  %v929_v1 = vmax.f32 %v927_v40, %v928_v51  ;;  %v1207_v2 = vsel %vm1173_vm6, %v903_v43, %v1206_v59  ;;  %v289_v4 = vsel %vm257_vm3, %v247_v49, -inf }
  0x77   : > { %v917_v7 = vmax.f32 %v915_v47, %v916_v54  ;;  %v923_v8 = vrot.slane %v922_v55, 1  ;;  %v934_v41 = vmax.f32 %v932_v52, %v933_v58  ;;  %v290_v56 = vmax.f32 %v288_v53, %v289_v4 }
  0x78   : > { %v930_v10 = vrot.slane %v929_v1, 1  ;;  %v1208_v12 = vsel %vm1175_vm7, %v910_v0, %v1207_v2  ;;  %v291_v14 = vsel %vm257_vm3, %v246_v37, -inf  ;;  %v292_v38 = vsel %vm257_vm3, %v248_v63, -inf }
  0x79   : > { %v924_v42 = vmax.f32 %v922_v55, %v923_v8  ;;  %v935_v15 = vrot.slane %v934_v41, 2  ;;  %v1209_v16 = vsel %vm1177_vm8, %v917_v7, %v1208_v12  ;;  %v293_v18 = vmax.f32 %v291_v14, %v292_v38 }
  0x7a   : > { %v931_v20 = vmax.f32 %v929_v1, %v930_v10  ;;  %v492_v21 = vcombine.high %v290_v56, %v290_v56  ;;  %v499_v23 = vrot.slane %v290_v56, %v4521_v17  ;;  %v4749_v19 = vsel %vm257_vm3, %v249_v9, -inf }
  0x7b   : > { %v936_v26 = vmax.f32 %v934_v41, %v935_v15  ;;  %v1210_v60 = vsel %vm1179_vm9, %v924_v42, %v1209_v16  ;;  %v509_v62 = vcombine.high %v293_v18, %v293_v18  ;;  %v516_v27 = vrot.slane %v293_v18, %v4521_v17 }
  0x7c   : > { %v1211_v28 = vsel %vm1181_vm10, %v931_v20, %v1210_v60  ;;  %v506_v29 = vrot.slane %v492_v21, %v4521_v17  ;;  %v507_v30 = vcombine.high %v499_v23, %v499_v23  ;;  %v939_v31 = vsel %vm658_vm4, %v499_v23, -inf  ;;  %v251_v60 = vld [vmem:[%s4514_s27 + $0xd0] sm:$0xff] }
  0x7d   : > { %v937_v33 = vrot.slane %v936_v26, 1  ;;  %v523_v35 = vrot.slane %v509_v62, %v4521_v17  ;;  %v524_v39 = vcombine.high %v516_v27, %v516_v27  ;;  %v940_v40 = vrot.slane %v939_v31, 4 }
  0x7e   : > { %v508_v32 = vcombine.high %v506_v29, %v506_v29  ;;  %v946_v43 = vsel %vm658_vm4, %v507_v30, -inf  ;;  %v953_v47 = vsel %vm658_vm4, %v506_v29, -inf  ;;  %v967_v48 = vsel %vm658_vm4, %v516_v27, -inf }
  0x7f   : > { %v938_v49 = vmax.f32 %v936_v26, %v937_v33  ;;  %v525_v50 = vcombine.high %v523_v35, %v523_v35  ;;  %v941_v51 = vmax.f32 %v939_v31, %v940_v40  ;;  %v947_v52 = vrot.slane %v946_v43, 4 }
  0x80   : > { %v954_v53 = vrot.slane %v953_v47, 4  ;;  %v960_v54 = vsel %vm658_vm4, %v508_v32, -inf  ;;  %v968_v55 = vrot.slane %v967_v48, 4  ;;  %v974_v58 = vsel %vm658_vm4, %v524_v39, -inf }
  0x81   : > { %v1212_v59 = vsel %vm1183_vm11, %v938_v49, %v1211_v28  ;;  %v942_v37 = vrot.slane %v941_v51, 2  ;;  %v948_v63 = vmax.f32 %v946_v43, %v947_v52  ;;  %v961_v0 = vrot.slane %v960_v54, 4  ;;  %v250_v43 = vld [vmem:[%s4514_s27 + $0xc8] sm:$0xff] }
  0x82   : > { %v1240_v1 = vrot.slane %v1212_v59, 7  ;;  %v955_v2 = vmax.f32 %v953_v47, %v954_v53  ;;  %v969_v4 = vmax.f32 %v967_v48, %v968_v55  ;;  %v975_v7 = vrot.slane %v974_v58, 4  ;;  %v252_v53 = vld [vmem:[%s4514_s27 + $0xd8] sm:$0xff] }
  0x83   : > { %v943_v8 = vmax.f32 %v941_v51, %v942_v37  ;;  %v949_v41 = vrot.slane %v948_v63, 2  ;;  %v962_v56 = vmax.f32 %v960_v54, %v961_v0  ;;  %v981_v9 = vsel %vm658_vm4, %v523_v35, -inf }
  0x84   : > { %v4765_v10 = vsel %vm1253_vm1, 0.0, %v1240_v1  ;;  %v4768_v12 = vsel %vm1253_vm1, %v1240_v1, 0.0  ;;  %v956_v14 = vrot.slane %v955_v2, 2  ;;  %v970_v38 = vrot.slane %v969_v4, 2 }
  0x85   : > { %v1305_v42 = vrot.slane %v4765_v10, 1  ;;  %v1306_v15 = vrot.slane %v4768_v12, 1  ;;  %v944_v16 = vrot.slane %v943_v8, 1  ;;  %v950_v18 = vmax.f32 %v948_v63, %v949_v41 }
  0x86   : > { %v957_v20 = vmax.f32 %v955_v2, %v956_v14  ;;  %v963_v21 = vrot.slane %v962_v56, 2  ;;  %v971_v23 = vmax.f32 %v969_v4, %v970_v38  ;;  %v976_v26 = vmax.f32 %v974_v58, %v975_v7 }
  0x87   : > { %v4774_v62 = vsel %vm1289_vm2, %v1305_v42, %v1306_v15  ;;  %v945_v27 = vmax.f32 %v943_v8, %v944_v16  ;;  %v951_v28 = vrot.slane %v950_v18, 1  ;;  %v982_v29 = vrot.slane %v981_v9, 4 }
  0x88   : > { %4055 = vmatmul.mubr.msk.f32.gmra.mrb[4].mxu0 %vm257_vm3, %v4774_v62  ;;  %v958_v30 = vrot.slane %v957_v20, 1  ;;  %v964_v31 = vmax.f32 %v962_v56, %v963_v21  ;;  %v972_v33 = vrot.slane %v971_v23, 1  ;;  %v977_v35 = vrot.slane %v976_v26, 2 }
  0x89   : > { %v952_v39 = vmax.f32 %v950_v18, %v951_v28  ;;  %v983_v40 = vmax.f32 %v981_v9, %v982_v29  ;;  %v988_v32 = vsel %vm658_vm4, %v525_v50, -inf  ;;  %v295_v47 = vsel %vm257_vm3, %v251_v60, -inf }
  0x8a   : > { %v959_v48 = vmax.f32 %v957_v20, %v958_v30  ;;  %v965_v49 = vrot.slane %v964_v31, 1  ;;  %v973_v51 = vmax.f32 %v971_v23, %v972_v33  ;;  %v978_v52 = vmax.f32 %v976_v26, %v977_v35 }
  0x8b   : > { %v984_v54 = vrot.slane %v983_v40, 2  ;;  %v989_v55 = vrot.slane %v988_v32, 4  ;;  %v1213_v58 = vsel %vm1171_vm5, %v952_v39, %v945_v27  ;;  %v296_v59 = vmax.f32 %v4749_v19, %v295_v47 }
  0x8c   : > { %v966_v37 = vmax.f32 %v964_v31, %v965_v49  ;;  %v979_v63 = vrot.slane %v978_v52, 1  ;;  %v1214_v0 = vsel %vm1173_vm6, %v959_v48, %v1213_v58  ;;  %v297_v50 = vsel %vm257_vm3, %v250_v43, -inf }
  0x8d   : > { %v985_v1 = vmax.f32 %v983_v40, %v984_v54  ;;  %v990_v2 = vmax.f32 %v988_v32, %v989_v55  ;;  %v298_v4 = vsel %vm257_vm3, %v252_v53, -inf  ;;  %v526_v7 = vcombine.high %v296_v59, %v296_v59 }
  0x8e   : > { %v980_v8 = vmax.f32 %v978_v52, %v979_v63  ;;  %v1215_v41 = vsel %vm1175_vm7, %v966_v37, %v1214_v0  ;;  %v299_v56 = vmax.f32 %v297_v50, %v298_v4  ;;  %v533_v9 = vrot.slane %v296_v59, %v4521_v17 }
  0x8f   : > { %v986_v14 = vrot.slane %v985_v1, 1  ;;  %v991_v38 = vrot.slane %v990_v2, 2  ;;  %v1216_v19 = vsel %vm1177_vm8, %v973_v51, %v1215_v41  ;;  %v540_v42 = vrot.slane %v526_v7, %v4521_v17 }
  0x90   : > { %v1217_v15 = vsel %vm1179_vm9, %v980_v8, %v1216_v19  ;;  %v541_v16 = vcombine.high %v533_v9, %v533_v9  ;;  %v543_v18 = vcombine.high %v299_v56, %v299_v56  ;;  %v550_v20 = vrot.slane %v299_v56, %v4521_v17 }
  0x91   : > { %v987_v21 = vmax.f32 %v985_v1, %v986_v14  ;;  %v992_v23 = vmax.f32 %v990_v2, %v991_v38  ;;  %v542_v26 = vcombine.high %v540_v42, %v540_v42  ;;  %v995_v60 = vsel %vm658_vm4, %v533_v9, -inf }
  0x92   : > { %v557_v27 = vrot.slane %v543_v18, %v4521_v17  ;;  %v558_v28 = vcombine.high %v550_v20, %v550_v20  ;;  %v996_v29 = vrot.slane %v995_v60, 4  ;;  %v1002_v30 = vsel %vm658_vm4, %v541_v16, -inf }
  0x93   : > { %v993_v31 = vrot.slane %v992_v23, 1  ;;  %v1218_v33 = vsel %vm1181_vm10, %v987_v21, %v1217_v15  ;;  %v1003_v35 = vrot.slane %v1002_v30, 4  ;;  %v1009_v39 = vsel %vm658_vm4, %v540_v42, -inf }
  0x94   : > { %v559_v40 = vcombine.high %v557_v27, %v557_v27  ;;  %v997_v32 = vmax.f32 %v995_v60, %v996_v29  ;;  %v1010_v43 = vrot.slane %v1009_v39, 4  ;;  %v1016_v47 = vsel %vm658_vm4, %v542_v26, -inf }
  0x95   : > { %v994_v48 = vmax.f32 %v992_v23, %v993_v31  ;;  %v1004_v49 = vmax.f32 %v1002_v30, %v1003_v35  ;;  %v1017_v51 = vrot.slane %v1016_v47, 4  ;;  %v1023_v52 = vsel %vm658_vm4, %v550_v20, -inf }
  0x96   : > { %v998_v53 = vrot.slane %v997_v32, 2  ;;  %v1011_v54 = vmax.f32 %v1009_v39, %v1010_v43  ;;  %v1024_v55 = vrot.slane %v1023_v52, 4  ;;  %v1030_v58 = vsel %vm658_vm4, %v558_v28, -inf }
  0x97   : > { %v1219_v59 = vsel %vm1183_vm11, %v994_v48, %v1218_v33  ;;  %v1005_v37 = vrot.slane %v1004_v49, 2  ;;  %v1018_v63 = vmax.f32 %v1016_v47, %v1017_v51  ;;  %v1031_v0 = vrot.slane %v1030_v58, 4 }
  0x98   : > { %v1241_v50 = vrot.slane %v1219_v59, 7  ;;  %v999_v1 = vmax.f32 %v997_v32, %v998_v53  ;;  %v1012_v2 = vrot.slane %v1011_v54, 2  ;;  %v1025_v4 = vmax.f32 %v1023_v52, %v1024_v55 }
  0x99   : > { %v1006_v7 = vmax.f32 %v1004_v49, %v1005_v37  ;;  %v1019_v8 = vrot.slane %v1018_v63, 2  ;;  %v1032_v41 = vmax.f32 %v1030_v58, %v1031_v0  ;;  %v1037_v56 = vsel %vm658_vm4, %v557_v27, -inf }
  0x9a   : > { %v4804_v9 = vsel %vm1253_vm1, 0.0, %v1241_v50  ;;  %v4807_v14 = vsel %vm1253_vm1, %v1241_v50, 0.0  ;;  %v1000_v38 = vrot.slane %v999_v1, 1  ;;  %v1013_v19 = vmax.f32 %v1011_v54, %v1012_v2  ;;  %v253_v50 = vld [vmem:[%s4514_s27 + $0xe0] sm:$0xff]  ;;  %v255_v2 = vld [vmem:[%s4514_s27 + $0xf0] sm:$0xff] }
  0x9b   : > { %v1308_v42 = vrot.slane %v4804_v9, 1  ;;  %v1309_v15 = vrot.slane %v4807_v14, 1  ;;  %v1007_v16 = vrot.slane %v1006_v7, 1  ;;  %v1020_v18 = vmax.f32 %v1018_v63, %v1019_v8  ;;  %v254_v8 = vld [vmem:[%s4514_s27 + $0xe8] sm:$0xff] }
  0x9c   : > { %v1001_v20 = vmax.f32 %v999_v1, %v1000_v38  ;;  %v1014_v21 = vrot.slane %v1013_v19, 1  ;;  %v1026_v23 = vrot.slane %v1025_v4, 2  ;;  %v1033_v26 = vrot.slane %v1032_v41, 2 }
  0x9d   : > { %v4812_v60 = vsel %vm1289_vm2, %v1308_v42, %v1309_v15  ;;  %v1008_v27 = vmax.f32 %v1006_v7, %v1007_v16  ;;  %v1021_v28 = vrot.slane %v1020_v18, 1  ;;  %v1038_v29 = vrot.slane %v1037_v56, 4 }
  0x9e   : > { %4057 = vmatprep.mubr.msk.f32.mxu0 %vm257_vm3, %v4812_v60  ;;  %v1015_v30 = vmax.f32 %v1013_v19, %v1014_v21  ;;  %v1027_v31 = vmax.f32 %v1025_v4, %v1026_v23  ;;  %v1034_v33 = vmax.f32 %v1032_v41, %v1033_v26  ;;  %v1044_v35 = vsel %vm658_vm4, %v559_v40, -inf  ;;  %v256_v41 = vld [vmem:[%s4514_s27 + $0xf8] sm:$0xff] }
  0x9f   : > { %v1022_v39 = vmax.f32 %v1020_v18, %v1021_v28  ;;  %v1039_v32 = vmax.f32 %v1037_v56, %v1038_v29  ;;  %v1045_v43 = vrot.slane %v1044_v35, 4  ;;  %v1220_v47 = vsel %vm1171_vm5, %v1008_v27, %v1001_v20 }
  0xa0   : > { %v1028_v48 = vrot.slane %v1027_v31, 1  ;;  %v1035_v49 = vrot.slane %v1034_v33, 1  ;;  %v1221_v51 = vsel %vm1173_vm6, %v1015_v30, %v1220_v47  ;;  %v300_v56 = vsel %vm257_vm3, %v253_v50, -inf }
  0xa1   : > { %v1040_v52 = vrot.slane %v1039_v32, 2  ;;  %v1046_v53 = vmax.f32 %v1044_v35, %v1045_v43  ;;  %v1222_v54 = vsel %vm1175_vm7, %v1022_v39, %v1221_v51  ;;  %v301_v42 = vsel %vm257_vm3, %v255_v2, -inf }
  0xa2   : > { %v1029_v55 = vmax.f32 %v1027_v31, %v1028_v48  ;;  %v1036_v58 = vmax.f32 %v1034_v33, %v1035_v49  ;;  %v302_v15 = vmax.f32 %v300_v56, %v301_v42  ;;  %v303_v16 = vsel %vm257_vm3, %v254_v8, -inf }
  0xa3   : > { %v1041_v40 = vmax.f32 %v1039_v32, %v1040_v52  ;;  %v1047_v59 = vrot.slane %v1046_v53, 2  ;;  %v304_v18 = vsel %vm257_vm3, %v256_v41, -inf }
  0xa4   : > { %v1223_v37 = vsel %vm1177_vm8, %v1029_v55, %v1222_v54  ;;  %v305_v21 = vmax.f32 %v303_v16, %v304_v18  ;;  %v560_v26 = vcombine.high %v302_v15, %v302_v15  ;;  %v567_v27 = vrot.slane %v302_v15, %v4521_v17 }
  0xa5   : > { %v1042_v63 = vrot.slane %v1041_v40, 1  ;;  %v1048_v0 = vmax.f32 %v1046_v53, %v1047_v59  ;;  %v1224_v1 = vsel %vm1179_vm9, %v1036_v58, %v1223_v37 }
  0xa6   : > { %v574_v30 = vrot.slane %v560_v26, %v4521_v17  ;;  %v575_v31 = vcombine.high %v567_v27, %v567_v27  ;;  %v584_v39 = vrot.slane %v305_v21, %v4521_v17  ;;  %v1051_v43 = vsel %vm658_vm4, %v567_v27, -inf }
  0xa7   : > { %v1043_v4 = vmax.f32 %v1041_v40, %v1042_v63  ;;  %v1049_v7 = vrot.slane %v1048_v0, 1  ;;  %v577_v48 = vcombine.high %v305_v21, %v305_v21  ;;  %v1052_v49 = vrot.slane %v1051_v43, 4 }
  0xa8   : > { %v576_v32 = vcombine.high %v574_v30, %v574_v30  ;;  %v1058_v51 = vsel %vm658_vm4, %v575_v31, -inf  ;;  %v1065_v53 = vsel %vm658_vm4, %v574_v30, -inf  ;;  %v592_v55 = vcombine.high %v584_v39, %v584_v39 }
  0xa9   : > { %v1050_v38 = vmax.f32 %v1048_v0, %v1049_v7  ;;  %v1225_v19 = vsel %vm1181_vm10, %v1043_v4, %v1224_v1  ;;  %v1059_v52 = vrot.slane %v1058_v51, 4  ;;  %v1053_v58 = vmax.f32 %v1051_v43, %v1052_v49  ;;  %v4858_v0 = vld [vmem:[%s5362_s1 + $0xc] sm:$0xf]  ;;  %v4436_v7 = vld [vmem:[%s5362_s1 + $0x8] sm:$0xf] }
  0xaa   : > { %v1072_v54 = vsel %vm658_vm4, %v576_v32, -inf  ;;  %v1066_v40 = vrot.slane %v1065_v53, 4  ;;  %v1079_v63 = vsel %vm658_vm4, %v584_v39, -inf  ;;  %v591_v50 = vrot.slane %v577_v48, %v4521_v17 }
  0xab   : > { %v1226_v20 = vsel %vm1183_vm11, %v1050_v38, %v1225_v19  ;;  %v1060_v59 = vmax.f32 %v1058_v51, %v1059_v52  ;;  %v1073_v37 = vrot.slane %v1072_v54, 4  ;;  %v1054_v2 = vrot.slane %v1053_v58, 2 }
  0xac   : > { %v1242_v23 = vrot.slane %v1226_v20, 7  ;;  %v1067_v1 = vmax.f32 %v1065_v53, %v1066_v40  ;;  %v1080_v8 = vrot.slane %v1079_v63, 4  ;;  %v1086_v41 = vsel %vm658_vm4, %v592_v55, -inf }
  0xad   : > { %v1061_v4 = vrot.slane %v1060_v59, 2  ;;  %v1074_v17 = vmax.f32 %v1072_v54, %v1073_v37  ;;  %v593_v56 = vcombine.high %v591_v50, %v591_v50  ;;  %v1055_v19 = vmax.f32 %v1053_v58, %v1054_v2 }
  0xae   : > { %v4834_v28 = vsel %vm1253_vm1, 0.0, %v1242_v23  ;;  %v4837_v29 = vsel %vm1253_vm1, %v1242_v23, 0.0  ;;  %v1068_v38 = vrot.slane %v1067_v1, 2  ;;  %v1087_v15 = vrot.slane %v1086_v41, 4 }
  0xaf   : > { %v1311_v33 = vrot.slane %v4834_v28, 1  ;;  %v1312_v35 = vrot.slane %v4837_v29, 1  ;;  %v1062_v42 = vmax.f32 %v1060_v59, %v1061_v4  ;;  %v1093_v16 = vsel %vm658_vm4, %v591_v50, -inf }
  0xb0   : > { %v1081_v18 = vmax.f32 %v1079_v63, %v1080_v8  ;;  %v1569_v20 = vrot.slane %v4594_v25, 2  ;;  %v1565_v21 = vrot.slane %v4496_v5, 2  ;;  %v1566_v23 = vrot.slane %v4499_v6, 2 }
  0xb1   : > { %v4845_v47 = vsel %vm1289_vm2, %v1311_v33, %v1312_v35  ;;  %v1075_v26 = vrot.slane %v1074_v17, 2  ;;  %v1069_v27 = vmax.f32 %v1067_v1, %v1068_v38  ;;  %v1094_v30 = vrot.slane %v1093_v16, 4 }
  0xb2   : > { %4058 = vmatmul.mubr.msk.f32.gmra.mrb[6].mxu0 %vm257_vm3, %v4845_v47  ;;  %v1100_v31 = vsel %vm658_vm4, %v593_v56, -inf  ;;  %v1568_v33 = vrot.slane %v4591_v24, 2  ;;  %v1056_v35 = vrot.slane %v1055_v19, 1  ;;  %v1063_v39 = vrot.slane %v1062_v42, 1 }
  0xb3   : > { %4062 = vmatprep.mubr.msk.f32.mxu0 %vm257_vm3, %v4496_v5  ;;  %v1088_v32 = vmax.f32 %v1086_v41, %v1087_v15  ;;  %v1571_v25 = vrot.slane %v4635_v3, 2  ;;  %v1572_v6 = vrot.slane %v4638_v61, 2  ;;  %v1082_v43 = vrot.slane %v1081_v18, 2 }
  0xb4   : > { %v4889_v48 = vsel %vm1564_vm12, %v1565_v21, %v1566_v23  ;;  %v1076_v49 = vmax.f32 %v1074_v17, %v1075_v26  ;;  %v1101_v51 = vrot.slane %v1100_v31, 4  ;;  %v1070_v52 = vrot.slane %v1069_v27, 1 }
  0xb5   : > { %v1095_v53 = vmax.f32 %v1093_v16, %v1094_v30  ;;  %v4894_v54 = vsel %vm1564_vm12, %v1568_v33, %v1569_v20  ;;  %v1057_v55 = vmax.f32 %v1055_v19, %v1056_v35  ;;  %v1064_v58 = vmax.f32 %v1062_v42, %v1063_v39 }
  0xb6   : > { %4063 = vmatmul.mubr.msk.f32.vlgmr.msra.gmra.mrb[0].mxu0 %vm257_vm3, %v4591_v24  ;;  %v1089_v40 = vrot.slane %v1088_v32, 2  ;;  %v4899_v61 = vsel %vm1564_vm12, %v1571_v25, %v1572_v6  ;;  %v1574_v59 = vrot.slane %v4683_v44, 2  ;;  %v1575_v37 = vrot.slane %v4686_v45, 2 }
  0xb7   : > { %4075 = vmatpush3.msk.msra.mxu0 %vm1331_vm0, %v4436_v7  ;;  %4065 = vmatprep.mubr.msk.f32.mxu0 %vm257_vm3, %v4635_v3  ;;  %v1083_v63 = vmax.f32 %v1081_v18, %v1082_v43  ;;  %v1577_v50 = vrot.slane %v4721_v22, 2  ;;  %v1578_v1 = vrot.slane %v4724_v46, 2  ;;  %v1077_v2 = vrot.slane %v1076_v49, 1  ;;  %v1846_v7 = vld [vmem:[%s5362_s1 + $0x10] sm:$0xf] }
  0xb8   : > { %4088 = vmatprep.subr.msk.mxu0 %vm1331_vm0, %v4858_v0  ;;  %v1102_v4 = vmax.f32 %v1100_v31, %v1101_v51  ;;  %v1071_v8 = vmax.f32 %v1069_v27, %v1070_v52  ;;  %v1096_v41 = vrot.slane %v1095_v53, 2  ;;  %v1580_v17 = vrot.slane %v4765_v10, 2  ;;  %v1968_v52 = vld [vmem:[%s5362_s1 + $0x14] sm:$0xf] }
  0xb9   : > { %v1090_v56 = vmax.f32 %v1088_v32, %v1089_v40  ;;  %v1227_v45 = vsel %vm1171_vm5, %v1064_v58, %v1057_v55  ;;  %v4917_v46 = vsel %vm1564_vm12, %v1574_v59, %v1575_v37  ;;  %v1581_v38 = vrot.slane %v4768_v12, 2  ;;  %v2087_v58 = vld [vmem:[%s5362_s1 + $0x18] sm:$0xf] }
  0xba   : > { %4066 = vmatmul.mubr.msk.f32.gmra.mrb[2].mxu0 %vm257_vm3, %v4683_v44  ;;  %v1583_v19 = vrot.slane %v4804_v9, 2  ;;  %v1084_v42 = vrot.slane %v1083_v63, 1  ;;  %v4922_v15 = vsel %vm1564_vm12, %v1577_v50, %v1578_v1  ;;  %v1584_v16 = vrot.slane %v4807_v14, 2 }
  0xbb   : > { %4068 = vmatprep.mubr.msk.f32.mxu0 %vm257_vm3, %v4721_v22  ;;  %v1078_v18 = vmax.f32 %v1076_v49, %v1077_v2  ;;  %v1097_v20 = vmax.f32 %v1095_v53, %v1096_v41  ;;  %v1228_v21 = vsel %vm1173_vm6, %v1071_v8, %v1227_v45  ;;  %v1091_v23 = vrot.slane %v1090_v56, 1  ;;  %v2321_v2 = vld [vmem:[%s5362_s1 + $0x20] sm:$0xf] }
  0xbc   : > { %v4932_v12 = vsel %vm1564_vm12, %v1580_v17, %v1581_v38  ;;  %v1586_v26 = vrot.slane %v4834_v28, 2  ;;  %v1587_v14 = vrot.slane %v4837_v29, 2  ;;  %v1085_v27 = vmax.f32 %v1083_v63, %v1084_v42  ;;  %v2204_v63 = vld [vmem:[%s5362_s1 + $0x1c] sm:$0xf] }
  0xbd   : > { %v4937_v30 = vsel %vm1564_vm12, %v1583_v19, %v1584_v16  ;;  %v1229_v33 = vsel %vm1175_vm7, %v1078_v18, %v1228_v21  ;;  %v1098_v35 = vrot.slane %v1097_v20, 1  ;;  %v1092_v39 = vmax.f32 %v1090_v56, %v1091_v23  ;;  %v2802_v21 = vld [vmem:[%s5364_s3 + $0x10] sm:$0xff] }
  0xbe   : > { %4069 = vmatmul.mubr.msk.f32.gmra.mrb[4].mxu0 %vm257_vm3, %v4765_v10  ;;  %v4945_v32 = vsel %vm1564_vm12, %v1586_v26, %v1587_v14  ;;  %v1230_v29 = vsel %vm1177_vm8, %v1085_v27, %v1229_v33 }
  0xbf   : > { %4071 = vmatprep.mubr.msk.f32.mxu0 %vm257_vm3, %v4804_v9  ;;  %v1099_v6 = vmax.f32 %v1097_v20, %v1098_v35  ;;  %v1231_v43 = vsel %vm1179_vm9, %v1092_v39, %v1230_v29 }
  0xc1   : > { %v1232_v51 = vsel %vm1181_vm10, %v1099_v6, %v1231_v43 }
  0xc2   : > { %4072 = vmatmul.mubr.msk.f32.gmra.mrb[6].mxu0 %vm257_vm3, %v4834_v28 }
  0xc3   : > { %4076 = vmatprep.mubr.msk.f32.mxu0 %vm257_vm3, %v4889_v48 }
  0xc6   : > { %4077 = vmatmul.mubr.msk.f32.vlgmr.msra.gmra.mrb[0].mxu0 %vm257_vm3, %v4894_v54 }
  0xc7   : > { %4089 = vmatpush3.msk.msra.mxu0 %vm1331_vm0, %v4858_v0  ;;  %4079 = vmatprep.mubr.msk.f32.mxu0 %vm257_vm3, %v4899_v61  ;;  %v1103_v0 = vrot.slane %v1102_v4, 2 }
  0xc8   : > { %4102 = vmatprep.subr.msk.mxu0 %vm1331_vm0, %v1846_v7 }
  0xc9   : > { %v1104_v31 = vmax.f32 %v1102_v4, %v1103_v0 }
  0xca   : > { %4080 = vmatmul.mubr.msk.f32.gmra.mrb[2].mxu0 %vm257_vm3, %v4917_v46 }
  0xcb   : > { %4082 = vmatprep.mubr.msk.f32.mxu0 %vm257_vm3, %v4922_v15  ;;  %v1105_v25 = vrot.slane %v1104_v31, 1 }
  0xcd   : > { %v1106_v49 = vmax.f32 %v1104_v31, %v1105_v25 }
  0xce   : > { %4083 = vmatmul.mubr.msk.f32.gmra.mrb[4].mxu0 %vm257_vm3, %v4932_v12 }
  0xcf   : > { %4085 = vmatprep.mubr.msk.f32.mxu0 %vm257_vm3, %v4937_v30  ;;  %v1233_v53 = vsel %vm1183_vm11, %v1106_v49, %v1232_v51 }
  0xd2   : > { %4086 = vmatmul.mubr.msk.f32.gmra.mrb[6].mxu0 %vm257_vm3, %v4945_v32 }
  0xd3   : > { %4090 = vmatprep.mubr.msk.f32.mxu0 %vm257_vm3, %v4591_v24  ;;  %v1243_v24 = vrot.slane %v1233_v53, 7 }
  0xd5   : > { %v1262_v55 = vsel %vm1253_vm1, 0.0, %v1243_v24  ;;  %v1271_v40 = vsel %vm1253_vm1, %v1243_v24, 0.0 }
  0xd6   : > { %4091 = vmatmul.mubr.msk.f32.vlgmr.msra.gmra.mrb[0].mxu0 %vm257_vm3, %v4635_v3  ;;  %v1844_v59 = vrot.slane %v1271_v40, 1  ;;  %v1965_v50 = vrot.slane %v1262_v55, 2 }
  0xd7   : > { %4103 = vmatpush3.msk.msra.mxu0 %vm1331_vm0, %v1846_v7  ;;  %4093 = vmatprep.mubr.msk.f32.mxu0 %vm257_vm3, %v4683_v44 }
  0xd8   : > { %4116 = vmatprep.subr.msk.mxu0 %vm1331_vm0, %v1968_v52 }
  0xda   : > { %4094 = vmatmul.mubr.msk.f32.gmra.mrb[2].mxu0 %vm257_vm3, %v4721_v22 }
  0xdb   : > { %4096 = vmatprep.mubr.msk.f32.mxu0 %vm257_vm3, %v4765_v10 }
  0xde   : > { %4097 = vmatmul.mubr.msk.f32.gmra.mrb[4].mxu0 %vm257_vm3, %v4804_v9 }
  0xdf   : > { %4099 = vmatprep.mubr.msk.f32.mxu0 %vm257_vm3, %v4834_v28 }
  0xe2   : > { %4100 = vmatmul.mubr.msk.f32.gmra.mrb[6].mxu0 %vm257_vm3, %v1262_v55 }
  0xe3   : > { %4104 = vmatprep.mubr.msk.f32.mxu0 %vm257_vm3, %v4599_v36  ;;  %v1843_v36 = vrot.slane %v1262_v55, 1 }
  0xe5   : > { %v1845_v37 = vsel %vm1289_vm2, %v1843_v36, %v1844_v59 }
  0xe6   : > { %4105 = vmatmul.mubr.msk.f32.vlgmr.msra.gmra.mrb[0].mxu0 %vm257_vm3, %v4644_v11 }
  0xe7   : > { %4117 = vmatpush3.msk.msra.mxu0 %vm1331_vm0, %v1968_v52  ;;  %4107 = vmatprep.mubr.msk.f32.mxu0 %vm257_vm3, %v4691_v57 }
  0xe8   : > { %4130 = vmatprep.subr.msk.mxu0 %vm1331_vm0, %v2087_v58 }
  0xea   : > { %4108 = vmatmul.mubr.msk.f32.gmra.mrb[2].mxu0 %vm257_vm3, %v4730_v34 }
  0xeb   : > { %4110 = vmatprep.mubr.msk.f32.mxu0 %vm257_vm3, %v4774_v62 }
  0xee   : > { %4111 = vmatmul.mubr.msk.f32.gmra.mrb[4].mxu0 %vm257_vm3, %v4812_v60 }
  0xef   : > { %4113 = vmatprep.mubr.msk.f32.mxu0 %vm257_vm3, %v4845_v47 }
  0xf2   : > { %4114 = vmatmul.mubr.msk.f32.gmra.mrb[6].mxu0 %vm257_vm3, %v1845_v37 }
  0xf3   : > { %4118 = vmatprep.mubr.msk.f32.mxu0 %vm257_vm3, %v4894_v54  ;;  %v1966_v54 = vrot.slane %v1271_v40, 2 }
  0xf5   : > { %v1967_v1 = vsel %vm1564_vm12, %v1965_v50, %v1966_v54 }
  0xf6   : > { %4119 = vmatmul.mubr.msk.f32.vlgmr.msra.gmra.mrb[0].mxu0 %vm257_vm3, %v4899_v61 }
  0xf7   : > { %4131 = vmatpush3.msk.msra.mxu0 %vm1331_vm0, %v2087_v58  ;;  %4121 = vmatprep.mubr.msk.f32.mxu0 %vm257_vm3, %v4917_v46 }
  0xf8   : > { %4144 = vmatprep.subr.msk.mxu0 %vm1331_vm0, %v2204_v63 }
  0xfa   : > { %4122 = vmatmul.mubr.msk.f32.gmra.mrb[2].mxu0 %vm257_vm3, %v4922_v15 }
  0xfb   : > { %4124 = vmatprep.mubr.msk.f32.mxu0 %vm257_vm3, %v4932_v12 }
  0xfe   : > { %4125 = vmatmul.mubr.msk.f32.gmra.mrb[4].mxu0 %vm257_vm3, %v4937_v30 }
  0xff   : > { %4127 = vmatprep.mubr.msk.f32.mxu0 %vm257_vm3, %v4945_v32 }
 0x102   : > { %4128 = vmatmul.mubr.msk.f32.gmra.mrb[6].mxu0 %vm257_vm3, %v1967_v1 }
 0x103   : > { %4132 = vmatprep.mubr.msk.f32.mxu0 %vm257_vm3, %v4635_v3  ;;  %v2537_v3 = vld [vmem:[%s5364_s3 + $0x8] sm:$0xff] }
 0x104   : > { %4172 = vmatprep.subr.mxu1 %v2537_v3 }
 0x105   : > { %4173 = vmatpush3.msra.mxu1 %v2537_v3 }
 0x106   : > { %4133 = vmatmul.mubr.msk.f32.vlgmr.msra.gmra.mrb[0].mxu0 %vm257_vm3, %v4683_v44  ;;  %v3806_v44 = vld [vmem:[%s5363_s2] ss:$0 sm:$0xff] }
 0x107   : > { %4145 = vmatpush3.msk.msra.mxu0 %vm1331_vm0, %v2204_v63  ;;  %4135 = vmatprep.mubr.msk.f32.mxu0 %vm257_vm3, %v4721_v22 }
 0x108   : > { %4158 = vmatprep.subr.msk.mxu0 %vm1331_vm0, %v2321_v2 }
 0x10a   : > { %4136 = vmatmul.mubr.msk.f32.gmra.mrb[2].mxu0 %vm257_vm3, %v4765_v10 }
 0x10b   : > { %4138 = vmatprep.mubr.msk.f32.mxu0 %vm257_vm3, %v4804_v9 }
 0x10e   : > { %4139 = vmatmul.mubr.msk.f32.gmra.mrb[4].mxu0 %vm257_vm3, %v4834_v28 }
 0x10f   : > { %4141 = vmatprep.mubr.msk.f32.mxu0 %vm257_vm3, %v1262_v55 }
 0x112   : > { %4142 = vmatmul.mubr.msk.f32.gmra.mrb[6].mxu0 %vm257_vm3, %v4496_v5 }
 0x113   : > { %4146 = vmatprep.mubr.msk.f32.mxu0 %vm257_vm3, %v4644_v11  ;;  %v2501_v11 = vld [vmem:[%s5364_s3] sm:$0xff] }
 0x114   : > { %4186 = vmatprep.subr.mxu1 %v2501_v11 }
 0x116   : > { %4147 = vmatmul.mubr.msk.f32.vlgmr.msra.gmra.mrb[0].mxu0 %vm257_vm3, %v4691_v57 }
 0x117   : > { %4159 = vmatpush3.msk.msra.mxu0 %vm1331_vm0, %v2321_v2  ;;  %4149 = vmatprep.mubr.msk.f32.mxu0 %vm257_vm3, %v4730_v34 }
 0x11a   : > { %4150 = vmatmul.mubr.msk.f32.gmra.mrb[2].mxu0 %vm257_vm3, %v4774_v62 }
 0x11b   : > { %4152 = vmatprep.mubr.msk.f32.mxu0 %vm257_vm3, %v4812_v60 }
 0x11e   : > { %4153 = vmatmul.mubr.msk.f32.gmra.mrb[4].mxu0 %vm257_vm3, %v4845_v47 }
 0x11f   : > { %4155 = vmatprep.mubr.msk.f32.mxu0 %vm257_vm3, %v1845_v37 }
 0x122   : > { %4156 = vmatmul.mubr.msk.f32.gmra.mrb[6].mxu0 %vm257_vm3, %v4509_v13 }
 0x123   : > { %4160 = vmatprep.mubr.msk.f32.mxu0 %vm257_vm3, %v4899_v61 }
 0x126   : > { %4161 = vmatmul.mubr.msk.f32.vlgmr.msra.gmra.mrb[0].mxu0 %vm257_vm3, %v4917_v46 }
 0x127   : > { %4163 = vmatprep.mubr.msk.f32.mxu0 %vm257_vm3, %v4922_v15 }
 0x12a   : > { %4164 = vmatmul.mubr.msk.f32.gmra.mrb[2].mxu0 %vm257_vm3, %v4932_v12 }
 0x12b   : > { %4166 = vmatprep.mubr.msk.f32.mxu0 %vm257_vm3, %v4937_v30 }
 0x12e   : > { %4167 = vmatmul.mubr.msk.f32.gmra.mrb[4].mxu0 %vm257_vm3, %v4945_v32 }
 0x12f   : > { %4169 = vmatprep.mubr.msk.f32.mxu0 %vm257_vm3, %v1967_v1 }
 0x132   : > { %4170 = vmatmul.mubr.msk.f32.gmra.mrb[6].mxu0 %vm257_vm3, %v4889_v48 }
 0x1f9   : > { %v4162_v57 = vpop.f32.mrb[0].mxu0 }
 0x1fa   : > { %v2446_v22 = vadd.f32 %v4162_v57, %v3806_v44  ;;  %v2391_v34 = vpop.f32.mrb[1].mxu0 }
 0x1fb   : > { %v2445_v10 = vadd.f32 %v3806_v44, %v2391_v34 }
 0x1fc   : > { %v2454_v62 = vmax.f32 %v2446_v22, 0.0 }
 0x1fd   : > { %v2453_v9 = vmax.f32 %v2445_v10, 0.0  ;;  %v4165_v60 = vpop.f32.mrb[2].mxu0 }
 0x1fe   : > { %v2470_v28 = vrot.slane %v2454_v62, 7  ;;  %v2448_v47 = vadd.f32 %v4165_v60, %v3806_v44  ;;  %v2401_v61 = vpop.f32.mrb[3].mxu0 }
 0x1ff   : > { %v2469_v4 = vrot.slane %v2453_v9, 7  ;;  %v2447_v7 = vadd.f32 %v3806_v44, %v2401_v61  ;;  %v2932_v9 = vld [vmem:[%s5364_s3 + $0x18] sm:$0xff] }
 0x200   : > { %v2456_v8 = vmax.f32 %v2448_v47, 0.0  ;;  %v5086_v45 = vsel %vm1253_vm1, 0.0, %v2470_v28  ;;  %v5089_v46 = vsel %vm1253_vm1, %v2470_v28, 0.0 }
 0x201   : > { %v5080_v41 = vsel %vm1253_vm1, 0.0, %v2469_v4  ;;  %v5083_v17 = vsel %vm1253_vm1, %v2469_v4, 0.0  ;;  %v4168_v56 = vpop.f32.mrb[4].mxu0  ;;  %v2455_v15 = vmax.f32 %v2447_v7, 0.0  ;;  %v2520_v23 = vrot.slane %v5089_v46, 1 }
 0x202   : > { %v2516_v38 = vrot.slane %v5080_v41, 1  ;;  %v2517_v19 = vrot.slane %v5083_v17, 1  ;;  %v2411_v42 = vpop.f32.mrb[5].mxu0  ;;  %v2450_v16 = vadd.f32 %v4168_v56, %v3806_v44  ;;  %v2472_v0 = vrot.slane %v2456_v8, 7 }
 0x203   : > { %v2449_v18 = vadd.f32 %v3806_v44, %v2411_v42  ;;  %v2471_v12 = vrot.slane %v2455_v15, 7  ;;  %v2519_v27 = vrot.slane %v5086_v45, 1  ;;  %v2781_v60 = vrot.slane %v5080_v41, 2 }
 0x204   : > { %v5094_v20 = vsel %vm1289_vm2, %v2516_v38, %v2517_v19  ;;  %v2458_v26 = vmax.f32 %v2450_v16, 0.0  ;;  %v5106_v39 = vsel %vm1253_vm1, 0.0, %v2472_v0  ;;  %v5109_v32 = vsel %vm1253_vm1, %v2472_v0, 0.0 }
 0x205   : > { %v4171_v14 = vpop.f32.mrb[6].mxu0  ;;  %4175 = vmatmul.mubr.msk.f32.vlgmr.msra.gmra.mrb[0].mxu1 %vm2538_vm13, %v5094_v20  ;;  %v2457_v30 = vmax.f32 %v2449_v18, 0.0  ;;  %v5112_v29 = vsel %vm1253_vm1, %v2471_v12, 0.0  ;;  %v5115_v6 = vsel %vm1253_vm1, 0.0, %v2471_v12  ;;  %v5118_v51 = vsel %vm1289_vm2, %v2519_v27, %v2520_v23  ;;  %v3172_v27 = vld [vmem:[%s5364_s3 + $0x28] sm:$0xff] }
 0x206   : > { %v5103_v31 = vadd.f32 %v4171_v14, %v3806_v44  ;;  %4187 = vmatpush3.msra.mxu1 %v2501_v11  ;;  %v2421_v33 = vpop.f32.mrb[7].mxu0  ;;  %v2474_v43 = vrot.slane %v2458_v26, 7  ;;  %4177 = vmatprep.mubr.msk.f32.mxu1 %vm2538_vm13, %v5118_v51  ;;  %v2523_v24 = vrot.slane %v5112_v29, 1  ;;  %v2526_v58 = vrot.slane %v5109_v32, 1 }
 0x207   : > { %v2451_v35 = vadd.f32 %v3806_v44, %v2421_v33  ;;  %4200 = vmatprep.subr.mxu1 %v2802_v21  ;;  %v2473_v25 = vrot.slane %v2457_v30, 7  ;;  %v2522_v40 = vrot.slane %v5115_v6, 1  ;;  %v2525_v36 = vrot.slane %v5106_v39, 1 }
 0x208   : > { %v5133_v59 = vsel %vm1253_vm1, 0.0, %v2474_v43  ;;  %v2498_v37 = vsel %vm1253_vm1, %v2474_v43, 0.0  ;;  %v2782_v28 = vrot.slane %v5083_v17, 2  ;;  %v2785_v47 = vrot.slane %v5089_v46, 2  ;;  %v3053_v17 = vld [vmem:[%s5364_s3 + $0x20] sm:$0xff] }
 0x209   : > { %v2459_v49 = vmax.f32 %v2451_v35, 0.0  ;;  %v5121_v52 = vsel %vm1253_vm1, 0.0, %v2473_v25  ;;  %v5124_v53 = vsel %vm1253_vm1, %v2473_v25, 0.0  ;;  %v5143_v2 = vsel %vm1289_vm2, %v2522_v40, %v2523_v24  ;;  %v3402_v25 = vld [vmem:[%s5364_s3 + $0x38] sm:$0xff]  ;;  %v3516_v24 = vld [vmem:[%s5364_s3 + $0x40] sm:$0xff] }
 0x20a   : > { %v2529_v63 = vrot.slane %v5124_v53, 1  ;;  %v2528_v50 = vrot.slane %v5121_v52, 1  ;;  %v2532_v3 = vrot.slane %v2498_v37, 1  ;;  %4178 = vmatmul.mubr.msk.f32.gmra.mrb[2].mxu1 %vm2538_vm13, %v5143_v2  ;;  %v5148_v11 = vsel %vm1289_vm2, %v2525_v36, %v2526_v58 }
 0x20b   : > { %v2475_v55 = vrot.slane %v2459_v49, 7  ;;  %v2531_v44 = vrot.slane %v5133_v59, 1  ;;  %4180 = vmatprep.mubr.msk.f32.mxu1 %vm2538_vm13, %v5148_v11  ;;  %v2784_v61 = vrot.slane %v5086_v45, 2  ;;  %v2788_v4 = vrot.slane %v5112_v29, 2 }
 0x20c   : > { %v5154_v22 = vsel %vm1289_vm2, %v2528_v50, %v2529_v63  ;;  %v2783_v7 = vsel %vm1564_vm12, %v2781_v60, %v2782_v28  ;;  %v2787_v8 = vrot.slane %v5115_v6, 2  ;;  %v2791_v56 = vrot.slane %v5109_v32, 2 }
 0x20d   : > { %v5139_v54 = vsel %vm1253_vm1, 0.0, %v2475_v55  ;;  %v2499_v1 = vsel %vm1253_vm1, %v2475_v55, 0.0  ;;  %v5160_v10 = vsel %vm1289_vm2, %v2531_v44, %v2532_v3  ;;  %v5203_v46 = vsel %vm1564_vm12, %v2784_v61, %v2785_v47 }
 0x20e   : > { %v2535_v57 = vrot.slane %v2499_v1, 1  ;;  %v2534_v34 = vrot.slane %v5139_v54, 1  ;;  %4181 = vmatmul.mubr.msk.f32.gmra.mrb[4].mxu1 %vm2538_vm13, %v5154_v22  ;;  %v2790_v38 = vrot.slane %v5106_v39, 2  ;;  %v2794_v19 = vrot.slane %v5124_v53, 2 }
 0x20f   : > { %4183 = vmatprep.mubr.msk.f32.mxu1 %vm2538_vm13, %v5160_v10  ;;  %v5210_v42 = vsel %vm1564_vm12, %v2787_v8, %v2788_v4  ;;  %v2793_v15 = vrot.slane %v5121_v52, 2  ;;  %v2797_v16 = vrot.slane %v2498_v37, 2  ;;  %v2796_v0 = vrot.slane %v5133_v59, 2 }
 0x210   : > { %v5165_v62 = vsel %vm1289_vm2, %v2534_v34, %v2535_v57  ;;  %v5216_v18 = vsel %vm1564_vm12, %v2790_v38, %v2791_v56  ;;  %v2799_v12 = vrot.slane %v5139_v54, 2  ;;  %v2460_v30 = vmax.f32 %v5103_v31, 0.0  ;;  %v3288_v31 = vld [vmem:[%s5364_s3 + $0x30] sm:$0xff] }
 0x211   : > { %v5222_v23 = vsel %vm1564_vm12, %v2793_v15, %v2794_v19  ;;  %v5228_v26 = vsel %vm1564_vm12, %v2796_v0, %v2797_v16 }
 0x212   : > { %4184 = vmatmul.mubr.msk.f32.gmra.mrb[6].mxu1 %vm2538_vm13, %v5165_v62 }
 0x213   : > { %4188 = vmatprep.mubr.msk.f32.mxu1 %vm2538_vm13, %v4496_v5 }
 0x216   : > { %4189 = vmatmul.mubr.msk.f32.vlgmr.msra.gmra.mrb[0].mxu1 %vm2538_vm13, %v5080_v41 }
 0x217   : > { %4201 = vmatpush3.msra.mxu1 %v2802_v21  ;;  %4191 = vmatprep.mubr.msk.f32.mxu1 %vm2538_vm13, %v5086_v45  ;;  %v2800_v21 = vrot.slane %v2499_v1, 2 }
 0x218   : > { %4214 = vmatprep.subr.mxu1 %v2932_v9 }
 0x219   : > { %v5233_v14 = vsel %vm1564_vm12, %v2799_v12, %v2800_v21 }
 0x21a   : > { %4192 = vmatmul.mubr.msk.f32.gmra.mrb[2].mxu1 %vm2538_vm13, %v5115_v6 }
 0x21b   : > { %4194 = vmatprep.mubr.msk.f32.mxu1 %vm2538_vm13, %v5106_v39 }
 0x21e   : > { %4195 = vmatmul.mubr.msk.f32.gmra.mrb[4].mxu1 %vm2538_vm13, %v5121_v52 }
 0x21f   : > { %4197 = vmatprep.mubr.msk.f32.mxu1 %vm2538_vm13, %v5133_v59 }
 0x222   : > { %4198 = vmatmul.mubr.msk.f32.gmra.mrb[6].mxu1 %vm2538_vm13, %v5139_v54 }
 0x223   : > { %4202 = vmatprep.mubr.msk.f32.mxu1 %vm2538_vm13, %v4889_v48 }
 0x226   : > { %4203 = vmatmul.mubr.msk.f32.vlgmr.msra.gmra.mrb[0].mxu1 %vm2538_vm13, %v2783_v7 }
 0x227   : > { %4215 = vmatpush3.msra.mxu1 %v2932_v9  ;;  %4205 = vmatprep.mubr.msk.f32.mxu1 %vm2538_vm13, %v5203_v46 }
 0x228   : > { %4228 = vmatprep.subr.mxu1 %v3053_v17 }
 0x22a   : > { %4206 = vmatmul.mubr.msk.f32.gmra.mrb[2].mxu1 %vm2538_vm13, %v5210_v42 }
 0x22b   : > { %4208 = vmatprep.mubr.msk.f32.mxu1 %vm2538_vm13, %v5216_v18 }
 0x22e   : > { %4209 = vmatmul.mubr.msk.f32.gmra.mrb[4].mxu1 %vm2538_vm13, %v5222_v23 }
 0x22f   : > { %4211 = vmatprep.mubr.msk.f32.mxu1 %vm2538_vm13, %v5228_v26 }
 0x232   : > { %4212 = vmatmul.mubr.msk.f32.gmra.mrb[6].mxu1 %vm2538_vm13, %v5233_v14 }
 0x233   : > { %4216 = vmatprep.mubr.msk.f32.mxu1 %vm2538_vm13, %v5080_v41  ;;  %v2476_v41 = vrot.slane %v2460_v30, 7 }
 0x235   : > { %v2492_v33 = vsel %vm1253_vm1, 0.0, %v2476_v41  ;;  %v2500_v35 = vsel %vm1253_vm1, %v2476_v41, 0.0 }
 0x236   : > { %4217 = vmatmul.mubr.msk.f32.vlgmr.msra.gmra.mrb[0].mxu1 %vm2538_vm13, %v5086_v45  ;;  %v3050_v32 = vrot.slane %v2492_v33, 1  ;;  %v3170_v43 = vrot.slane %v2500_v35, 2  ;;  %v3169_v49 = vrot.slane %v2492_v33, 2 }
 0x237   : > { %4229 = vmatpush3.msra.mxu1 %v3053_v17  ;;  %4219 = vmatprep.mubr.msk.f32.mxu1 %vm2538_vm13, %v5115_v6 }
 0x238   : > { %4242 = vmatprep.subr.mxu1 %v3172_v27  ;;  %v3171_v53 = vsel %vm1564_vm12, %v3169_v49, %v3170_v43 }
 0x23a   : > { %4220 = vmatmul.mubr.msk.f32.gmra.mrb[2].mxu1 %vm2538_vm13, %v5106_v39 }
 0x23b   : > { %4222 = vmatprep.mubr.msk.f32.mxu1 %vm2538_vm13, %v5121_v52 }
 0x23e   : > { %4223 = vmatmul.mubr.msk.f32.gmra.mrb[4].mxu1 %vm2538_vm13, %v5133_v59 }
 0x23f   : > { %4225 = vmatprep.mubr.msk.f32.mxu1 %vm2538_vm13, %v5139_v54 }
 0x242   : > { %4226 = vmatmul.mubr.msk.f32.gmra.mrb[6].mxu1 %vm2538_vm13, %v2492_v33 }
 0x243   : > { %4230 = vmatprep.mubr.msk.f32.mxu1 %vm2538_vm13, %v5094_v20  ;;  %v3051_v20 = vrot.slane %v2500_v35, 1 }
 0x245   : > { %v3052_v29 = vsel %vm1289_vm2, %v3050_v32, %v3051_v20 }
 0x246   : > { %4231 = vmatmul.mubr.msk.f32.vlgmr.msra.gmra.mrb[0].mxu1 %vm2538_vm13, %v5118_v51 }
 0x247   : > { %4243 = vmatpush3.msra.mxu1 %v3172_v27  ;;  %4233 = vmatprep.mubr.msk.f32.mxu1 %vm2538_vm13, %v5143_v2 }
 0x248   : > { %4256 = vmatprep.subr.mxu1 %v3288_v31 }
 0x24a   : > { %4234 = vmatmul.mubr.msk.f32.gmra.mrb[2].mxu1 %vm2538_vm13, %v5148_v11 }
 0x24b   : > { %4236 = vmatprep.mubr.msk.f32.mxu1 %vm2538_vm13, %v5154_v22 }
 0x24e   : > { %4237 = vmatmul.mubr.msk.f32.gmra.mrb[4].mxu1 %vm2538_vm13, %v5160_v10 }
 0x24f   : > { %4239 = vmatprep.mubr.msk.f32.mxu1 %vm2538_vm13, %v5165_v62 }
 0x252   : > { %4240 = vmatmul.mubr.msk.f32.gmra.mrb[6].mxu1 %vm2538_vm13, %v3052_v29 }
 0x253   : > { %4244 = vmatprep.mubr.msk.f32.mxu1 %vm2538_vm13, %v2783_v7 }
 0x256   : > { %4245 = vmatmul.mubr.msk.f32.vlgmr.msra.gmra.mrb[0].mxu1 %vm2538_vm13, %v5203_v46 }
 0x257   : > { %4257 = vmatpush3.msra.mxu1 %v3288_v31  ;;  %4247 = vmatprep.mubr.msk.f32.mxu1 %vm2538_vm13, %v5210_v42 }
 0x258   : > { %4270 = vmatprep.subr.mxu1 %v3402_v25 }
 0x25a   : > { %4248 = vmatmul.mubr.msk.f32.gmra.mrb[2].mxu1 %vm2538_vm13, %v5216_v18 }
 0x25b   : > { %4250 = vmatprep.mubr.msk.f32.mxu1 %vm2538_vm13, %v5222_v23 }
 0x25e   : > { %4251 = vmatmul.mubr.msk.f32.gmra.mrb[4].mxu1 %vm2538_vm13, %v5228_v26 }
 0x25f   : > { %4253 = vmatprep.mubr.msk.f32.mxu1 %vm2538_vm13, %v5233_v14 }
 0x262   : > { %4254 = vmatmul.mubr.msk.f32.gmra.mrb[6].mxu1 %vm2538_vm13, %v3171_v53 }
 0x263   : > { %4258 = vmatprep.mubr.msk.f32.mxu1 %vm2538_vm13, %v5086_v45 }
 0x266   : > { %4259 = vmatmul.mubr.msk.f32.vlgmr.msra.gmra.mrb[0].mxu1 %vm2538_vm13, %v5115_v6 }
 0x267   : > { %4271 = vmatpush3.msra.mxu1 %v3402_v25  ;;  %4261 = vmatprep.mubr.msk.f32.mxu1 %vm2538_vm13, %v5106_v39 }
 0x268   : > { %4284 = vmatprep.subr.mxu1 %v3516_v24 }
 0x26a   : > { %4262 = vmatmul.mubr.msk.f32.gmra.mrb[2].mxu1 %vm2538_vm13, %v5121_v52 }
 0x26b   : > { %4264 = vmatprep.mubr.msk.f32.mxu1 %vm2538_vm13, %v5133_v59 }
 0x26e   : > { %4265 = vmatmul.mubr.msk.f32.gmra.mrb[4].mxu1 %vm2538_vm13, %v5139_v54 }
 0x26f   : > { %4267 = vmatprep.mubr.msk.f32.mxu1 %vm2538_vm13, %v2492_v33 }
 0x272   : > { %4268 = vmatmul.mubr.msk.f32.gmra.mrb[6].mxu1 %vm2538_vm13, %v4496_v5  ;;  %v3879_v5 = vld [vmem:[%s5365_s4] ss:$0 sm:$0xff] }
 0x273   : > { %4272 = vmatprep.mubr.msk.f32.mxu1 %vm2538_vm13, %v5118_v51 }
 0x276   : > { %4273 = vmatmul.mubr.msk.f32.vlgmr.msra.gmra.mrb[0].mxu1 %vm2538_vm13, %v5143_v2 }
 0x277   : > { %4285 = vmatpush3.msra.mxu1 %v3516_v24  ;;  %4275 = vmatprep.mubr.msk.f32.mxu1 %vm2538_vm13, %v5148_v11 }
 0x27a   : > { %4276 = vmatmul.mubr.msk.f32.gmra.mrb[2].mxu1 %vm2538_vm13, %v5154_v22 }
 0x27b   : > { %4278 = vmatprep.mubr.msk.f32.mxu1 %vm2538_vm13, %v5160_v10 }
 0x27e   : > { %4279 = vmatmul.mubr.msk.f32.gmra.mrb[4].mxu1 %vm2538_vm13, %v5165_v62 }
 0x27f   : > { %4281 = vmatprep.mubr.msk.f32.mxu1 %vm2538_vm13, %v3052_v29 }
 0x282   : > { %4282 = vmatmul.mubr.msk.f32.gmra.mrb[6].mxu1 %vm2538_vm13, %v4509_v13 }
 0x283   : > { %4286 = vmatprep.mubr.msk.f32.mxu1 %vm2538_vm13, %v5203_v46 }
 0x286   : > { %4287 = vmatmul.mubr.msk.f32.vlgmr.msra.gmra.mrb[0].mxu1 %vm2538_vm13, %v5210_v42 }
 0x287   : > { %4289 = vmatprep.mubr.msk.f32.mxu1 %vm2538_vm13, %v5216_v18 }
 0x28a   : > { %4290 = vmatmul.mubr.msk.f32.gmra.mrb[2].mxu1 %vm2538_vm13, %v5222_v23 }
 0x28b   : > { %4292 = vmatprep.mubr.msk.f32.mxu1 %vm2538_vm13, %v5228_v26 }
 0x28e   : > { %4293 = vmatmul.mubr.msk.f32.gmra.mrb[4].mxu1 %vm2538_vm13, %v5233_v14 }
 0x28f   : > { %4295 = vmatprep.mubr.msk.f32.mxu1 %vm2538_vm13, %v3171_v53 }
 0x292   : > { %4296 = vmatmul.mubr.msk.f32.gmra.mrb[6].mxu1 %vm2538_vm13, %v4889_v48 }
 0x359   : > { %v4288_v13 = vpop.f32.mrb[0].mxu1 }
 0x35a   : > { %v3638_v45 = vadd.f32 %v4288_v13, %v3879_v5  ;;  %v3583_v39 = vpop.f32.mrb[1].mxu1 }
 0x35b   : > { %v3637_v6 = vadd.f32 %v3879_v5, %v3583_v39 }
 0x35c   : > { %v3646_v51 = vmax.f32 %v3638_v45, 0.0 }
 0x35d   : > { %v3645_v52 = vmax.f32 %v3637_v6, 0.0  ;;  %v4291_v55 = vpop.f32.mrb[2].mxu1 }
 0x35e   : > { %3654 = vst.msk [vmem:[%s224_s23 + $0x8] sm:$0xff] %vm2538_vm13, %v3646_v51  ;;  %v3640_v58 = vadd.f32 %v4291_v55, %v3879_v5  ;;  %v3593_v48 = vpop.f32.mrb[3].mxu1 }
 0x35f   : > { %3653 = vst.msk [vmem:[%s224_s23] sm:$0xff] %vm2538_vm13, %v3645_v52  ;;  %v3639_v40 = vadd.f32 %v3879_v5, %v3593_v48 }
 0x360   : > { %v3648_v36 = vmax.f32 %v3640_v58, 0.0 }
 0x361   : > { %v3647_v59 = vmax.f32 %v3639_v40, 0.0  ;;  %v4294_v37 = vpop.f32.mrb[4].mxu1 }
 0x362   : > { %3656 = vst.msk [vmem:[%s224_s23 + $0x18] sm:$0xff] %vm2538_vm13, %v3648_v36  ;;  %v3642_v63 = vadd.f32 %v4294_v37, %v3879_v5  ;;  %v3603_v50 = vpop.f32.mrb[5].mxu1 }
 0x363   : > { %3655 = vst.msk [vmem:[%s224_s23 + $0x10] sm:$0xff] %vm2538_vm13, %v3647_v59  ;;  %v3641_v54 = vadd.f32 %v3879_v5, %v3603_v50 }
 0x364   : > { %v3650_v1 = vmax.f32 %v3642_v63, 0.0 }
 0x365   : > { %v3649_v2 = vmax.f32 %v3641_v54, 0.0  ;;  %v4297_v3 = vpop.f32.mrb[6].mxu1 }
 0x366   : > { %3658 = vst.msk [vmem:[%s224_s23 + $0x28] sm:$0xff] %vm2538_vm13, %v3650_v1  ;;  %v3644_v11 = vadd.f32 %v4297_v3, %v3879_v5  ;;  %v3613_v44 = vpop.f32.mrb[7].mxu1 }
 0x367   : > { %3657 = vst.msk [vmem:[%s224_s23 + $0x20] sm:$0xff] %vm2538_vm13, %v3649_v2  ;;  %v3643_v57 = vadd.f32 %v3879_v5, %v3613_v44 }
 0x368   : > { %v3652_v22 = vmax.f32 %v3644_v11, 0.0 }
 0x369   : > { %v3651_v34 = vmax.f32 %v3643_v57, 0.0 }
 0x36a   : > { %3660 = vst.msk [vmem:[%s224_s23 + $0x38] sm:$0xff] %vm2538_vm13, %v3652_v22 }
 0x36b   : > { %3659 = vst.msk [vmem:[%s224_s23 + $0x30] sm:$0xff] %vm2538_vm13, %v3651_v34 }
 0x36c PF: > { %s15_s18 = sadd.s32 1, %s4443_s18  }
 0x36d   : > { %p12_p4 = scmp.ge.s32.totalorder %s15_s18, 4  }
 0x36f   :  { %14 = sbr.rel (!%p12_p4) target bundleno = 1 (0x1), region = 70 }

</bundles_post_ra>
